<compile_context>
chip_gen: v5e
topology: v5e:2x2
jax: 0.10.0
libtpu: 0.0.40
codegen_flags: <defaults>
</compile_context>

<pallas_src>
import functools

import numpy as np
import jax
import jax.numpy as jnp
from jax import lax
from jax.experimental import pallas as pl
from jax.experimental.pallas import tpu as pltpu

EXPANSION = 4
BN_EPS = 1e-5


# --------------------------------------------------------------------------- #
# In-kernel helpers.
# --------------------------------------------------------------------------- #
def _avg_pool_flat(a, b, h, w, c, s):
    """AvgPool2d(kernel=s, stride=s), floor mode, on a (b*h*w, c) value.

    Pure reshape/add reduction (no pooling matrix); all intermediates rank<=4.
    Returns (b * (h//s) * (w//s), c).
    """
    if s == 1:
        return a
    ho, wo = h // s, w // s
    a = a.reshape(b, h, w, c)[:, :ho * s, :wo * s, :]
    a = a.reshape(b * ho * s, wo, s, c)               # group the W window
    acc = a[:, :, 0, :]
    for k in range(1, s):
        acc = acc + a[:, :, k, :]                     # (b*ho*s, wo, c)
    acc = acc.reshape(b * ho, s, wo, c)               # group the H window
    out = acc[:, 0]
    for k in range(1, s):
        out = out + acc[:, k]                         # (b*ho, wo, c)
    return (out * (1.0 / (s * s))).reshape(b * ho * wo, c)


# --------------------------------------------------------------------------- #
# Pallas kernel: whole bottleneck block for one batch-block per grid step.
# --------------------------------------------------------------------------- #
def _bottleneck_kernel(*refs, stride, has_downsample, compute_dtype):
    if has_downsample:
        (x_ref, w1_ref, s1_ref, b1_ref, w2_ref, s2_ref, b2_ref,
         w3_ref, s3_ref, b3_ref, wd_ref, sd_ref, bd_ref, o_ref, pad_ref) = refs
    else:
        (x_ref, w1_ref, s1_ref, b1_ref, w2_ref, s2_ref, b2_ref,
         w3_ref, s3_ref, b3_ref, o_ref, pad_ref) = refs
        wd_ref = sd_ref = bd_ref = None

    B, H, W, Cin = x_ref.shape
    P = w1_ref.shape[1]
    C4 = w3_ref.shape[1]
    Ho, Wo = o_ref.shape[1], o_ref.shape[2]
    M = B * H * W
    cdt = compute_dtype

    x_flat = x_ref[...].reshape(M, Cin)                       # compute dtype

    # ---- conv1 (1x1) + bn1 + relu -------------------------------------------
    h1 = jnp.dot(x_flat, w1_ref[...], preferred_element_type=jnp.float32)
    h1 = jnp.maximum(h1 * s1_ref[...] + b1_ref[...], 0.0)     # (M, P) f32

    # ---- conv2 (3x3, pad=1) + bn2 + relu as ONE (M, 9P) x (9P, P) matmul ------
    # Scratch is padded along H only (leading axis), in compute_dtype, so the
    # interior write and every row-tap read are sublane-aligned / lane-dense.
    # The halo rows are re-zeroed every step (two tiny aligned stores): the
    # scratch is per-core and uninitialized, and with "parallel" megacore
    # splitting program_id==0 does not run on every core.
    zero_row = jnp.zeros((B, 1, W, P), cdt)
    pad_ref[:, 0:1, :, :] = zero_row
    pad_ref[:, H + 1:H + 2, :, :] = zero_row
    pad_ref[:, 1:H + 1, :, :] = h1.astype(cdt).reshape(B, H, W, P)

    # Build the im2col patch operand: (dy, dx, cin)-major channel order matches
    # the wrapper's (3, 3, P, P) -> (9P, P) weight reshape.  The +/-1 W shift is
    # done in-register (zero-column concat), not via misaligned scratch slices.
    zcol = jnp.zeros((B, H, 1, P), cdt)
    taps = []
    for dy in range(3):
        t = pad_ref[:, dy:dy + H, :, :]                               # aligned read
        west = jnp.concatenate([zcol, t[:, :, :W - 1, :]], axis=2)    # dx = 0
        east = jnp.concatenate([t[:, :, 1:, :], zcol], axis=2)        # dx = 2
        taps += [west, t, east]
    patches = jnp.concatenate(taps, axis=3).reshape(M, 9 * P)         # (M, 9P)

    h2 = jnp.dot(patches, w2_ref[...], preferred_element_type=jnp.float32)
    h2 = jnp.maximum(h2 * s2_ref[...] + b2_ref[...], 0.0)             # (M, P) f32

    # ---- avgpool(stride) (reshape/add reduction) ------------------------------
    h2p = _avg_pool_flat(h2, B, H, W, P, stride)                      # (B*Ho*Wo, P)

    # ---- conv3 (1x1) + bn3 ----------------------------------------------------
    h3 = jnp.dot(h2p.astype(cdt), w3_ref[...], preferred_element_type=jnp.float32)
    h3 = h3 * s3_ref[...] + b3_ref[...]                               # (B*Ho*Wo, C4)

    # ---- identity / downsample (avgpool -> 1x1 conv -> bn) --------------------
    if has_downsample:
        xp = _avg_pool_flat(x_flat, B, H, W, Cin, stride)             # (B*Ho*Wo, Cin)
        idn = jnp.dot(xp, wd_ref[...], preferred_element_type=jnp.float32)
        idn = idn * sd_ref[...] + bd_ref[...]
    else:
        idn = x_flat.astype(jnp.float32)                              # Cin==C4, stride==1

    out = jnp.maximum(h3 + idn, 0.0)
    o_ref[...] = out.reshape(B, Ho, Wo, C4).astype(o_ref.dtype)


# --------------------------------------------------------------------------- #
# Glue: parameter folding + pallas_call wrapper.
# --------------------------------------------------------------------------- #
def _fold_bn(gamma, beta, mean, var):
    scale = gamma / jnp.sqrt(var + BN_EPS)
    bias = beta - mean * scale
    return scale[None, :].astype(jnp.float32), bias[None, :].astype(jnp.float32)


def _auto_batch_block(n, rows_per_image):
    """Pick the per-step batch block: keep >=2 grid steps when possible (so both
    v7x TensorCores get work) and otherwise grow until the matmul M dim is deep
    enough to amortize per-step overhead at small spatial sizes."""
    divisors = [d for d in range(1, n + 1) if n % d == 0]
    cands = [d for d in divisors if n // d >= 2] or divisors
    for d in cands:
        if d * rows_per_image >= 256:
            return d
    return cands[-1]


def bottleneck_pallas_nhwc(x_nhwc, params, stride, compute_dtype=jnp.bfloat16,
                           out_dtype=jnp.float32, batch_block=None):
    N, H, W, Cin = x_nhwc.shape
    P = params["conv1_w"].shape[0]
    C4 = P * EXPANSION
    has_ds = (stride > 1) or (Cin != C4)
    Ho, Wo = (H // stride, W // stride) if stride > 1 else (H, W)

    if batch_block is None:
        batch_block = _auto_batch_block(N, H * W)
    assert N % batch_block == 0, "batch_block must divide the batch size"
    B = batch_block

    # Activations travel in compute_dtype (bf16 halves x HBM traffic and the
    # double-buffered VMEM footprint); chained blocks can also request a bf16
    # output via out_dtype.
    x = x_nhwc.astype(compute_dtype)

    # conv weights: torch (Cout, Cin, kh, kw) -> matmul-friendly layouts.
    w1 = params["conv1_w"][:, :, 0, 0].T.astype(compute_dtype)                 # (Cin, P)
    w2 = jnp.transpose(params["conv2_w"], (2, 3, 1, 0)).reshape(9 * P, P)      # (9P, P)
    w2 = w2.astype(compute_dtype)                                              # (dy,dx,cin)-major
    w3 = params["conv3_w"][:, :, 0, 0].T.astype(compute_dtype)                 # (P, C4)
    s1, b1 = _fold_bn(params["bn1_g"], params["bn1_b"], params["bn1_m"], params["bn1_v"])
    s2, b2 = _fold_bn(params["bn2_g"], params["bn2_b"], params["bn2_m"], params["bn2_v"])
    s3, b3 = _fold_bn(params["bn3_g"], params["bn3_b"], params["bn3_m"], params["bn3_v"])

    def full(shape):
        r = len(shape)
        return pl.BlockSpec(shape, lambda n, _r=r: (0,) * _r)

    operands = [x, w1, s1, b1, w2, s2, b2, w3, s3, b3]
    in_specs = [
        pl.BlockSpec((B, H, W, Cin), lambda n: (n, 0, 0, 0)),                  # x (batch block)
        full((Cin, P)), full((1, P)), full((1, P)),                            # conv1 / bn1
        full((9 * P, P)), full((1, P)), full((1, P)),                          # conv2 / bn2
        full((P, C4)), full((1, C4)), full((1, C4)),                           # conv3 / bn3
    ]
    if has_ds:                                                                 # only DMA'd when used
        wd = params["convd_w"][:, :, 0, 0].T.astype(compute_dtype)             # (Cin, C4)
        sd, bd = _fold_bn(params["bnd_g"], params["bnd_b"], params["bnd_m"], params["bnd_v"])
        operands += [wd, sd, bd]
        in_specs += [full((Cin, C4)), full((1, C4)), full((1, C4))]

    kernel = functools.partial(_bottleneck_kernel, stride=stride,
                               has_downsample=has_ds, compute_dtype=compute_dtype)

    # Cost estimate for XLA scheduling around the custom call.
    flops = 2 * H * W * Cin * P + 2 * H * W * (9 * P) * P + 2 * Ho * Wo * P * C4
    if has_ds:
        flops += 2 * Ho * Wo * Cin * C4
    flops *= N
    out_itemsize = jnp.dtype(out_dtype).itemsize
    bytes_accessed = sum(int(np.prod(a.shape)) * a.dtype.itemsize for a in operands)
    bytes_accessed += N * Ho * Wo * C4 * out_itemsize
    cost = pl.CostEstimate(flops=int(flops), transcendentals=0,
                           bytes_accessed=int(bytes_accessed))

    # Rough per-step VMEM estimate; only raise the scoped limit when needed.
    c_itemsize = jnp.dtype(compute_dtype).itemsize
    weight_bytes = sum(int(np.prod(a.shape)) * a.dtype.itemsize for a in operands[1:])
    est_vmem = (2 * B * H * W * Cin * c_itemsize            # x block (double-buffered)
                + 2 * B * Ho * Wo * C4 * out_itemsize       # out block (double-buffered)
                + 2 * weight_bytes                          # weights / BN (double-buffered)
                + B * (H + 2) * W * P * c_itemsize          # conv2 halo scratch
                + B * H * W * 9 * P * c_itemsize            # im2col patch value
                + 3 * B * H * W * P * 4)                    # f32 h1/h2/pool intermediates
    compiler_kwargs = dict(dimension_semantics=("parallel",))
    if est_vmem > (32 << 20):
        # TODO(synk): per-chip budget (v7x: 64 MiB physical VMEM) and
        # pl.Buffered(1) single-buffering of the grid-invariant weights.
        compiler_kwargs["vmem_limit_bytes"] = int(min(100 << 20, (est_vmem * 3) // 2))

    grid_spec = pltpu.PrefetchScalarGridSpec(
        num_scalar_prefetch=0,
        grid=(N // B,),
        in_specs=in_specs,
        out_specs=pl.BlockSpec((B, Ho, Wo, C4), lambda n: (n, 0, 0, 0)),
        scratch_shapes=[pltpu.VMEM((B, H + 2, W, P), compute_dtype)],
    )

    return pl.pallas_call(
        kernel,
        out_shape=jax.ShapeDtypeStruct((N, Ho, Wo, C4), out_dtype),
        grid_spec=grid_spec,
        compiler_params=pltpu.CompilerParams(**compiler_kwargs),
        cost_estimate=cost,
    )(*operands)


def bottleneck_pallas(x_nchw, params, stride, compute_dtype=jnp.bfloat16,
                      out_dtype=jnp.float32, batch_block=None):
    # NCHW wrapper for torch-layout parity; chain bottleneck_pallas_nhwc
    # directly between consecutive blocks to avoid these HBM transposes.
    x = jnp.transpose(x_nchw, (0, 2, 3, 1))
    out = bottleneck_pallas_nhwc(x, params, stride, compute_dtype, out_dtype,
                                 batch_block)
    return jnp.transpose(out, (0, 3, 1, 2))


# --------------------------------------------------------------------------- #
# Deterministic parameter init (shapes from Bottleneck.__init__).
# --------------------------------------------------------------------------- #
def init_params(key, inplanes, planes, stride):
    C4 = planes * EXPANSION
    keys = jax.random.split(key, 8)

    def conv(k, cout, cin, kh, kw):
        return 0.1 * jax.random.normal(k, (cout, cin, kh, kw), jnp.float32)

    def bn(k, c):
        kg, kb, km, kv = jax.random.split(k, 4)
        return (1.0 + 0.1 * jax.random.normal(kg, (c,), jnp.float32),
                0.1 * jax.random.normal(kb, (c,), jnp.float32),
                0.1 * jax.random.normal(km, (c,), jnp.float32),
                0.5 + jax.random.uniform(kv, (c,), jnp.float32))

    p = {}
    p["conv1_w"] = conv(keys[0], planes, inplanes, 1, 1)
    p["bn1_g"], p["bn1_b"], p["bn1_m"], p["bn1_v"] = bn(keys[1], planes)
    p["conv2_w"] = conv(keys[2], planes, planes, 3, 3)
    p["bn2_g"], p["bn2_b"], p["bn2_m"], p["bn2_v"] = bn(keys[3], planes)
    p["conv3_w"] = conv(keys[4], C4, planes, 1, 1)
    p["bn3_g"], p["bn3_b"], p["bn3_m"], p["bn3_v"] = bn(keys[5], C4)
    if stride > 1 or inplanes != C4:
        p["convd_w"] = conv(keys[6], C4, inplanes, 1, 1)
        p["bnd_g"], p["bnd_b"], p["bnd_m"], p["bnd_v"] = bn(keys[7], C4)
    return p


# --------------------------------------------------------------------------- #
# Pure-JAX reference (lax.conv / reduce_window) for correctness checking.
# --------------------------------------------------------------------------- #
def bottleneck_reference(x_nchw, p, stride):
    x = jnp.transpose(x_nchw, (0, 2, 3, 1)).astype(jnp.float32)
    dn = ("NHWC", "HWIO", "NHWC")

    def conv(h, w_torch, pad):
        w = jnp.transpose(w_torch, (2, 3, 1, 0))
        return lax.conv_general_dilated(h, w, (1, 1), ((pad, pad), (pad, pad)),
                                        dimension_numbers=dn)

    def bn(h, pref):
        s, b = _fold_bn(p[pref + "_g"], p[pref + "_b"], p[pref + "_m"], p[pref + "_v"])
        return h * s.reshape(1, 1, 1, -1) + b.reshape(1, 1, 1, -1)

    def avgpool(h, s):
        if s == 1:
            return h
        return lax.reduce_window(h, 0.0, lax.add, (1, s, s, 1),
                                 (1, s, s, 1), "VALID") / float(s * s)

    relu = lambda h: jnp.maximum(h, 0.0)
    out = relu(bn(conv(x, p["conv1_w"], 0), "bn1"))
    out = relu(bn(conv(out, p["conv2_w"], 1), "bn2"))
    out = avgpool(out, stride)
    out = bn(conv(out, p["conv3_w"], 0), "bn3")
    Cin, C4 = x.shape[-1], out.shape[-1]
    if stride > 1 or Cin != C4:
        idn = bn(conv(avgpool(x, stride), p["convd_w"], 0), "bnd")
    else:
        idn = x
    return jnp.transpose(relu(out + idn), (0, 3, 1, 2))


# --------------------------------------------------------------------------- #
if __name__ == "__main__":
    key = jax.random.PRNGKey(0)

    # --- Config A: stride=2 (avgpool + downsample branch) ---------------------
    N, inplanes, planes, H, W, stride = 2, 16, 8, 12, 12, 2
    key, kx, kp = jax.random.split(key, 3)
    x = jax.random.normal(kx, (N, inplanes, H, W), jnp.float32)   # NCHW like torch
    params = init_params(kp, inplanes, planes, stride)
    ref = bottleneck_reference(x, params, stride)

    out_f32 = jax.block_until_ready(bottleneck_pallas(x, params, stride, jnp.float32))
    np.testing.assert_allclose(np.asarray(out_f32), np.asarray(ref), rtol=5e-4, atol=5e-4)

    out_bf16 = jax.block_until_ready(bottleneck_pallas(x, params, stride))
    np.testing.assert_allclose(np.asarray(out_bf16), np.asarray(ref), rtol=5e-2, atol=5e-2)

    # Exercise the multi-image batch block path (B_blk=2, grid of 1).
    out_bb = jax.block_until_ready(bottleneck_pallas(x, params, stride, batch_block=2))
    np.testing.assert_allclose(np.asarray(out_bb), np.asarray(ref), rtol=5e-2, atol=5e-2)

    # --- Config B: stride=1, identity shortcut (no downsample branch) ---------
    N, inplanes, planes, H, W, stride = 2, 32, 8, 8, 8, 1
    key, kx, kp = jax.random.split(key, 3)
    x = jax.random.normal(kx, (N, inplanes, H, W), jnp.float32)
    params = init_params(kp, inplanes, planes, stride)
    ref = bottleneck_reference(x, params, stride)

    out_f32 = jax.block_until_ready(bottleneck_pallas(x, params, stride, jnp.float32))
    np.testing.assert_allclose(np.asarray(out_f32), np.asarray(ref), rtol=5e-4, atol=5e-4)

    out_bf16 = jax.block_until_ready(bottleneck_pallas(x, params, stride))
    np.testing.assert_allclose(np.asarray(out_bf16), np.asarray(ref), rtol=5e-2, atol=5e-2)

    print("KERNEL_OK")
</pallas_src>

<mosaic_0001>
module attributes {stable_mosaic.version = 11 : i64} {
  func.func @_bottleneck_kernel(%arg0: i32, %arg1: memref<1x12x12x16xf32, #tpu.memory_space<vmem>>, %arg2: memref<16x8xf32, #tpu.memory_space<vmem>>, %arg3: memref<1x8xf32, #tpu.memory_space<vmem>>, %arg4: memref<1x8xf32, #tpu.memory_space<vmem>>, %arg5: memref<72x8xf32, #tpu.memory_space<vmem>>, %arg6: memref<1x8xf32, #tpu.memory_space<vmem>>, %arg7: memref<1x8xf32, #tpu.memory_space<vmem>>, %arg8: memref<8x32xf32, #tpu.memory_space<vmem>>, %arg9: memref<1x32xf32, #tpu.memory_space<vmem>>, %arg10: memref<1x32xf32, #tpu.memory_space<vmem>>, %arg11: memref<16x32xf32, #tpu.memory_space<vmem>>, %arg12: memref<1x32xf32, #tpu.memory_space<vmem>>, %arg13: memref<1x32xf32, #tpu.memory_space<vmem>>, %arg14: memref<1x6x6x32xf32, #tpu.memory_space<vmem>>, %arg15: memref<1x14x12x8xf32, #tpu.memory_space<vmem>>) attributes {dimension_semantics = [#tpu.dimension_semantics<parallel>], iteration_bounds = array<i64: 2>, scalar_prefetch = 0 : i64, scratch_operands = 1 : i64, tpu.core_type = #tpu.core_type<tc>, window_params = [{transform_indices = @transform_0, window_bounds = array<i64: 1, 12, 12, 16>}, {pipeline_mode = #tpu.pipeline_mode<synchronous>, transform_indices = @transform_1, window_bounds = array<i64: 16, 8>}, {pipeline_mode = #tpu.pipeline_mode<synchronous>, transform_indices = @transform_2, window_bounds = array<i64: 1, 8>}, {pipeline_mode = #tpu.pipeline_mode<synchronous>, transform_indices = @transform_3, window_bounds = array<i64: 1, 8>}, {pipeline_mode = #tpu.pipeline_mode<synchronous>, transform_indices = @transform_4, window_bounds = array<i64: 72, 8>}, {pipeline_mode = #tpu.pipeline_mode<synchronous>, transform_indices = @transform_5, window_bounds = array<i64: 1, 8>}, {pipeline_mode = #tpu.pipeline_mode<synchronous>, transform_indices = @transform_6, window_bounds = array<i64: 1, 8>}, {pipeline_mode = #tpu.pipeline_mode<synchronous>, transform_indices = @transform_7, window_bounds = array<i64: 8, 32>}, {pipeline_mode = #tpu.pipeline_mode<synchronous>, transform_indices = @transform_8, window_bounds = array<i64: 1, 32>}, {pipeline_mode = #tpu.pipeline_mode<synchronous>, transform_indices = @transform_9, window_bounds = array<i64: 1, 32>}, {pipeline_mode = #tpu.pipeline_mode<synchronous>, transform_indices = @transform_10, window_bounds = array<i64: 16, 32>}, {pipeline_mode = #tpu.pipeline_mode<synchronous>, transform_indices = @transform_11, window_bounds = array<i64: 1, 32>}, {pipeline_mode = #tpu.pipeline_mode<synchronous>, transform_indices = @transform_12, window_bounds = array<i64: 1, 32>}, {transform_indices = @transform_13, window_bounds = array<i64: 1, 6, 6, 32>}]} {
    %c0 = arith.constant 0 : index
    %c0_0 = arith.constant 0 : index
    %c0_1 = arith.constant 0 : index
    %c0_2 = arith.constant 0 : index
    %0 = vector.load %arg1[%c0, %c0_0, %c0_1, %c0_2] : memref<1x12x12x16xf32, #tpu.memory_space<vmem>>, vector<1x12x12x16xf32>
    %1 = vector.shape_cast %0 : vector<1x12x12x16xf32> to vector<144x16xf32>
    %c0_3 = arith.constant 0 : index
    %c0_4 = arith.constant 0 : index
    %2 = vector.load %arg2[%c0_3, %c0_4] : memref<16x8xf32, #tpu.memory_space<vmem>>, vector<16x8xf32>
    %cst = arith.constant dense<0.000000e+00> : vector<144x8xf32>
    %3 = tpu.matmul %1, %2, %cst {dimension_numbers = #tpu.dot_dimension_numbers<[1], [0], [0], [1], [0, 0, 1, 1], [], []>} : vector<144x16xf32>, vector<16x8xf32>, vector<144x8xf32> -> vector<144x8xf32>
    %c0_5 = arith.constant 0 : index
    %c0_6 = arith.constant 0 : index
    %4 = vector.load %arg3[%c0_5, %c0_6] : memref<1x8xf32, #tpu.memory_space<vmem>>, vector<1x8xf32>
    %5 = vector.broadcast %4 : vector<1x8xf32> to vector<144x8xf32>
    %6 = arith.mulf %3, %5 : vector<144x8xf32>
    %c0_7 = arith.constant 0 : index
    %c0_8 = arith.constant 0 : index
    %7 = vector.load %arg4[%c0_7, %c0_8] : memref<1x8xf32, #tpu.memory_space<vmem>>, vector<1x8xf32>
    %8 = vector.broadcast %7 : vector<1x8xf32> to vector<144x8xf32>
    %9 = arith.addf %6, %8 : vector<144x8xf32>
    %cst_9 = arith.constant 0.000000e+00 : f32
    %10 = vector.broadcast %cst_9 : f32 to vector<144x8xf32>
    %11 = arith.maximumf %9, %10 : vector<144x8xf32>
    %cst_10 = arith.constant 0.000000e+00 : f32
    %12 = vector.broadcast %cst_10 : f32 to vector<1x1x12x8xf32>
    %c0_11 = arith.constant 0 : index
    %c0_12 = arith.constant 0 : index
    %c0_13 = arith.constant 0 : index
    %c0_14 = arith.constant 0 : index
    %13 = vector.load %arg15[%c0_11, %c0_12, %c0_13, %c0_14] : memref<1x14x12x8xf32, #tpu.memory_space<vmem>>, vector<1x1x12x8xf32>
    tpu.vector_store %arg15[%c0_11, %c0_12, %c0_13, %c0_14], %12 {strides = array<i32>} : memref<1x14x12x8xf32, #tpu.memory_space<vmem>>, vector<1x1x12x8xf32>,
    %c0_15 = arith.constant 0 : index
    %c13 = arith.constant 13 : index
    %c0_16 = arith.constant 0 : index
    %c0_17 = arith.constant 0 : index
    %14 = vector.load %arg15[%c0_15, %c13, %c0_16, %c0_17] : memref<1x14x12x8xf32, #tpu.memory_space<vmem>>, vector<1x1x12x8xf32>
    tpu.vector_store %arg15[%c0_15, %c13, %c0_16, %c0_17], %12 {strides = array<i32>} : memref<1x14x12x8xf32, #tpu.memory_space<vmem>>, vector<1x1x12x8xf32>,
    %15 = vector.shape_cast %11 : vector<144x8xf32> to vector<1x12x12x8xf32>
    %c0_18 = arith.constant 0 : index
    %c1 = arith.constant 1 : index
    %c0_19 = arith.constant 0 : index
    %c0_20 = arith.constant 0 : index
    %16 = vector.load %arg15[%c0_18, %c1, %c0_19, %c0_20] : memref<1x14x12x8xf32, #tpu.memory_space<vmem>>, vector<1x12x12x8xf32>
    tpu.vector_store %arg15[%c0_18, %c1, %c0_19, %c0_20], %15 {strides = array<i32>} : memref<1x14x12x8xf32, #tpu.memory_space<vmem>>, vector<1x12x12x8xf32>,
    %cst_21 = arith.constant 0.000000e+00 : f32
    %17 = vector.broadcast %cst_21 : f32 to vector<1x12x1x8xf32>
    %c0_22 = arith.constant 0 : index
    %c0_23 = arith.constant 0 : index
    %c0_24 = arith.constant 0 : index
    %c0_25 = arith.constant 0 : index
    %18 = vector.load %arg15[%c0_22, %c0_23, %c0_24, %c0_25] : memref<1x14x12x8xf32, #tpu.memory_space<vmem>>, vector<1x12x12x8xf32>
    %19 = vector.extract_strided_slice %18 {offsets = [0, 0, 0, 0], sizes = [1, 12, 11, 8], strides = [1, 1, 1, 1]} : vector<1x12x12x8xf32> to vector<1x12x11x8xf32>
    %20 = tpu.concatenate %17, %19 in 2 : vector<1x12x1x8xf32>, vector<1x12x11x8xf32> -> vector<1x12x12x8xf32>
    %21 = vector.extract_strided_slice %18 {offsets = [0, 0, 1, 0], sizes = [1, 12, 11, 8], strides = [1, 1, 1, 1]} : vector<1x12x12x8xf32> to vector<1x12x11x8xf32>
    %22 = tpu.concatenate %21, %17 in 2 : vector<1x12x11x8xf32>, vector<1x12x1x8xf32> -> vector<1x12x12x8xf32>
    %c0_26 = arith.constant 0 : index
    %c1_27 = arith.constant 1 : index
    %c0_28 = arith.constant 0 : index
    %c0_29 = arith.constant 0 : index
    %23 = vector.load %arg15[%c0_26, %c1_27, %c0_28, %c0_29] : memref<1x14x12x8xf32, #tpu.memory_space<vmem>>, vector<1x12x12x8xf32>
    %24 = vector.extract_strided_slice %23 {offsets = [0, 0, 0, 0], sizes = [1, 12, 11, 8], strides = [1, 1, 1, 1]} : vector<1x12x12x8xf32> to vector<1x12x11x8xf32>
    %25 = tpu.concatenate %17, %24 in 2 : vector<1x12x1x8xf32>, vector<1x12x11x8xf32> -> vector<1x12x12x8xf32>
    %26 = vector.extract_strided_slice %23 {offsets = [0, 0, 1, 0], sizes = [1, 12, 11, 8], strides = [1, 1, 1, 1]} : vector<1x12x12x8xf32> to vector<1x12x11x8xf32>
    %27 = tpu.concatenate %26, %17 in 2 : vector<1x12x11x8xf32>, vector<1x12x1x8xf32> -> vector<1x12x12x8xf32>
    %c0_30 = arith.constant 0 : index
    %c2 = arith.constant 2 : index
    %c0_31 = arith.constant 0 : index
    %c0_32 = arith.constant 0 : index
    %28 = vector.load %arg15[%c0_30, %c2, %c0_31, %c0_32] : memref<1x14x12x8xf32, #tpu.memory_space<vmem>>, vector<1x12x12x8xf32>
    %29 = vector.extract_strided_slice %28 {offsets = [0, 0, 0, 0], sizes = [1, 12, 11, 8], strides = [1, 1, 1, 1]} : vector<1x12x12x8xf32> to vector<1x12x11x8xf32>
    %30 = tpu.concatenate %17, %29 in 2 : vector<1x12x1x8xf32>, vector<1x12x11x8xf32> -> vector<1x12x12x8xf32>
    %31 = vector.extract_strided_slice %28 {offsets = [0, 0, 1, 0], sizes = [1, 12, 11, 8], strides = [1, 1, 1, 1]} : vector<1x12x12x8xf32> to vector<1x12x11x8xf32>
    %32 = tpu.concatenate %31, %17 in 2 : vector<1x12x11x8xf32>, vector<1x12x1x8xf32> -> vector<1x12x12x8xf32>
    %33 = tpu.concatenate %20, %18, %22, %25, %23, %27, %30, %28, %32 in 3 : vector<1x12x12x8xf32>, vector<1x12x12x8xf32>, vector<1x12x12x8xf32>, vector<1x12x12x8xf32>, vector<1x12x12x8xf32>, vector<1x12x12x8xf32>, vector<1x12x12x8xf32>, vector<1x12x12x8xf32>, vector<1x12x12x8xf32> -> vector<1x12x12x72xf32>
    %34 = vector.shape_cast %33 : vector<1x12x12x72xf32> to vector<144x72xf32>
    %c0_33 = arith.constant 0 : index
    %c0_34 = arith.constant 0 : index
    %35 = vector.load %arg5[%c0_33, %c0_34] : memref<72x8xf32, #tpu.memory_space<vmem>>, vector<72x8xf32>
    %cst_35 = arith.constant dense<0.000000e+00> : vector<144x8xf32>
    %36 = tpu.matmul %34, %35, %cst_35 {dimension_numbers = #tpu.dot_dimension_numbers<[1], [0], [0], [1], [0, 0, 1, 1], [], []>} : vector<144x72xf32>, vector<72x8xf32>, vector<144x8xf32> -> vector<144x8xf32>
    %c0_36 = arith.constant 0 : index
    %c0_37 = arith.constant 0 : index
    %37 = vector.load %arg6[%c0_36, %c0_37] : memref<1x8xf32, #tpu.memory_space<vmem>>, vector<1x8xf32>
    %38 = vector.broadcast %37 : vector<1x8xf32> to vector<144x8xf32>
    %39 = arith.mulf %36, %38 : vector<144x8xf32>
    %c0_38 = arith.constant 0 : index
    %c0_39 = arith.constant 0 : index
    %40 = vector.load %arg7[%c0_38, %c0_39] : memref<1x8xf32, #tpu.memory_space<vmem>>, vector<1x8xf32>
    %41 = vector.broadcast %40 : vector<1x8xf32> to vector<144x8xf32>
    %42 = arith.addf %39, %41 : vector<144x8xf32>
    %cst_40 = arith.constant 0.000000e+00 : f32
    %43 = vector.broadcast %cst_40 : f32 to vector<144x8xf32>
    %44 = arith.maximumf %42, %43 : vector<144x8xf32>
    %45 = vector.shape_cast %44 : vector<144x8xf32> to vector<1x12x12x8xf32>
    %46 = vector.shape_cast %45 : vector<1x12x12x8xf32> to vector<12x6x2x8xf32>
    %47 = vector.extract_strided_slice %46 {offsets = [0, 0, 0, 0], sizes = [12, 6, 1, 8], strides = [1, 1, 1, 1]} : vector<12x6x2x8xf32> to vector<12x6x1x8xf32>
    %48 = vector.shape_cast %47 : vector<12x6x1x8xf32> to vector<12x6x8xf32>
    %49 = vector.extract_strided_slice %46 {offsets = [0, 0, 1, 0], sizes = [12, 6, 1, 8], strides = [1, 1, 1, 1]} : vector<12x6x2x8xf32> to vector<12x6x1x8xf32>
    %50 = vector.shape_cast %49 : vector<12x6x1x8xf32> to vector<12x6x8xf32>
    %51 = arith.addf %48, %50 : vector<12x6x8xf32>
    %52 = vector.shape_cast %51 : vector<12x6x8xf32> to vector<6x2x6x8xf32>
    %53 = vector.extract_strided_slice %52 {offsets = [0, 0, 0, 0], sizes = [6, 1, 6, 8], strides = [1, 1, 1, 1]} : vector<6x2x6x8xf32> to vector<6x1x6x8xf32>
    %54 = vector.shape_cast %53 : vector<6x1x6x8xf32> to vector<6x6x8xf32>
    %55 = vector.extract_strided_slice %52 {offsets = [0, 1, 0, 0], sizes = [6, 1, 6, 8], strides = [1, 1, 1, 1]} : vector<6x2x6x8xf32> to vector<6x1x6x8xf32>
    %56 = vector.shape_cast %55 : vector<6x1x6x8xf32> to vector<6x6x8xf32>
    %57 = arith.addf %54, %56 : vector<6x6x8xf32>
    %cst_41 = arith.constant 2.500000e-01 : f32
    %58 = vector.broadcast %cst_41 : f32 to vector<6x6x8xf32>
    %59 = arith.mulf %57, %58 : vector<6x6x8xf32>
    %60 = vector.shape_cast %59 : vector<6x6x8xf32> to vector<36x8xf32>
    %c0_42 = arith.constant 0 : index
    %c0_43 = arith.constant 0 : index
    %61 = vector.load %arg8[%c0_42, %c0_43] : memref<8x32xf32, #tpu.memory_space<vmem>>, vector<8x32xf32>
    %cst_44 = arith.constant dense<0.000000e+00> : vector<36x32xf32>
    %62 = tpu.matmul %60, %61, %cst_44 {dimension_numbers = #tpu.dot_dimension_numbers<[1], [0], [0], [1], [0, 0, 1, 1], [], []>} : vector<36x8xf32>, vector<8x32xf32>, vector<36x32xf32> -> vector<36x32xf32>
    %c0_45 = arith.constant 0 : index
    %c0_46 = arith.constant 0 : index
    %63 = vector.load %arg9[%c0_45, %c0_46] : memref<1x32xf32, #tpu.memory_space<vmem>>, vector<1x32xf32>
    %64 = vector.broadcast %63 : vector<1x32xf32> to vector<36x32xf32>
    %65 = arith.mulf %62, %64 : vector<36x32xf32>
    %c0_47 = arith.constant 0 : index
    %c0_48 = arith.constant 0 : index
    %66 = vector.load %arg10[%c0_47, %c0_48] : memref<1x32xf32, #tpu.memory_space<vmem>>, vector<1x32xf32>
    %67 = vector.broadcast %66 : vector<1x32xf32> to vector<36x32xf32>
    %68 = arith.addf %65, %67 : vector<36x32xf32>
    %69 = vector.shape_cast %1 : vector<144x16xf32> to vector<1x12x12x16xf32>
    %70 = vector.shape_cast %69 : vector<1x12x12x16xf32> to vector<12x6x2x16xf32>
    %71 = vector.extract_strided_slice %70 {offsets = [0, 0, 0, 0], sizes = [12, 6, 1, 16], strides = [1, 1, 1, 1]} : vector<12x6x2x16xf32> to vector<12x6x1x16xf32>
    %72 = vector.shape_cast %71 : vector<12x6x1x16xf32> to vector<12x6x16xf32>
    %73 = vector.extract_strided_slice %70 {offsets = [0, 0, 1, 0], sizes = [12, 6, 1, 16], strides = [1, 1, 1, 1]} : vector<12x6x2x16xf32> to vector<12x6x1x16xf32>
    %74 = vector.shape_cast %73 : vector<12x6x1x16xf32> to vector<12x6x16xf32>
    %75 = arith.addf %72, %74 : vector<12x6x16xf32>
    %76 = vector.shape_cast %75 : vector<12x6x16xf32> to vector<6x2x6x16xf32>
    %77 = vector.extract_strided_slice %76 {offsets = [0, 0, 0, 0], sizes = [6, 1, 6, 16], strides = [1, 1, 1, 1]} : vector<6x2x6x16xf32> to vector<6x1x6x16xf32>
    %78 = vector.shape_cast %77 : vector<6x1x6x16xf32> to vector<6x6x16xf32>
    %79 = vector.extract_strided_slice %76 {offsets = [0, 1, 0, 0], sizes = [6, 1, 6, 16], strides = [1, 1, 1, 1]} : vector<6x2x6x16xf32> to vector<6x1x6x16xf32>
    %80 = vector.shape_cast %79 : vector<6x1x6x16xf32> to vector<6x6x16xf32>
    %81 = arith.addf %78, %80 : vector<6x6x16xf32>
    %cst_49 = arith.constant 2.500000e-01 : f32
    %82 = vector.broadcast %cst_49 : f32 to vector<6x6x16xf32>
    %83 = arith.mulf %81, %82 : vector<6x6x16xf32>
    %84 = vector.shape_cast %83 : vector<6x6x16xf32> to vector<36x16xf32>
    %c0_50 = arith.constant 0 : index
    %c0_51 = arith.constant 0 : index
    %85 = vector.load %arg11[%c0_50, %c0_51] : memref<16x32xf32, #tpu.memory_space<vmem>>, vector<16x32xf32>
    %cst_52 = arith.constant dense<0.000000e+00> : vector<36x32xf32>
    %86 = tpu.matmul %84, %85, %cst_52 {dimension_numbers = #tpu.dot_dimension_numbers<[1], [0], [0], [1], [0, 0, 1, 1], [], []>} : vector<36x16xf32>, vector<16x32xf32>, vector<36x32xf32> -> vector<36x32xf32>
    %c0_53 = arith.constant 0 : index
    %c0_54 = arith.constant 0 : index
    %87 = vector.load %arg12[%c0_53, %c0_54] : memref<1x32xf32, #tpu.memory_space<vmem>>, vector<1x32xf32>
    %88 = vector.broadcast %87 : vector<1x32xf32> to vector<36x32xf32>
    %89 = arith.mulf %86, %88 : vector<36x32xf32>
    %c0_55 = arith.constant 0 : index
    %c0_56 = arith.constant 0 : index
    %90 = vector.load %arg13[%c0_55, %c0_56] : memref<1x32xf32, #tpu.memory_space<vmem>>, vector<1x32xf32>
    %91 = vector.broadcast %90 : vector<1x32xf32> to vector<36x32xf32>
    %92 = arith.addf %89, %91 : vector<36x32xf32>
    %93 = arith.addf %68, %92 : vector<36x32xf32>
    %cst_57 = arith.constant 0.000000e+00 : f32
    %94 = vector.broadcast %cst_57 : f32 to vector<36x32xf32>
    %95 = arith.maximumf %93, %94 : vector<36x32xf32>
    %96 = vector.shape_cast %95 : vector<36x32xf32> to vector<1x6x6x32xf32>
    %c0_58 = arith.constant 0 : index
    %c0_59 = arith.constant 0 : index
    %c0_60 = arith.constant 0 : index
    %c0_61 = arith.constant 0 : index
    %97 = vector.load %arg14[%c0_58, %c0_59, %c0_60, %c0_61] : memref<1x6x6x32xf32, #tpu.memory_space<vmem>>, vector<1x6x6x32xf32>
    tpu.vector_store %arg14[%c0_58, %c0_59, %c0_60, %c0_61], %96 {strides = array<i32>} : memref<1x6x6x32xf32, #tpu.memory_space<vmem>>, vector<1x6x6x32xf32>,
    return
  }
  func.func @transform_0(%arg0: i32) -> (i32, i32, i32, i32) {
    %c0_i32 = arith.constant 0 : i32
    %c0_i32_0 = arith.constant 0 : i32
    %c0_i32_1 = arith.constant 0 : i32
    %c0_i32_2 = arith.constant 0 : i32
    return %arg0, %c0_i32, %c0_i32_0, %c0_i32_1 : i32, i32, i32, i32
  }
  func.func @transform_1(%arg0: i32) -> (i32, i32) {
    %c0_i32 = arith.constant 0 : i32
    %c0_i32_0 = arith.constant 0 : i32
    %c0_i32_1 = arith.constant 0 : i32
    return %c0_i32, %c0_i32_0 : i32, i32
  }
  func.func @transform_2(%arg0: i32) -> (i32, i32) {
    %c0_i32 = arith.constant 0 : i32
    %c0_i32_0 = arith.constant 0 : i32
    %c0_i32_1 = arith.constant 0 : i32
    return %c0_i32, %c0_i32_0 : i32, i32
  }
  func.func @transform_3(%arg0: i32) -> (i32, i32) {
    %c0_i32 = arith.constant 0 : i32
    %c0_i32_0 = arith.constant 0 : i32
    %c0_i32_1 = arith.constant 0 : i32
    return %c0_i32, %c0_i32_0 : i32, i32
  }
  func.func @transform_4(%arg0: i32) -> (i32, i32) {
    %c0_i32 = arith.constant 0 : i32
    %c0_i32_0 = arith.constant 0 : i32
    %c0_i32_1 = arith.constant 0 : i32
    return %c0_i32, %c0_i32_0 : i32, i32
  }
  func.func @transform_5(%arg0: i32) -> (i32, i32) {
    %c0_i32 = arith.constant 0 : i32
    %c0_i32_0 = arith.constant 0 : i32
    %c0_i32_1 = arith.constant 0 : i32
    return %c0_i32, %c0_i32_0 : i32, i32
  }
  func.func @transform_6(%arg0: i32) -> (i32, i32) {
    %c0_i32 = arith.constant 0 : i32
    %c0_i32_0 = arith.constant 0 : i32
    %c0_i32_1 = arith.constant 0 : i32
    return %c0_i32, %c0_i32_0 : i32, i32
  }
  func.func @transform_7(%arg0: i32) -> (i32, i32) {
    %c0_i32 = arith.constant 0 : i32
    %c0_i32_0 = arith.constant 0 : i32
    %c0_i32_1 = arith.constant 0 : i32
    return %c0_i32, %c0_i32_0 : i32, i32
  }
  func.func @transform_8(%arg0: i32) -> (i32, i32) {
    %c0_i32 = arith.constant 0 : i32
    %c0_i32_0 = arith.constant 0 : i32
    %c0_i32_1 = arith.constant 0 : i32
    return %c0_i32, %c0_i32_0 : i32, i32
  }
  func.func @transform_9(%arg0: i32) -> (i32, i32) {
    %c0_i32 = arith.constant 0 : i32
    %c0_i32_0 = arith.constant 0 : i32
    %c0_i32_1 = arith.constant 0 : i32
    return %c0_i32, %c0_i32_0 : i32, i32
  }
  func.func @transform_10(%arg0: i32) -> (i32, i32) {
    %c0_i32 = arith.constant 0 : i32
    %c0_i32_0 = arith.constant 0 : i32
    %c0_i32_1 = arith.constant 0 : i32
    return %c0_i32, %c0_i32_0 : i32, i32
  }
  func.func @transform_11(%arg0: i32) -> (i32, i32) {
    %c0_i32 = arith.constant 0 : i32
    %c0_i32_0 = arith.constant 0 : i32
    %c0_i32_1 = arith.constant 0 : i32
    return %c0_i32, %c0_i32_0 : i32, i32
  }
  func.func @transform_12(%arg0: i32) -> (i32, i32) {
    %c0_i32 = arith.constant 0 : i32
    %c0_i32_0 = arith.constant 0 : i32
    %c0_i32_1 = arith.constant 0 : i32
    return %c0_i32, %c0_i32_0 : i32, i32
  }
  func.func @transform_13(%arg0: i32) -> (i32, i32, i32, i32) {
    %c0_i32 = arith.constant 0 : i32
    %c0_i32_0 = arith.constant 0 : i32
    %c0_i32_1 = arith.constant 0 : i32
    %c0_i32_2 = arith.constant 0 : i32
    return %arg0, %c0_i32, %c0_i32_0, %c0_i32_1 : i32, i32, i32, i32
  }
}

</mosaic_0001>

<bundles_post_ra>
// kernel: tpu_custom_call.1
= control target key start
LH: loop header
LB: loop body
LE: loop exit
PB: predicated region body
PF: predicated region fallthrough
CT: control target
= control target key end

     0   :  { %s4247_s25 = smov 0   ;;  %s6177_s0 = inlined_call_operand.vmem [shape: f32[2,12,12,16], index: 0, kind: input, shape index: {}]   ;;  %s6178_s1 = inlined_call_operand.vmem [shape: f32[16,8], index: 1, kind: input, shape index: {}]   ;;  %s6179_s2 = inlined_call_operand.vmem [shape: f32[1,8], index: 2, kind: input, shape index: {}]   ;;  %s6180_s3 = inlined_call_operand.vmem [shape: f32[1,8], index: 3, kind: input, shape index: {}]   ;;  %s6181_s4 = inlined_call_operand.vmem [shape: f32[72,8], index: 4, kind: input, shape index: {}]   ;;  %s6182_s5 = inlined_call_operand.vmem [shape: f32[1,8], index: 5, kind: input, shape index: {}]   ;;  %s6183_s6 = inlined_call_operand.vmem [shape: f32[1,8], index: 6, kind: input, shape index: {}]   ;;  %s6184_s7 = inlined_call_operand.vmem [shape: f32[8,32], index: 7, kind: input, shape index: {}]   ;;  %s6185_s8 = inlined_call_operand.vmem [shape: f32[1,32], index: 8, kind: input, shape index: {}]   ;;  %s6186_s9 = inlined_call_operand.vmem [shape: f32[1,32], index: 9, kind: input, shape index: {}]   ;;  %s6187_s10 = inlined_call_operand.vmem [shape: f32[16,32], index: 10, kind: input, shape index: {}]   ;;  %s6188_s11 = inlined_call_operand.vmem [shape: f32[1,32], index: 11, kind: input, shape index: {}]   ;;  %s6189_s12 = inlined_call_operand.vmem [shape: f32[1,32], index: 12, kind: input, shape index: {}]   ;;  %s6190_s13 = inlined_call_operand.vmem [shape: f32[2,6,6,32], index: 13, kind: output, shape index: {}]  }
   0x1 LB: > { %s3912_s26 = sadd.s32 4294967295, %s4166_s25   ;;  %p3916_p0 = scmp.ge.s32.totalorder %s4166_s25, 1  ;;  %s4166_s25 = sphi %s4247_s25, %s23_s25  }
   0x2   : > { %p387_p1 = scmp.lt.s32.totalorder %s4166_s25, 3 }
   0x4   : > { %p388_p2 = pnand %p3916_p0, %p387_p1 }
   0x6   : > { %391 = sbr.rel (%p388_p2) target bundleno = 1108 (0x454), region = 72 }
   0xb   : > { %v502_v0 = vld [vmem:[%s6178_s1 + $0x8] sm:$0xff]  ;;  %v501_v1 = vld [vmem:[%s6178_s1] sm:$0xff]  ;;  %p431_p3 = scmp.lt.s32.totalorder %s3912_s26, 1  ;;  %vm564_vm0 = vcmask 130048   ;;  %vm734_vm1 = vcmask 64512   ;;  %v4168_v36 = vmov 0.0  }
   0xc   : > { %615 = vmatpush.msra.mxu0 %v502_v0  ;;  %4111 = vmatpush.msra.mxu3 %v502_v0  ;;  %735 = vst.msk [vmem:[#allocation2] sm:$0xff] %vm734_vm1, %v4168_v36  ;;  %vm736_vm2 = vcmask 60416   ;;  %s4169_s18 = smov 8   ;;  %vm1061_vm3 = vcmask 1042432   ;;  %vm1012_vm4 = vcmask 1046528   ;;  %s4170_s19 = smov 16  }
   0xd   : > { %s6342_s26 = smov (!%p431_p3, %s3912_s26), 1  ;;  %739 = vst.msk [vmem:[#allocation2 + $0xd0] sm:$0xff] %vm734_vm1, %v4168_v36  ;;  %v4450_v60 = vld [vmem:[%s6179_s2] ss:$0 sm:$0xff]  ;;  %vm939_vm5 = vcmask 1040384   ;;  %s4171_s24 = smov 24  }
   0xe   : > { %616 = vmatpush.msra.mxu0 %v501_v1  ;;  %4112 = vmatpush.msra.mxu3 %v501_v1  ;;  %s4131_s14 = smul.u32 192, %s6342_s26  ;;  %740 = vst.msk [vmem:[#allocation2 + $0xd8] sm:$0xf] %vm736_vm2, %v4168_v36  ;;  %v4457_v61 = vld [vmem:[%s6180_s3] ss:$0 sm:$0xff]  ;;  %s4172_s27 = smov 32  }
   0xf   : > { %737 = vst.msk [vmem:[#allocation2 + $0x8] sm:$0xf] %vm736_vm2, %v4168_v36  ;;  %s4173_s28 = smov 40   ;;  %s4174_s29 = smov 56   ;;  %vm2095_vm6 = vcmask 195584   ;;  %vm2120_vm7 = vcmask 261120  }
  0x10   : > { %s4267_s17 = scalar_lea.vmem %s6177_s0, %s4131_s14  ;;  %s4175_s30 = smov 48   ;;  %vm2145_vm8 = vcmask 326656   ;;  %vm2170_vm9 = vcmask 392192   ;;  %vm2195_vm10 = vcmask 457728   ;;  %vm2220_vm11 = vcmask 523264  }
  0x11   : > { %v4270_v2 = vld [vmem:[%s4267_s17] sm:$0xff]  ;;  %v4273_v3 = vld [vmem:[%s4267_s17 + $0x8] sm:$0xf]  ;;  %v4276_v4 = vld [vmem:[%s4267_s17 + $0x10] sm:$0xff]  ;;  %s4176_s14 = smov 64   ;;  %vm2351_vm12 = vcmask 588800  }
  0x12   : > { %6266 = vst [vmem:[#allocation3_spill] sm:$0xff] %v4273_v3  ;;  %v4279_v5 = vrot.slane %v4270_v2, 4  ;;  %v4283_v6 = vrot.slane %v4276_v4, 4  ;;  %v4287_v7 = vld [vmem:[%s4267_s17 + $0x20] sm:$0xff]  ;;  %v4291_v8 = vld [vmem:[%s4267_s17 + $0x18] sm:$0xf] }
  0x13   : > { %503 = vst [vmem:[#allocation1] ss:$2 sm:$0xff] %v4270_v2  ;;  %v4295_v9 = vrot.slane %v4287_v7, 4  ;;  %v4302_v10 = vld [vmem:[%s4267_s17 + $0x28] sm:$0xf]  ;;  %v4305_v11 = vld [vmem:[%s4267_s17 + $0x30] sm:$0xff] }
  0x14   : > { %6267 = vst [vmem:[#allocation4_spill] sm:$0xff] %v4279_v5  ;;  %v4310_v14 = vrot.slane %v4305_v11, 4  ;;  %v4314_v15 = vld [vmem:[%s4267_s17 + $0x38] sm:$0xf]  ;;  %v4320_v17 = vld [vmem:[%s4267_s17 + $0x40] sm:$0xff]  ;;  %v4332_v21 = vld [vmem:[%s4267_s17 + $0x50] sm:$0xff] }
  0x15   : > { %6268 = vst [vmem:[#allocation5_spill] sm:$0xff] %v4283_v6  ;;  %v4323_v18 = vrot.slane %v4320_v17, 4  ;;  %v4329_v20 = vld [vmem:[%s4267_s17 + $0x48] sm:$0xf]  ;;  %v4335_v22 = vld [vmem:[%s4267_s17 + $0x58] sm:$0xf] }
  0x16   : > { %507 = vst [vmem:[#allocation1 + $0x10] ss:$2 sm:$0xff] %v4273_v3  ;;  %v4338_v23 = vrot.slane %v4332_v21, 4  ;;  %v4347_v26 = vld [vmem:[%s4267_s17 + $0x80] sm:$0xff]  ;;  %v4356_v29 = vld [vmem:[%s4267_s17 + $0xa8] sm:$0xf] }
  0x17   : > { %6269 = vst [vmem:[#allocation6_spill] sm:$0xff] %v4287_v7  ;;  %v4350_v27 = vrot.slane %v4347_v26, 4  ;;  %v4359_v30 = vld [vmem:[%s4267_s17 + $0xb0] sm:$0xff]  ;;  %v4369_v34 = vld [vmem:[%s4267_s17 + $0x60] sm:$0xff]  ;;  %v4379_v38 = vld [vmem:[%s4267_s17 + $0x88] sm:$0xf] }
  0x18   : > { %505 = vst [vmem:[#allocation1 + $0x1] ss:$2 sm:$0xff] %v4279_v5  ;;  %v4372_v35 = vrot.slane %v4369_v34, 4  ;;  %v4382_v39 = vld [vmem:[%s4267_s17 + $0x90] sm:$0xff]  ;;  %v4386_v40 = vld [vmem:[#allocation2] sm:$0xff]  ;;  %v4400_v43 = vrot.slane %v4359_v30, 4 }
  0x19   : > { %6270 = vst [vmem:[#allocation7_spill] sm:$0xff] %v4291_v8  ;;  %1411 = vrot.lane.b32.xlu0 %v4386_v40, %s4169_s18  ;;  %v4394_v41 = vld [vmem:[%s4267_s17 + $0x68] sm:$0xf]  ;;  %v4397_v42 = vld [vmem:[%s4267_s17 + $0x70] sm:$0xff]  ;;  %v4404_v44 = vld [vmem:[%s4267_s17 + $0xb8] sm:$0xf] }
  0x1a   : > { %509 = vst [vmem:[#allocation1 + $0x11] ss:$2 sm:$0xff] %v4276_v4  ;;  %v4410_v46 = vld [vmem:[#allocation2 + $0x8] sm:$0xf]  ;;  %v4413_v47 = vrot.slane %v4397_v42, 4  ;;  %v4423_v49 = vrot.slane %v4382_v39, 4 }
  0x1b   : > { %6271 = vst [vmem:[#allocation8_spill] sm:$0xff] %v4295_v9  ;;  %v4418_v48 = vld [vmem:[%s4267_s17 + $0x78] sm:$0xf]  ;;  %v1013_v51 = vrot.slane %v4386_v40, 1  ;;  %v1014_v53 = vrot.slane %v4410_v46, 1  ;;  %v4436_v56 = vld [vmem:[%s4267_s17 + $0xa0] sm:$0xff] }
  0x1c   : > { %511 = vst [vmem:[#allocation1 + $0x20] ss:$2 sm:$0xff] %v4283_v6  ;;  %v4427_v52 = vld [vmem:[%s4267_s17 + $0x98] sm:$0xf]  ;;  %v4441_v57 = vrot.slane %v4436_v56, 4  ;;  %vm3080_vm13 = vcmask 1041409  }
  0x1d   : > { %513 = vst [vmem:[#allocation1 + $0x21] ss:$2 sm:$0xff] %v4291_v8  ;;  %v1015_v54 = vsel %vm1012_vm4, %v1013_v51, %v1014_v53  ;;  %v1062_v55 = vsel %vm1061_vm3, %v1014_v53, 0.0  ;;  %vm3082_vm14 = vcmask 1042434   ;;  %vm3084_vm15 = vcmask 1043459  }
  0x1e   : > { %515 = vst [vmem:[#allocation1 + $0x30] ss:$2 sm:$0xff] %v4287_v7  ;;  %1497 = vrot.lane.b32.xlu1 %v1062_v55, %s4170_s19 }
  0x1f   : > { %517 = vst [vmem:[#allocation1 + $0x31] ss:$2 sm:$0xff] %v4295_v9  ;;  %v518_v12 = vld.sshfl [vmem:[#allocation1] sm:$0xff pattern:$0x75316420] }
  0x20   : > { %6272 = vst [vmem:[#allocation9_spill] sm:$0xff] %v4302_v10  ;;  %3919 = vmatmul.msk.f32.vlgmr.msra.gmra.mxu0 %vm564_vm0, %v518_v12 }
  0x21   : > { %6273 = vst [vmem:[#allocation10_spill] sm:$0xff] %v4305_v11  ;;  %v519_v13 = vld.sshfl [vmem:[#allocation1 + $0x10] sm:$0xff pattern:$0x75316420]  ;;  %1413 = vrot.lane.b32.xlu0 %v4410_v46, %s4169_s18 }
  0x22   : > { %522 = vst [vmem:[#allocation1] ss:$2 sm:$0xff] %v4302_v10 }
  0x23   : > { %6274 = vst [vmem:[#allocation11_spill] sm:$0xff] %v4310_v14 }
  0x24   : > { %523 = vst [vmem:[#allocation1 + $0x1] ss:$2 sm:$0xff] %v4305_v11  ;;  %v520_v16 = vld.sshfl [vmem:[#allocation1 + $0x20] sm:$0xff pattern:$0x75316420] }
  0x25   : > { %6275 = vst [vmem:[#allocation12_spill] sm:$0xff] %v4314_v15 }
  0x26   : > { %524 = vst [vmem:[#allocation1 + $0x10] ss:$2 sm:$0xff] %v4310_v14  ;;  %v521_v19 = vld.sshfl [vmem:[#allocation1 + $0x30] sm:$0xff pattern:$0x75316420] }
  0x27   : > { %525 = vst [vmem:[#allocation1 + $0x11] ss:$2 sm:$0xff] %v4314_v15 }
  0x28   : > { %3920 = vmatmul.msk.f32.gmra.mxu0 %vm564_vm0, %v519_v13  ;;  %6276 = vst [vmem:[#allocation13_spill] sm:$0xff] %v4320_v17 }
  0x29   : > { %6277 = vst [vmem:[#allocation14_spill] sm:$0xff] %v4323_v18  ;;  %1495 = vrot.lane.b32.xlu0 %v1015_v54, %s4170_s19 }
  0x2a   : > { %526 = vst [vmem:[#allocation1 + $0x20] ss:$2 sm:$0xff] %v4320_v17 }
  0x2b   : > { %527 = vst [vmem:[#allocation1 + $0x21] ss:$2 sm:$0xff] %v4323_v18  ;;  %v530_v24 = vld.sshfl [vmem:[#allocation1] sm:$0xff pattern:$0x75316420]  ;;  %v6300_v18 = vrot.slane %v4386_v40, 7 }
  0x2c   : > { %6278 = vst [vmem:[#allocation15_spill] sm:$0xff] %v4329_v20 }
  0x2d   : > { %6279 = vst [vmem:[#allocation16_spill] sm:$0xff] %v4332_v21 }
  0x2e   : > { %6280 = vst [vmem:[#allocation17_spill] sm:$0xff] %v4335_v22  ;;  %v531_v28 = vld.sshfl [vmem:[#allocation1 + $0x10] sm:$0xff pattern:$0x75316420] }
  0x2f   : > { %6281 = vst [vmem:[#allocation18_spill] sm:$0xff] %v4338_v23 }
  0x30   : > { %3921 = vmatmul.msk.f32.gmra.mxu0 %vm564_vm0, %v520_v16  ;;  %528 = vst [vmem:[#allocation1 + $0x30] ss:$2 sm:$0xff] %v4329_v20 }
  0x31   : > { %529 = vst [vmem:[#allocation1 + $0x31] ss:$2 sm:$0xff] %v4332_v21 }
  0x32   : > { %534 = vst [vmem:[#allocation1] ss:$2 sm:$0xff] %v4338_v23  ;;  %v532_v32 = vld.sshfl [vmem:[#allocation1 + $0x20] sm:$0xff pattern:$0x75316420] }
  0x33   : > { %535 = vst [vmem:[#allocation1 + $0x1] ss:$2 sm:$0xff] %v4335_v22 }
  0x34   : > { %6282 = vst [vmem:[#allocation19_spill] sm:$0xff] %v4347_v26 }
  0x35   : > { %6283 = vst [vmem:[#allocation20_spill] sm:$0xff] %v4350_v27 }
  0x36   : > { %6284 = vst [vmem:[#allocation21_spill] sm:$0xff] %v4356_v29 }
  0x37   : > { %6285 = vst [vmem:[#allocation22_spill] sm:$0xff] %v4359_v30 }
  0x38   : > { %3922 = vmatmul.msk.f32.gmra.mxu0 %vm564_vm0, %v521_v19  ;;  %v533_v33 = vld.sshfl [vmem:[#allocation1 + $0x30] sm:$0xff pattern:$0x75316420]  ;;  %6286 = vst [vmem:[#allocation23_spill] sm:$0xff] %v4369_v34 }
  0x39   : > { %6287 = vst [vmem:[#allocation24_spill] sm:$0xff] %v4372_v35 }
  0x3a   : > { %v542_v25 = vld.sshfl [vmem:[#allocation1] sm:$0xff pattern:$0x75316420]  ;;  %536 = vst [vmem:[#allocation1 + $0x10] ss:$2 sm:$0xff] %v4369_v34 }
  0x3b   : > { %546 = vst [vmem:[#allocation1] ss:$2 sm:$0xff] %v4347_v26 }
  0x3c   : > { %547 = vst [vmem:[#allocation1 + $0x1] ss:$2 sm:$0xff] %v4350_v27 }
  0x3d   : > { %537 = vst [vmem:[#allocation1 + $0x11] ss:$2 sm:$0xff] %v4372_v35 }
  0x3e   : > { %6288 = vst [vmem:[#allocation25_spill] sm:$0xff] %v4379_v38 }
  0x3f   : > { %6289 = vst [vmem:[#allocation26_spill] sm:$0xff] %v4382_v39 }
  0x40   : > { %3923 = vmatmul.msk.f32.gmra.mxu0 %vm564_vm0, %v530_v24  ;;  %6290 = vst [vmem:[#allocation27_spill] sm:$0xff] %v4394_v41 }
  0x41   : > { %6291 = vst [vmem:[#allocation28_spill] sm:$0xff] %v4397_v42 }
  0x42   : > { %6292 = vst [vmem:[#allocation29_spill] sm:$0xff] %v4400_v43 }
  0x43   : > { %v4361_v31 = vld.sshfl [vmem:[#allocation1] sm:$0xff pattern:$0x75316420]  ;;  %538 = vst [vmem:[#allocation1 + $0x20] ss:$2 sm:$0xff] %v4394_v41 }
  0x44   : > { %558 = vst [vmem:[#allocation1] ss:$2 sm:$0xff] %v4356_v29  ;;  %v543_v37 = vld.sshfl [vmem:[#allocation1 + $0x10] sm:$0xff pattern:$0x75316420] }
  0x45   : > { %559 = vst [vmem:[#allocation1 + $0x1] ss:$2 sm:$0xff] %v4359_v30 }
  0x46   : > { %548 = vst [vmem:[#allocation1 + $0x10] ss:$2 sm:$0xff] %v4379_v38  ;;  %v2283_v38 = vld [vmem:[%s6181_s4 + $0x10] sm:$0xff] }
  0x47   : > { %549 = vst [vmem:[#allocation1 + $0x11] ss:$2 sm:$0xff] %v4382_v39 }
  0x48   : > { %3924 = vmatmul.msk.f32.gmra.mxu0 %vm564_vm0, %v531_v28  ;;  %6293 = vst [vmem:[#allocation30_spill] sm:$0xff] %v4404_v44 }
  0x49   : > { %539 = vst [vmem:[#allocation1 + $0x21] ss:$2 sm:$0xff] %v4397_v42 }
  0x4a   : > { %6294 = vst [vmem:[#allocation31_spill] sm:$0xff] %v4413_v47 }
  0x4b   : > { %6295 = vst [vmem:[#allocation32_spill] sm:$0xff] %v4418_v48 }
  0x4c   : > { %540 = vst [vmem:[#allocation1 + $0x30] ss:$2 sm:$0xff] %v4413_v47  ;;  %v562_v12 = vld.sshfl [vmem:[#allocation1] sm:$0xff pattern:$0x75316420] }
  0x4d   : > { %541 = vst [vmem:[#allocation1 + $0x31] ss:$2 sm:$0xff] %v4418_v48 }
  0x4e   : > { %v555_v45 = vld.sshfl [vmem:[#allocation1 + $0x10] sm:$0xff pattern:$0x75316420]  ;;  %6296 = vst [vmem:[#allocation33_spill] sm:$0xff] %v4423_v49 }
  0x4f   : > { %560 = vst [vmem:[#allocation1 + $0x10] ss:$2 sm:$0xff] %v4400_v43  ;;  %3932 = vmatmul.msk.f32.vlgmr.msra.gmra.mxu3 %vm564_vm0, %v555_v45 }
  0x50   : > { %3925 = vmatmul.msk.f32.gmra.mxu0 %vm564_vm0, %v532_v32  ;;  %561 = vst [vmem:[#allocation1 + $0x11] ss:$2 sm:$0xff] %v4404_v44  ;;  %v544_v50 = vld.sshfl [vmem:[#allocation1 + $0x20] sm:$0xff pattern:$0x75316420] }
  0x51   : > { %6297 = vst [vmem:[#allocation34_spill] sm:$0xff] %v4427_v52 }
  0x52   : > { %550 = vst [vmem:[#allocation1 + $0x20] ss:$2 sm:$0xff] %v4423_v49 }
  0x53   : > { %551 = vst [vmem:[#allocation1 + $0x21] ss:$2 sm:$0xff] %v4427_v52 }
  0x54   : > { %6298 = vst [vmem:[#allocation35_spill] sm:$0xff] %v4436_v56  ;;  %v545_v58 = vld.sshfl [vmem:[#allocation1 + $0x30] sm:$0xff pattern:$0x75316420] }
  0x55   : > { %6299 = vst [vmem:[#allocation36_spill] sm:$0xff] %v4441_v57 }
  0x56   : > { %552 = vst [vmem:[#allocation1 + $0x30] ss:$2 sm:$0xff] %v4436_v56 }
  0x57   : > { %553 = vst [vmem:[#allocation1 + $0x31] ss:$2 sm:$0xff] %v4441_v57  ;;  %v563_v28 = vld.sshfl [vmem:[#allocation1 + $0x10] sm:$0xff pattern:$0x75316420] }
  0x58   : > { %3926 = vmatmul.msk.f32.gmra.mxu0 %vm564_vm0, %v533_v33 }
  0x5a   : > { %v556_v59 = vld.sshfl [vmem:[#allocation1 + $0x20] sm:$0xff pattern:$0x75316420] }
  0x5b   : > { %3933 = vmatmul.msk.f32.gmra.mxu3 %vm564_vm0, %v556_v59 }
  0x5e   : > { %v557_v62 = vld.sshfl [vmem:[#allocation1 + $0x30] sm:$0xff pattern:$0x75316420] }
  0x60   : > { %3927 = vmatmul.msk.f32.gmra.mxu0 %vm564_vm0, %v542_v25 }
  0x63   : > { %3934 = vmatmul.msk.f32.gmra.mxu3 %vm564_vm0, %v557_v62 }
  0x68   : > { %3928 = vmatmul.msk.f32.gmra.mxu0 %vm564_vm0, %v543_v37 }
  0x6b   : > { %3935 = vmatmul.msk.f32.gmra.mxu3 %vm564_vm0, %v562_v12 }
  0x70   : > { %3929 = vmatmul.msk.f32.gmra.mxu0 %vm564_vm0, %v544_v50 }
  0x73   : > { %3936 = vmatmul.msk.f32.gmra.mxu3 %vm564_vm0, %v563_v28 }
  0x78   : > { %3930 = vmatmul.msk.f32.gmra.mxu0 %vm564_vm0, %v545_v58 }
  0x80   : > { %3931 = vmatmul.msk.f32.gmra.mxu0 %vm564_vm0, %v4361_v31 }
  0x9d   : > { %v618_v63 = vpop.f32.mrf.mxu0 }
  0x9e   : > { %v676_v0 = vmul.f32 %v4450_v60, %v618_v63 }
  0xa0   : > { %v698_v1 = vadd.f32 %v4457_v61, %v676_v0 }
  0xa2   : > { %v716_v13 = vmax.f32 %v698_v1, 0.0 }
  0xa4   : > { %v759_v16 = vrot.slane %v716_v13, 4  ;;  %777 = vst [vmem:[#allocation1] ss:$2 sm:$0xff] %v716_v13 }
  0xa5   : > { %v621_v19 = vpop.f32.mrf.mxu0 }
  0xa6   : > { %779 = vst [vmem:[#allocation1 + $0x1] ss:$2 sm:$0xff] %v759_v16  ;;  %v677_v24 = vmul.f32 %v4450_v60, %v621_v19 }
  0xa8   : > { %v699_v25 = vadd.f32 %v4457_v61, %v677_v24 }
  0xaa   : > { %v717_v31 = vmax.f32 %v699_v25, 0.0 }
  0xac   : > { %v760_v32 = vrot.slane %v717_v31, 4  ;;  %781 = vst [vmem:[#allocation1 + $0x10] ss:$2 sm:$0xff] %v717_v31 }
  0xad   : > { %v782_v33 = vld.sshfl [vmem:[#allocation1] sm:$0xff pattern:$0x75316420]  ;;  %v624_v36 = vpop.f32.mrf.mxu0 }
  0xae   : > { %867 = vst.msk [vmem:[#allocation2 + $0x10] sm:$0xff] %vm734_vm1, %v782_v33  ;;  %v678_v37 = vmul.f32 %v4450_v60, %v624_v36 }
  0xaf   : > { %785 = vst [vmem:[#allocation1 + $0x20] ss:$2 sm:$0xff] %v760_v32 }
  0xb0   : > { %v700_v45 = vadd.f32 %v4457_v61, %v678_v37 }
  0xb2   : > { %v718_v50 = vmax.f32 %v700_v45, 0.0 }
  0xb3   : > { %v783_v51 = vld.sshfl [vmem:[#allocation1 + $0x10] sm:$0xff pattern:$0x75316420] }
  0xb4   : > { %868 = vst.msk [vmem:[#allocation2 + $0x18] sm:$0xf] %vm736_vm2, %v783_v51  ;;  %v761_v53 = vrot.slane %v718_v50, 4 }
  0xb5   : > { %787 = vst [vmem:[#allocation1 + $0x21] ss:$2 sm:$0xff] %v718_v50  ;;  %v893_v54 = vld [vmem:[#allocation2 + $0x10] sm:$0xff]  ;;  %v627_v58 = vpop.f32.mrf.mxu0 }
  0xb6   : > { %789 = vst [vmem:[#allocation1 + $0x30] ss:$2 sm:$0xff] %v761_v53  ;;  %1415 = vrot.lane.b32.xlu1 %v893_v54, %s4169_s18  ;;  %v943_v55 = vrot.slane %v893_v54, 7  ;;  %v679_v59 = vmul.f32 %v4450_v60, %v627_v58  ;;  %v1016_v32 = vrot.slane %v893_v54, 1 }
  0xb8   : > { %v4473_v62 = vsel %vm939_vm5, 0.0, %v943_v55  ;;  %v701_v63 = vadd.f32 %v4457_v61, %v679_v59 }
  0xb9   : > { %1579 = vrot.lane.b32.xlu0 %v4473_v62, %s4171_s24 }
  0xba   : > { %v719_v12 = vmax.f32 %v701_v63, 0.0 }
  0xbb   : > { %v1075_v0 = vld [vmem:[#allocation2 + $0x18] sm:$0xf] }
  0xbc   : > { %v894_v1 = vld [vmem:[#allocation2 + $0x18] sm:$0xf]  ;;  %1653 = vrot.lane.b32.xlu2 %v1075_v0, %s4172_s27  ;;  %v762_v25 = vrot.slane %v719_v12, 4  ;;  %792 = vst [vmem:[#allocation1] ss:$2 sm:$0xff] %v719_v12  ;;  %v1123_v45 = vrot.slane %v1075_v0, 7 }
  0xbd   : > { %v790_v13 = vld.sshfl [vmem:[#allocation1 + $0x20] sm:$0xff pattern:$0x75316420]  ;;  %v944_v16 = vrot.slane %v894_v1, 7  ;;  %v1017_v24 = vrot.slane %v894_v1, 1  ;;  %v630_v33 = vpop.f32.mrf.mxu0  ;;  %v1183_v59 = vrot.slane %v1075_v0, 1 }
  0xbe   : > { %v791_v19 = vld.sshfl [vmem:[#allocation1 + $0x30] sm:$0xff pattern:$0x75316420]  ;;  %869 = vst.msk [vmem:[#allocation2 + $0x20] sm:$0xff] %vm734_vm1, %v790_v13  ;;  %1651 = vrot.lane.b32.xlu1 %v893_v54, %s4172_s27  ;;  %v680_v36 = vmul.f32 %v4450_v60, %v630_v33  ;;  %v1124_v13 = vsel %vm939_vm5, %v943_v55, %v1123_v45 }
  0xbf   : > { %870 = vst.msk [vmem:[#allocation2 + $0x28] sm:$0xf] %vm736_vm2, %v791_v19  ;;  %v4483_v28 = vsel %vm939_vm5, %v943_v55, %v944_v16  ;;  %v1063_v31 = vsel %vm1061_vm3, %v1017_v24, 0.0  ;;  %v1018_v37 = vsel %vm1012_vm4, %v1016_v32, %v1017_v24  ;;  %v1184_v19 = vsel %vm1012_vm4, %v1016_v32, %v1183_v59 }
  0xc0   : > { %793 = vst [vmem:[#allocation1 + $0x1] ss:$2 sm:$0xff] %v762_v25  ;;  %v702_v51 = vadd.f32 %v4457_v61, %v680_v36  ;;  %v1230_v0 = vsel %vm1061_vm3, %v1183_v59, 0.0 }
  0xc1   : > { %1501 = vrot.lane.b32.xlu0 %v1063_v31, %s4170_s19 }
  0xc2   : > { %v720_v58 = vmax.f32 %v702_v51, 0.0 }
  0xc4   : > { %1499 = vrot.lane.b32.xlu2 %v1018_v37, %s4170_s19  ;;  %v763_v16 = vrot.slane %v720_v58, 4  ;;  %794 = vst [vmem:[#allocation1 + $0x10] ss:$2 sm:$0xff] %v720_v58 }
  0xc5   : > { %v1076_v50 = vld [vmem:[#allocation2 + $0x20] sm:$0xff] }
  0xc6   : > { %v4491_v53 = vld [vmem:[#allocation2 + $0x28] sm:$0xf]  ;;  %1417 = vrot.lane.b32.xlu1 %v894_v1, %s4169_s18  ;;  %v946_v54 = vrot.slane %v1076_v50, 7  ;;  %797 = vst [vmem:[#allocation1 + $0x20] ss:$2 sm:$0xff] %v763_v16  ;;  %v633_v1 = vpop.f32.mrf.mxu0 }
  0xc7   : > { %v795_v63 = vld.sshfl [vmem:[#allocation1] sm:$0xff pattern:$0x75316420]  ;;  %v947_v12 = vrot.slane %v4491_v53, 7  ;;  %v681_v25 = vmul.f32 %v4450_v60, %v633_v1  ;;  %v1244_v32 = vld [vmem:[#allocation2 + $0x28] sm:$0xf] }
  0xc8   : > { %871 = vst.msk [vmem:[#allocation2 + $0x30] sm:$0xff] %vm734_vm1, %v795_v63  ;;  %v4511_v31 = vsel %vm939_vm5, 0.0, %v946_v54  ;;  %v1292_v51 = vrot.slane %v1244_v32, 7  ;;  %v4526_v63 = vld [vmem:[#allocation2 + $0x28] sm:$0xf] }
  0xc9   : > { %1581 = vrot.lane.b32.xlu0 %v1124_v13, %s4171_s24  ;;  %v4500_v24 = vsel %vm939_vm5, %v946_v54, %v947_v12  ;;  %v703_v33 = vadd.f32 %v4457_v61, %v681_v25 }
  0xca   : > { %v1293_v13 = vsel %vm939_vm5, %v946_v54, %v1292_v51  ;;  %v1020_v51 = vrot.slane %v4491_v53, 1 }
  0xcb   : > { %v796_v55 = vld.sshfl [vmem:[#allocation1 + $0x10] sm:$0xff pattern:$0x75316420]  ;;  %v721_v37 = vmax.f32 %v703_v33, 0.0 }
  0xcc   : > { %1735 = vrot.lane.b32.xlu2 %v1184_v19, %s4173_s28  ;;  %872 = vst.msk [vmem:[#allocation2 + $0x38] sm:$0xf] %vm736_vm2, %v796_v55  ;;  %v1126_v19 = vrot.slane %v4526_v63, 7 }
  0xcd   : > { %v764_v12 = vrot.slane %v721_v37, 4  ;;  %798 = vst [vmem:[#allocation1 + $0x21] ss:$2 sm:$0xff] %v721_v37  ;;  %v1185_v37 = vrot.slane %v1076_v50, 1 }
  0xce   : > { %1737 = vrot.lane.b32.xlu1 %v1230_v0, %s4173_s28  ;;  %v636_v1 = vpop.f32.mrf.mxu0  ;;  %v1127_v33 = vsel %vm939_vm5, %v946_v54, %v1126_v19  ;;  %v1352_v54 = vrot.slane %v1244_v32, 1 }
  0xcf   : > { %v4516_v36 = vld [vmem:[#allocation2 + $0x30] sm:$0xff]  ;;  %799 = vst [vmem:[#allocation1 + $0x30] ss:$2 sm:$0xff] %v764_v12  ;;  %v682_v25 = vmul.f32 %v4450_v60, %v636_v1  ;;  %v1064_v12 = vsel %vm1061_vm3, %v1020_v51, 0.0 }
  0xd0   : > { %v4523_v58 = vrot.slane %v4516_v36, 7 }
  0xd1   : > { %1655 = vrot.lane.b32.xlu0 %v1076_v50, %s4172_s27 }
  0xd2   : > { %v657_v57 = vpop.f32.mrf.mxu3 }
  0xd3   : > { %v4518_v45 = vld [vmem:[#allocation2 + $0x38] sm:$0xf]  ;;  %v689_v44 = vmul.f32 %v4450_v60, %v657_v57 }
  0xd4   : > { %1419 = vrot.lane.b32.xlu2 %v1076_v50, %s4169_s18  ;;  %v950_v59 = vrot.slane %v4518_v45, 7  ;;  %v800_v0 = vld.sshfl [vmem:[#allocation1 + $0x20] sm:$0xff pattern:$0x75316420] }
  0xd5   : > { %873 = vst.msk [vmem:[#allocation2 + $0x40] sm:$0xff] %vm734_vm1, %v800_v0  ;;  %v1021_v0 = vsel %vm1012_vm4, %v1185_v37, %v1020_v51  ;;  %v1353_v51 = vsel %vm1012_vm4, %v1185_v37, %v1352_v54 }
  0xd6   : > { %1891 = vrot.lane.b32.xlu1 %v1076_v50, %s4174_s29  ;;  %v4533_v16 = vsel %vm939_vm5, %v4523_v58, %v950_v59  ;;  %v801_v55 = vld.sshfl [vmem:[#allocation1 + $0x30] sm:$0xff pattern:$0x75316420]  ;;  %v704_v59 = vadd.f32 %v4457_v61, %v682_v25  ;;  %v6193_v25 = vrot.slane %v4386_v40, 7 }
  0xd7   : > { %874 = vst.msk [vmem:[#allocation2 + $0x48] sm:$0xf] %vm736_vm2, %v801_v55  ;;  %v639_v55 = vpop.f32.mrf.mxu0 }
  0xd8   : > { %v683_v50 = vmul.f32 %v4450_v60, %v639_v55 }
  0xd9   : > { %1819 = vrot.lane.b32.xlu0 %v4511_v31, %s4175_s30 }
  0xda   : > { %v705_v1 = vadd.f32 %v4457_v61, %v683_v50  ;;  %v1186_v50 = vrot.slane %v4526_v63, 1 }
  0xdc   : > { %1421 = vrot.lane.b32.xlu2 %v4491_v53, %s4169_s18  ;;  %v4552_v19 = vld [vmem:[#allocation2 + $0x40] sm:$0xff] }
  0xdd   : > { %v4752_v48 = vrot.slane %v4552_v19, 1 }
  0xde   : > { %1657 = vrot.lane.b32.xlu1 %v4526_v63, %s4172_s27  ;;  %v4554_v53 = vld [vmem:[#allocation2 + $0x48] sm:$0xf] }
  0xdf   : > { %v642_v55 = vpop.f32.mrf.mxu0  ;;  %v4731_v39 = vld [vmem:[#allocation2 + $0x48] sm:$0xf] }
  0xe1   : > { %1821 = vrot.lane.b32.xlu0 %v1293_v13, %s4175_s30  ;;  %v722_v13 = vmax.f32 %v704_v59, 0.0  ;;  %v723_v59 = vmax.f32 %v705_v1, 0.0  ;;  %v684_v1 = vmul.f32 %v4450_v60, %v642_v55  ;;  %v1231_v55 = vsel %vm1061_vm3, %v1186_v50, 0.0 }
  0xe3   : > { %v765_v43 = vrot.slane %v722_v13, 4  ;;  %802 = vst [vmem:[#allocation1] ss:$2 sm:$0xff] %v722_v13  ;;  %v766_v13 = vrot.slane %v723_v59, 4 }
  0xe4   : > { %1893 = vrot.lane.b32.xlu2 %v1244_v32, %s4174_s29  ;;  %v4564_v32 = vrot.slane %v4552_v19, 7  ;;  %804 = vst [vmem:[#allocation1 + $0x10] ss:$2 sm:$0xff] %v723_v59  ;;  %v1187_v59 = vsel %vm1012_vm4, %v1185_v37, %v1186_v50 }
  0xe5   : > { %803 = vst [vmem:[#allocation1 + $0x1] ss:$2 sm:$0xff] %v765_v43  ;;  %v953_v43 = vrot.slane %v4554_v53, 7 }
  0xe6   : > { %1583 = vrot.lane.b32.xlu1 %v4511_v31, %s4171_s24  ;;  %807 = vst [vmem:[#allocation1 + $0x20] ss:$2 sm:$0xff] %v766_v13 }
  0xe9   : > { %1585 = vrot.lane.b32.xlu0 %v1127_v33, %s4171_s24  ;;  %v941_v33 = vrot.slane %v4410_v46, 7 }
  0xeb   : > { %v4572_v46 = vsel %vm939_vm5, %v6193_v25, %v941_v33  ;;  %v806_v63 = vld.sshfl [vmem:[#allocation1 + $0x10] sm:$0xff pattern:$0x75316420] }
  0xec   : > { %1505 = vrot.lane.b32.xlu2 %v1064_v12, %s4170_s19  ;;  %v1399_v12 = vsel %vm1061_vm3, %v1352_v54, 0.0  ;;  %v4579_v54 = vsel %vm939_vm5, %v4564_v32, %v953_v43  ;;  %876 = vst.msk [vmem:[#allocation2 + $0x58] sm:$0xf] %vm736_vm2, %v806_v63  ;;  %v645_v43 = vpop.f32.mrf.mxu0 }
  0xed   : > { %v685_v13 = vmul.f32 %v4450_v60, %v645_v43  ;;  %v1246_v43 = vld [vmem:[#allocation2 + $0x38] sm:$0xf] }
  0xee   : > { %1503 = vrot.lane.b32.xlu1 %v1021_v0, %s4170_s19  ;;  %v805_v0 = vld.sshfl [vmem:[#allocation1] sm:$0xff pattern:$0x75316420] }
  0xef   : > { %875 = vst.msk [vmem:[#allocation2 + $0x50] sm:$0xff] %vm734_vm1, %v805_v0  ;;  %v4592_v0 = vsel %vm939_vm5, 0.0, %v4523_v58  ;;  %v707_v37 = vadd.f32 %v4457_v61, %v685_v13 }
  0xf1   : > { %1423 = vrot.lane.b32.xlu0 %v4516_v36, %s4169_s18 }
  0xf4   : > { %1975 = vrot.lane.b32.xlu2 %v1353_v51, %s4176_s14  ;;  %v706_v51 = vadd.f32 %v4457_v61, %v684_v1  ;;  %v725_v1 = vmax.f32 %v707_v37, 0.0  ;;  %v4611_v37 = vld [vmem:[#allocation2 + $0x38] sm:$0xf] }
  0xf5   : > { %v1129_v49 = vrot.slane %v4611_v37, 7 }
  0xf6   : > { %1977 = vrot.lane.b32.xlu1 %v1399_v12, %s4176_s14  ;;  %v724_v33 = vmax.f32 %v706_v51, 0.0  ;;  %v4599_v51 = vrot.slane %v4516_v36, 1  ;;  %v768_v63 = vrot.slane %v725_v1, 4  ;;  %812 = vst [vmem:[#allocation1] ss:$2 sm:$0xff] %v725_v1  ;;  %v1295_v1 = vrot.slane %v1246_v43, 7 }
  0xf8   : > { %v767_v12 = vrot.slane %v724_v33, 4  ;;  %808 = vst [vmem:[#allocation1 + $0x21] ss:$2 sm:$0xff] %v724_v33 }
  0xf9   : > { %1895 = vrot.lane.b32.xlu0 %v4516_v36, %s4174_s29  ;;  %813 = vst [vmem:[#allocation1 + $0x1] ss:$2 sm:$0xff] %v768_v63  ;;  %v4618_v63 = vpop.permute.xlu0 %1411 }
  0xfa   : > { %809 = vst [vmem:[#allocation1 + $0x30] ss:$2 sm:$0xff] %v767_v12 }
  0xfc   : > { %1739 = vrot.lane.b32.xlu2 %v1187_v59, %s4173_s28  ;;  %v1023_v59 = vrot.slane %v4518_v45, 1 }
  0xfe   : > { %1659 = vrot.lane.b32.xlu1 %v4516_v36, %s4172_s27  ;;  %v1024_v50 = vsel %vm1012_vm4, %v4599_v51, %v1023_v59  ;;  %v648_v36 = vpop.f32.mrf.mxu0 }
  0xff   : > { %v810_v33 = vld.sshfl [vmem:[#allocation1 + $0x20] sm:$0xff pattern:$0x75316420]  ;;  %v686_v13 = vmul.f32 %v4450_v60, %v648_v36  ;;  %v1296_v36 = vsel %vm939_vm5, %v4523_v58, %v1295_v1 }
 0x100   : > { %877 = vst.msk [vmem:[#allocation2 + $0x60] sm:$0xff] %vm734_vm1, %v810_v33  ;;  %v815_v25 = vld.sshfl [vmem:[#allocation1] sm:$0xff pattern:$0x75316420] }
 0x101   : > { %1587 = vrot.lane.b32.xlu0 %v4592_v0, %s4171_s24  ;;  %v811_v12 = vld.sshfl [vmem:[#allocation1 + $0x30] sm:$0xff pattern:$0x75316420]  ;;  %879 = vst.msk [vmem:[#allocation2 + $0x70] sm:$0xff] %vm734_vm1, %v815_v25  ;;  %v4638_v27 = vpop.permute.xlu0 %1413 }
 0x102   : > { %878 = vst.msk [vmem:[#allocation2 + $0x68] sm:$0xf] %vm736_vm2, %v811_v12  ;;  %v1355_v12 = vrot.slane %v1246_v43, 1 }
 0x104   : > { %1741 = vrot.lane.b32.xlu2 %v1231_v55, %s4173_s28  ;;  %v708_v55 = vadd.f32 %v4457_v61, %v686_v13  ;;  %v1356_v29 = vsel %vm1012_vm4, %v4599_v51, %v1355_v12 }
 0x106   : > { %1823 = vrot.lane.b32.xlu1 %v4592_v0, %s4175_s30  ;;  %v726_v33 = vmax.f32 %v708_v55, 0.0  ;;  %v651_v13 = vpop.f32.mrf.mxu0  ;;  %v711_v55 = vadd.f32 %v4457_v61, %v689_v44  ;;  %v1130_v44 = vsel %vm939_vm5, %v4523_v58, %v1129_v49  ;;  %v1065_v58 = vsel %vm1061_vm3, %v1023_v59, 0.0 }
 0x108   : > { %814 = vst [vmem:[#allocation1 + $0x10] ss:$2 sm:$0xff] %v726_v33 }
 0x109   : > { %1507 = vrot.lane.b32.xlu0 %v1024_v50, %s4170_s19  ;;  %v769_v50 = vrot.slane %v726_v33, 4  ;;  %v4773_v34 = vld [vmem:[#allocation2 + $0x68] sm:$0xf] }
 0x10a   : > { %v6302_v5 = vrot.slane %v4773_v34, 1 }
 0x10b   : > { %817 = vst [vmem:[#allocation1 + $0x20] ss:$2 sm:$0xff] %v769_v50  ;;  %v729_v50 = vmax.f32 %v711_v55, 0.0  ;;  %v1400_v55 = vsel %vm1061_vm3, %v1355_v12, 0.0 }
 0x10c   : > { %1661 = vrot.lane.b32.xlu2 %v4611_v37, %s4172_s27  ;;  %v1403_v11 = vsel %vm1061_vm3, %v6302_v5, 0.0 }
 0x10e   : > { %1425 = vrot.lane.b32.xlu1 %v4518_v45, %s4169_s18  ;;  %v687_v45 = vmul.f32 %v4450_v60, %v651_v13  ;;  %v654_v13 = vpop.f32.mrf.mxu0 }
 0x10f   : > { %v816_v57 = vld.sshfl [vmem:[#allocation1 + $0x10] sm:$0xff pattern:$0x75316420] }
 0x110   : > { %v709_v33 = vadd.f32 %v4457_v61, %v687_v45  ;;  %880 = vst.msk [vmem:[#allocation2 + $0x78] sm:$0xf] %vm736_vm2, %v816_v57  ;;  %v660_v45 = vpop.f32.mrf.mxu3 }
 0x111   : > { %1825 = vrot.lane.b32.xlu0 %v1296_v36, %s4175_s30  ;;  %824 = vst [vmem:[#allocation1 + $0x10] ss:$2 sm:$0xff] %v729_v50 }
 0x112   : > { %v727_v25 = vmax.f32 %v709_v33, 0.0 }
 0x114   : > { %1979 = vrot.lane.b32.xlu2 %v1356_v29, %s4176_s14  ;;  %v770_v36 = vrot.slane %v727_v25, 4  ;;  %818 = vst [vmem:[#allocation1 + $0x21] ss:$2 sm:$0xff] %v727_v25  ;;  %v688_v29 = vmul.f32 %v4450_v60, %v654_v13  ;;  %v1189_v13 = vrot.slane %v4611_v37, 1 }
 0x116   : > { %v4632_v1 = vpop.permute.xlu2 %1653  ;;  %1897 = vrot.lane.b32.xlu1 %v1246_v43, %s4174_s29  ;;  %819 = vst [vmem:[#allocation1 + $0x30] ss:$2 sm:$0xff] %v770_v36  ;;  %v690_v43 = vmul.f32 %v4450_v60, %v660_v45  ;;  %v710_v33 = vadd.f32 %v4457_v61, %v688_v29  ;;  %v4651_v36 = vpop.permute.xlu1 %1497  ;;  %v1190_v37 = vsel %vm1012_vm4, %v4599_v51, %v1189_v13  ;;  %v2289_v51 = vld [vmem:[%s6181_s4 + $0x40] sm:$0xff] }
 0x117   : > { %2395 = vmatpush.msra.mxu1 %v2289_v51  ;;  %4113 = vmatpush.msra.mxu2 %v2289_v51 }
 0x118   : > { %v712_v49 = vadd.f32 %v4457_v61, %v690_v43  ;;  %v728_v25 = vmax.f32 %v710_v33, 0.0  ;;  %v663_v43 = vpop.f32.mrf.mxu3  ;;  %v826_v33 = vld.sshfl [vmem:[#allocation1 + $0x10] sm:$0xff pattern:$0x75316420]  ;;  %4114 = vmatpush.msrb.mxu3 %v2289_v51  ;;  %v4701_v51 = vsel %vm939_vm5, 0.0, %v4564_v32 }
 0x119   : > { %1589 = vrot.lane.b32.xlu0 %v1130_v44, %s4171_s24  ;;  %v772_v44 = vrot.slane %v729_v50, 4  ;;  %v691_v59 = vmul.f32 %v4450_v60, %v663_v43  ;;  %884 = vst.msk [vmem:[#allocation2 + $0x98] sm:$0xf] %vm736_vm2, %v826_v33  ;;  %v2287_v33 = vld [vmem:[%s6181_s4 + $0x30] sm:$0xff] }
 0x11a   : > { %822 = vst [vmem:[#allocation1] ss:$2 sm:$0xff] %v728_v25  ;;  %v771_v29 = vrot.slane %v728_v25, 4  ;;  %v1232_v25 = vsel %vm1061_vm3, %v1189_v13, 0.0  ;;  %v2288_v13 = vld [vmem:[%s6181_s4 + $0x38] sm:$0xff] }
 0x11b   : > { %v820_v45 = vld.sshfl [vmem:[#allocation1 + $0x20] sm:$0xff pattern:$0x75316420]  ;;  %2396 = vmatpush.msra.mxu1 %v2288_v13  ;;  %4115 = vmatpush.msra.mxu2 %v2288_v13 }
 0x11c   : > { %1981 = vrot.lane.b32.xlu2 %v1400_v55, %s4176_s14  ;;  %881 = vst.msk [vmem:[#allocation2 + $0x80] sm:$0xff] %vm734_vm1, %v820_v45  ;;  %v730_v55 = vmax.f32 %v712_v49, 0.0  ;;  %v713_v49 = vadd.f32 %v4457_v61, %v691_v59  ;;  %4116 = vmatpush.msrb.mxu3 %v2288_v13  ;;  %v4705_v13 = vld [vmem:[#allocation2 + $0x50] sm:$0xff] }
 0x11d   : > { %v821_v12 = vld.sshfl [vmem:[#allocation1 + $0x30] sm:$0xff pattern:$0x75316420]  ;;  %827 = vst [vmem:[#allocation1 + $0x20] ss:$2 sm:$0xff] %v772_v44  ;;  %2397 = vmatpush.msra.mxu1 %v2287_v33  ;;  %4117 = vmatpush.msra.mxu2 %v2287_v33  ;;  %v4722_v30 = vrot.slane %v4705_v13, 7 }
 0x11e   : > { %v4648_v57 = vpop.permute.xlu2 %1499  ;;  %1509 = vrot.lane.b32.xlu1 %v1065_v58, %s4170_s19  ;;  %882 = vst.msk [vmem:[#allocation2 + $0x88] sm:$0xf] %vm736_vm2, %v821_v12  ;;  %v773_v50 = vrot.slane %v730_v55, 4  ;;  %v4659_v58 = vpop.permute.xlu0 %1495  ;;  %v731_v12 = vmax.f32 %v713_v49, 0.0  ;;  %v2286_v49 = vld [vmem:[%s6181_s4 + $0x28] sm:$0xff]  ;;  %4118 = vmatpush.msrb.mxu3 %v2287_v33 }
 0x11f   : > { %823 = vst [vmem:[#allocation1 + $0x1] ss:$2 sm:$0xff] %v771_v29  ;;  %2398 = vmatpush.msra.mxu1 %v2286_v49  ;;  %4119 = vmatpush.msra.mxu2 %v2286_v49  ;;  %v4715_v33 = vld [vmem:[#allocation2 + $0x58] sm:$0xf] }
 0x120   : > { %828 = vst [vmem:[#allocation1 + $0x21] ss:$2 sm:$0xff] %v730_v55  ;;  %v774_v59 = vrot.slane %v731_v12, 4  ;;  %4120 = vmatpush.msrb.mxu3 %v2286_v49  ;;  %v2284_v49 = vld [vmem:[%s6181_s4 + $0x18] sm:$0xff]  ;;  %v956_v56 = vrot.slane %v4715_v33, 7 }
 0x121   : > { %1663 = vrot.lane.b32.xlu0 %v4552_v19, %s4172_s27  ;;  %829 = vst [vmem:[#allocation1 + $0x30] ss:$2 sm:$0xff] %v773_v50 }
 0x122   : > { %v4738_v26 = vsel %vm939_vm5, %v4722_v30, %v956_v56 }
 0x124   : > { %1743 = vrot.lane.b32.xlu2 %v1190_v37, %s4173_s28 }
 0x126   : > { %v4667_v45 = vpop.permute.xlu2 %1735  ;;  %1745 = vrot.lane.b32.xlu1 %v1232_v25, %s4173_s28  ;;  %v825_v55 = vld.sshfl [vmem:[#allocation1] sm:$0xff pattern:$0x75316420] }
 0x127   : > { %883 = vst.msk [vmem:[#allocation2 + $0x90] sm:$0xff] %vm734_vm1, %v825_v55  ;;  %v830_v43 = vld.sshfl [vmem:[#allocation1 + $0x20] sm:$0xff pattern:$0x75316420]  ;;  %v4711_v55 = vrot.slane %v4705_v13, 1 }
 0x128   : > { %v4670_v44 = vpop.permute.xlu1 %1415  ;;  %v831_v50 = vld.sshfl [vmem:[#allocation1 + $0x30] sm:$0xff pattern:$0x75316420]  ;;  %885 = vst.msk [vmem:[#allocation2 + $0xa0] sm:$0xff] %vm734_vm1, %v830_v43  ;;  %v4713_v43 = vld [vmem:[#allocation2 + $0x58] sm:$0xf] }
 0x129   : > { %1429 = vrot.lane.b32.xlu0 %v4554_v53, %s4169_s18  ;;  %886 = vst.msk [vmem:[#allocation2 + $0xa8] sm:$0xf] %vm736_vm2, %v831_v50  ;;  %v4719_v50 = vld [vmem:[#allocation2 + $0x48] sm:$0xf]  ;;  %v6224_v52 = vrot.slane %v4713_v43, 1 }
 0x12a   : > { %832 = vst [vmem:[#allocation1] ss:$2 sm:$0xff] %v731_v12  ;;  %v2285_v12 = vld [vmem:[%s6181_s4 + $0x20] sm:$0xff]  ;;  %v1298_v41 = vrot.slane %v4719_v50, 7 }
 0x12b   : > { %v4680_v29 = vpop.permute.xlu0 %1579  ;;  %833 = vst [vmem:[#allocation1 + $0x1] ss:$2 sm:$0xff] %v774_v59  ;;  %2399 = vmatpush.msra.mxu1 %v2285_v12  ;;  %4121 = vmatpush.msra.mxu2 %v2285_v12  ;;  %v4749_v35 = vsel %vm1012_vm4, %v4711_v55, %v6224_v52 }
 0x12c   : > { %1427 = vrot.lane.b32.xlu2 %v4552_v19, %s4169_s18  ;;  %4122 = vmatpush.msrb.mxu3 %v2285_v12  ;;  %v1026_v12 = vrot.slane %v4554_v53, 1 }
 0x12d   : > { %2400 = vmatpush.msra.mxu1 %v2284_v49  ;;  %4123 = vmatpush.msra.mxu2 %v2284_v49 }
 0x12e   : > { %v4689_v37 = vpop.permute.xlu2 %1419  ;;  %1899 = vrot.lane.b32.xlu1 %v4552_v19, %s4174_s29  ;;  %4124 = vmatpush.msrb.mxu3 %v2284_v49  ;;  %v2282_v49 = vld [vmem:[%s6181_s4 + $0x8] sm:$0xff]  ;;  %v1066_v53 = vsel %vm1061_vm3, %v1026_v12, 0.0  ;;  %v2281_v19 = vld [vmem:[%s6181_s4] sm:$0xff] }
 0x12f   : > { %2401 = vmatpush.msra.mxu1 %v2283_v38  ;;  %4125 = vmatpush.msra.mxu2 %v2283_v38 }
 0x130   : > { %v4697_v25 = vpop.permute.xlu1 %1651  ;;  %4126 = vmatpush.msrb.mxu3 %v2283_v38  ;;  %v1027_v38 = vsel %vm1012_vm4, %v4752_v48, %v1026_v12  ;;  %v6243_v12 = vrot.slane %v4773_v34, 1 }
 0x131   : > { %1827 = vrot.lane.b32.xlu0 %v4701_v51, %s4175_s30  ;;  %2402 = vmatpush.msra.mxu1 %v2282_v49 }
 0x132   : > { %v835_v56 = vld.sshfl [vmem:[#allocation1] sm:$0xff pattern:$0x75316420]  ;;  %4127 = vmatpush.msra.mxu2 %v2282_v49  ;;  %4128 = vmatpush.msrb.mxu3 %v2282_v49 }
 0x133   : > { %v4717_v59 = vpop.permute.xlu0 %1501  ;;  %887 = vst.msk [vmem:[#allocation2 + $0xb0] sm:$0xff] %vm734_vm1, %v835_v56  ;;  %2403 = vmatpush.msra.mxu1 %v2281_v19  ;;  %v4771_v56 = vld [vmem:[#allocation2 + $0x60] sm:$0xff] }
 0x134   : > { %1901 = vrot.lane.b32.xlu2 %v4719_v50, %s4174_s29  ;;  %4129 = vmatpush.msra.mxu2 %v2281_v19  ;;  %v4776_v22 = vrot.slane %v4771_v56, 1 }
 0x135   : > { %4130 = vmatpush.msrb.mxu3 %v2281_v19  ;;  %v1000_v19 = vsel %vm939_vm5, 0.0, %v6300_v18 }
 0x136   : > { %v4740_v47 = vpop.permute.xlu2 %1421  ;;  %1665 = vrot.lane.b32.xlu1 %v4731_v39, %s4172_s27  ;;  %v4798_v21 = vsel %vm1012_vm4, %v4776_v22, %v6243_v12 }
 0x138   : > { %v4757_v42 = vpop.permute.xlu1 %1417 }
 0x139   : > { %1513 = vrot.lane.b32.xlu0 %v1066_v53, %s4170_s19  ;;  %v666_v53 = vpop.f32.mrf.mxu3 }
 0x13a   : > { %v692_v49 = vmul.f32 %v4450_v60, %v666_v53  ;;  %v1299_v53 = vsel %vm939_vm5, %v4564_v32, %v1298_v41 }
 0x13b   : > { %v4765_v52 = vpop.permute.xlu0 %1581 }
 0x13c   : > { %1511 = vrot.lane.b32.xlu2 %v1027_v38, %s4170_s19  ;;  %v1358_v38 = vrot.slane %v4719_v50, 1  ;;  %v714_v23 = vadd.f32 %v4457_v61, %v692_v49  ;;  %v2047_v50 = vsel %vm734_vm1, %v1000_v19, %v4618_v63  ;;  %v1192_v19 = vrot.slane %v4731_v39, 1 }
 0x13d   : > { %v2071_v41 = vsel %vm564_vm0, %v2047_v50, %v4659_v58  ;;  %v1135_v58 = vrot.slane %v4713_v43, 7 }
 0x13e   : > { %v4779_v20 = vpop.permute.xlu2 %1893  ;;  %1591 = vrot.lane.b32.xlu1 %v4701_v51, %s4171_s24  ;;  %v732_v9 = vmax.f32 %v714_v23, 0.0  ;;  %v1359_v18 = vsel %vm1012_vm4, %v4752_v48, %v1358_v38  ;;  %v1401_v23 = vsel %vm1061_vm3, %v1358_v38, 0.0  ;;  %v2096_v63 = vsel %vm2095_vm6, %v2071_v41, %v4680_v29 }
 0x13f   : > { %v1132_v38 = vrot.slane %v4731_v39, 7 }
 0x140   : > { %v4789_v14 = vpop.permute.xlu1 %1737  ;;  %v775_v49 = vrot.slane %v732_v9, 4  ;;  %834 = vst [vmem:[#allocation1 + $0x10] ss:$2 sm:$0xff] %v732_v9  ;;  %v2121_v9 = vsel %vm2120_vm7, %v2096_v63, %v4697_v25 }
 0x141   : > { %1829 = vrot.lane.b32.xlu0 %v1299_v53, %s4175_s30  ;;  %v2146_v29 = vsel %vm2145_vm8, %v2121_v9, %v4667_v45  ;;  %v1133_v41 = vsel %vm939_vm5, %v4564_v32, %v1132_v38  ;;  %v1136_v45 = vsel %vm939_vm5, %v4722_v30, %v1135_v58  ;;  %v669_v9 = vpop.f32.mrf.mxu3  ;;  %v1233_v58 = vsel %vm1061_vm3, %v1192_v19, 0.0 }
 0x142   : > { %837 = vst [vmem:[#allocation1 + $0x20] ss:$2 sm:$0xff] %v775_v49 }
 0x143   : > { %v4802_v40 = vpop.permute.xlu0 %1655 }
 0x144   : > { %1983 = vrot.lane.b32.xlu2 %v1359_v18, %s4176_s14 }
 0x146   : > { %v4810_v53 = vpop.permute.xlu2 %1505  ;;  %1985 = vrot.lane.b32.xlu1 %v1401_v23, %s4176_s14  ;;  %v1193_v23 = vsel %vm1012_vm4, %v4752_v48, %v1192_v19  ;;  %v2048_v19 = vsel %vm734_vm1, %v4572_v46, %v4638_v27 }
 0x147   : > { %v836_v50 = vld.sshfl [vmem:[#allocation1 + $0x10] sm:$0xff pattern:$0x75316420] }
 0x148   : > { %v1892_v18 = vpop.permute.xlu1 %1891  ;;  %888 = vst.msk [vmem:[#allocation2 + $0xb8] sm:$0xf] %vm736_vm2, %v836_v50  ;;  %v693_v50 = vmul.f32 %v4450_v60, %v669_v9  ;;  %v2072_v9 = vsel %vm564_vm0, %v2048_v19, %v4651_v36 }
 0x149   : > { %1903 = vrot.lane.b32.xlu0 %v4705_v13, %s4174_s29  ;;  %v2097_v27 = vsel %vm2095_vm6, %v2072_v9, %v4765_v52 }
 0x14b   : > { %v1820_v49 = vpop.permute.xlu0 %1819 }
 0x14c   : > { %v2171_v25 = vsel %vm2170_vm9, %v2146_v29, %v1820_v49  ;;  %1747 = vrot.lane.b32.xlu2 %v1193_v23, %s4173_s28 }
 0x14d   : > { %v2196_v39 = vsel %vm2195_vm10, %v2171_v25, %v1892_v18  ;;  %v715_v18 = vadd.f32 %v4457_v61, %v693_v50  ;;  %v4872_v50 = vld [vmem:[#allocation2 + $0x68] sm:$0xf] }
 0x14e   : > { %v1976_v63 = vpop.permute.xlu2 %1975  ;;  %1593 = vrot.lane.b32.xlu1 %v1133_v41, %s4171_s24 }
 0x14f   : > { %v2221_v48 = vsel %vm2220_vm11, %v2196_v39, %v1976_v63  ;;  %v733_v38 = vmax.f32 %v715_v18, 0.0 }
 0x150   : > { %v2269_v49 = vrot.slane %v2221_v48, 4  ;;  %2290 = vst [vmem:[#allocation1] ss:$2 sm:$0xff] %v2221_v48  ;;  %v4837_v29 = vpop.permute.xlu1 %1657  ;;  %v1029_v48 = vrot.slane %v4715_v33, 1 }
 0x151   : > { %1597 = vrot.lane.b32.xlu0 %v1136_v45, %s4171_s24  ;;  %v776_v23 = vrot.slane %v733_v38, 4  ;;  %838 = vst [vmem:[#allocation1 + $0x21] ss:$2 sm:$0xff] %v733_v38  ;;  %v4879_v38 = vld [vmem:[#allocation2 + $0x70] sm:$0xff] }
 0x152   : > { %2292 = vst [vmem:[#allocation1 + $0x1] ss:$2 sm:$0xff] %v2269_v49  ;;  %v2122_v49 = vsel %vm2120_vm7, %v2097_v27, %v4632_v1  ;;  %v1067_v36 = vsel %vm1061_vm3, %v1029_v48, 0.0 }
 0x153   : > { %v1822_v32 = vpop.permute.xlu0 %1821  ;;  %839 = vst [vmem:[#allocation1 + $0x30] ss:$2 sm:$0xff] %v776_v23  ;;  %v2147_v52 = vsel %vm2145_vm8, %v2122_v49, %v4789_v14  ;;  %v4887_v23 = vld [vmem:[#allocation2 + $0x58] sm:$0xf] }
 0x154   : > { %1433 = vrot.lane.b32.xlu2 %v4715_v33, %s4169_s18  ;;  %v6245_v33 = vrot.slane %v4872_v50, 1  ;;  %v2172_v19 = vsel %vm2170_vm9, %v2147_v52, %v1822_v32  ;;  %v6244_v9 = vrot.slane %v4887_v23, 1  ;;  %v4915_v52 = vld [vmem:[#allocation2 + $0x68] sm:$0xf] }
 0x155   : > { %v2197_v49 = vsel %vm2195_vm10, %v2172_v19, %v4779_v20  ;;  %v6246_v20 = vrot.slane %v4915_v52, 1  ;;  %v1030_v19 = vsel %vm1012_vm4, %v4711_v55, %v1029_v48 }
 0x156   : > { %v4844_v25 = vpop.permute.xlu2 %1739  ;;  %1749 = vrot.lane.b32.xlu1 %v1233_v58, %s4173_s28  ;;  %v4881_v58 = vld [vmem:[#allocation2 + $0x78] sm:$0xf]  ;;  %v1033_v32 = vsel %vm1012_vm4, %v4776_v22, %v6245_v33  ;;  %v1362_v12 = vsel %vm1012_vm4, %v4711_v55, %v6244_v9  ;;  %v4937_v9 = vld [vmem:[#allocation2 + $0x88] sm:$0xf] }
 0x157   : > { %v962_v1 = vrot.slane %v4881_v58, 7  ;;  %v965_v48 = vrot.slane %v4937_v9, 7 }
 0x158   : > { %v1584_v60 = vpop.permute.xlu1 %1583  ;;  %v840_v41 = vld.sshfl [vmem:[#allocation1 + $0x20] sm:$0xff pattern:$0x75316420] }
 0x159   : > { %v2305_v39 = vld.sshfl [vmem:[#allocation1] sm:$0xff pattern:$0x75316420]  ;;  %1435 = vrot.lane.b32.xlu0 %v4771_v56, %s4169_s18  ;;  %889 = vst.msk [vmem:[#allocation2 + $0xc0] sm:$0xff] %vm734_vm1, %v840_v41  ;;  %v4896_v41 = vsel %vm939_vm5, 0.0, %v4722_v30 }
 0x15a   : > { %3937 = vmatmul.msk.f32.vlgmr.msra.gmra.mxu1 %vm2351_vm12, %v2305_v39  ;;  %v841_v45 = vld.sshfl [vmem:[#allocation1 + $0x30] sm:$0xff pattern:$0x75316420]  ;;  %v4890_v39 = vrot.slane %v4879_v38, 7 }
 0x15b   : > { %v4850_v61 = vpop.permute.xlu0 %1585  ;;  %890 = vst.msk [vmem:[#allocation2 + $0xc8] sm:$0xf] %vm736_vm2, %v841_v45  ;;  %vm3086_vm2 = vcmask 1044484  }
 0x15c   : > { %1669 = vrot.lane.b32.xlu2 %v4713_v43, %s4172_s27  ;;  %v4904_v14 = vsel %vm939_vm5, %v4890_v39, %v962_v1 }
 0x15e   : > { %v4858_v63 = vpop.permute.xlu2 %1741  ;;  %1431 = vrot.lane.b32.xlu1 %v4705_v13, %s4169_s18 }
 0x160   : > { %v4867_v46 = vpop.permute.xlu1 %1503 }
 0x161   : > { %1671 = vrot.lane.b32.xlu0 %v4771_v56, %s4172_s27 }
 0x163   : > { %v4876_v18 = vpop.permute.xlu0 %1423 }
 0x164   : > { %1517 = vrot.lane.b32.xlu2 %v1067_v36, %s4170_s19 }
 0x166   : > { %v4898_v45 = vpop.permute.xlu2 %1661  ;;  %1831 = vrot.lane.b32.xlu1 %v4896_v41, %s4175_s30 }
 0x168   : > { %v1978_v27 = vpop.permute.xlu1 %1977 }
 0x169   : > { %v2222_v36 = vsel %vm2220_vm11, %v2197_v49, %v1978_v27  ;;  %1519 = vrot.lane.b32.xlu0 %v1033_v32, %s4170_s19  ;;  %v2049_v27 = vsel %vm734_vm1, %v4473_v62, %v4670_v44  ;;  %v1301_v62 = vrot.slane %v4887_v23, 7 }
 0x16a   : > { %2294 = vst [vmem:[#allocation1 + $0x10] ss:$2 sm:$0xff] %v2222_v36  ;;  %v1199_v36 = vsel %vm1012_vm4, %v4776_v22, %v6246_v20  ;;  %v2073_v55 = vsel %vm564_vm0, %v2049_v27, %v4648_v57  ;;  %v6301_v22 = vrot.slane %v4713_v43, 1 }
 0x16b   : > { %v1896_v1 = vpop.permute.xlu0 %1895 }
 0x16c   : > { %1987 = vrot.lane.b32.xlu2 %v1362_v12, %s4176_s14  ;;  %v4935_v12 = vld [vmem:[#allocation2 + $0x80] sm:$0xff]  ;;  %v1234_v20 = vsel %vm1061_vm3, %v6301_v22, 0.0  ;;  %v4990_v22 = vrot.slane %v4771_v56, 7 }
 0x16d   : > { %v4944_v44 = vrot.slane %v4935_v12, 7 }
 0x16e   : > { %v1980_v49 = vpop.permute.xlu2 %1979  ;;  %1515 = vrot.lane.b32.xlu1 %v1030_v19, %s4170_s19  ;;  %v2098_v19 = vsel %vm2095_vm6, %v2073_v55, %v1584_v60  ;;  %v5029_v6 = vsel %vm939_vm5, 0.0, %v4990_v22 }
 0x16f   : > { %v4955_v57 = vsel %vm939_vm5, %v4944_v44, %v965_v48  ;;  %v2123_v27 = vsel %vm2120_vm7, %v2098_v19, %v4802_v40 }
 0x170   : > { %v4929_v32 = vpop.permute.xlu1 %1659  ;;  %v2148_v43 = vsel %vm2145_vm8, %v2123_v27, %v4844_v25  ;;  %v1304_v27 = vrot.slane %v4773_v34, 7 }
 0x171   : > { %1755 = vrot.lane.b32.xlu0 %v1199_v36, %s4173_s28  ;;  %v1302_v36 = vsel %vm939_vm5, %v4722_v30, %v1301_v62  ;;  %v2050_v30 = vsel %vm734_vm1, %v4483_v28, %v4757_v42  ;;  %v4987_v62 = vld [vmem:[#allocation2 + $0x90] sm:$0xff] }
 0x172   : > { %v4995_v28 = vrot.slane %v4987_v62, 7 }
 0x173   : > { %v4948_v33 = vpop.permute.xlu0 %1587 }
 0x174   : > { %1753 = vrot.lane.b32.xlu2 %v1234_v20, %s4173_s28 }
 0x176   : > { %v1982_v17 = vpop.permute.xlu2 %1981  ;;  %1833 = vrot.lane.b32.xlu1 %v1302_v36, %s4175_s30  ;;  %v2074_v36 = vsel %vm564_vm0, %v2050_v30, %v4717_v59  ;;  %v1305_v59 = vsel %vm939_vm5, %v4990_v22, %v1304_v27 }
 0x178   : > { %v1824_v60 = vpop.permute.xlu1 %1823 }
 0x179   : > { %v2173_v55 = vsel %vm2170_vm9, %v2148_v43, %v1824_v60  ;;  %1911 = vrot.lane.b32.xlu0 %v4879_v38, %s4174_s29  ;;  %v5001_v60 = vld [vmem:[#allocation2 + $0xa8] sm:$0xf] }
 0x17a   : > { %v2198_v20 = vsel %vm2195_vm10, %v2173_v55, %v1896_v1  ;;  %v4983_v1 = vsel %vm939_vm5, 0.0, %v4890_v39  ;;  %v5003_v55 = vld [vmem:[#allocation2 + $0xa0] sm:$0xff] }
 0x17b   : > { %v2223_v48 = vsel %vm2220_vm11, %v2198_v20, %v1980_v49  ;;  %v4970_v40 = vpop.permute.xlu0 %1507  ;;  %v4985_v49 = vld [vmem:[#allocation2 + $0x98] sm:$0xf]  ;;  %v2099_v20 = vsel %vm2095_vm6, %v2074_v36, %v4850_v61 }
 0x17c   : > { %v2270_v19 = vrot.slane %v2223_v48, 4  ;;  %2296 = vst [vmem:[#allocation1 + $0x11] ss:$2 sm:$0xff] %v2223_v48  ;;  %1909 = vrot.lane.b32.xlu2 %v4773_v34, %s4174_s29  ;;  %v968_v42 = vrot.slane %v4985_v49, 7  ;;  %v971_v48 = vrot.slane %v5001_v60, 7  ;;  %v2124_v61 = vsel %vm2120_vm7, %v2099_v20, %v4837_v29 }
 0x17d   : > { %v5057_v34 = vld [vmem:[#allocation2 + $0x78] sm:$0xf] }
 0x17e   : > { %2298 = vst [vmem:[#allocation1 + $0x20] ss:$2 sm:$0xff] %v2270_v19  ;;  %v4977_v25 = vpop.permute.xlu2 %1743  ;;  %1437 = vrot.lane.b32.xlu1 %v4872_v50, %s4169_s18  ;;  %v5011_v19 = vrot.slane %v5003_v55, 7  ;;  %v5017_v10 = vsel %vm939_vm5, %v4995_v28, %v968_v42  ;;  %v2149_v42 = vsel %vm2145_vm8, %v2124_v61, %v4858_v63  ;;  %v1035_v63 = vrot.slane %v4881_v58, 1 }
 0x180   : > { %v4999_v43 = vpop.permute.xlu1 %1425  ;;  %v5025_v36 = vsel %vm939_vm5, %v5011_v19, %v971_v48 }
 0x181   : > { %1839 = vrot.lane.b32.xlu0 %v4983_v1, %s4175_s30 }
 0x183   : > { %v1826_v15 = vpop.permute.xlu0 %1825  ;;  %v2306_v30 = vld.sshfl [vmem:[#allocation1 + $0x10] sm:$0xff pattern:$0x75316420] }
 0x184   : > { %1837 = vrot.lane.b32.xlu2 %v1305_v59, %s4175_s30  ;;  %3938 = vmatmul.msk.f32.gmra.mxu1 %vm2351_vm12, %v2306_v30  ;;  %v2174_v29 = vsel %vm2170_vm9, %v2149_v42, %v1826_v15  ;;  %v6303_v15 = vrot.slane %v4872_v50, 1 }
 0x186   : > { %v1428_v27 = vpop.permute.xlu2 %1427  ;;  %1599 = vrot.lane.b32.xlu1 %v5029_v6, %s4171_s24  ;;  %v1068_v61 = vsel %vm1061_vm3, %v6303_v15, 0.0 }
 0x188   : > { %v1898_v20 = vpop.permute.xlu1 %1897 }
 0x189   : > { %v2199_v59 = vsel %vm2195_vm10, %v2174_v29, %v1898_v20  ;;  %1441 = vrot.lane.b32.xlu0 %v4881_v58, %s4169_s18  ;;  %v5063_v58 = vrot.slane %v4879_v38, 1  ;;  %v6261_v20 = vrot.slane %v5057_v34, 1 }
 0x18a   : > { %v2224_v48 = vsel %vm2220_vm11, %v2199_v59, %v1982_v17  ;;  %v1069_v17 = vsel %vm1061_vm3, %v1035_v63, 0.0  ;;  %v2055_v59 = vsel %vm734_vm1, %v4701_v51, %v1428_v27  ;;  %v5082_v51 = vld [vmem:[#allocation2 + $0xb8] sm:$0xf] }
 0x18b   : > { %2300 = vst [vmem:[#allocation1 + $0x21] ss:$2 sm:$0xff] %v2224_v48  ;;  %v5040_v30 = vpop.permute.xlu0 %1589  ;;  %v1036_v7 = vsel %vm1012_vm4, %v5063_v58, %v1035_v63 }
 0x18c   : > { %1993 = vrot.lane.b32.xlu2 %v1403_v11, %s4176_s14 }
 0x18e   : > { %v5050_v42 = vpop.permute.xlu2 %1901  ;;  %1521 = vrot.lane.b32.xlu1 %v1068_v61, %s4170_s19 }
 0x190   : > { %v5054_v29 = vpop.permute.xlu1 %1509 }
 0x191   : > { %1525 = vrot.lane.b32.xlu0 %v1069_v17, %s4170_s19  ;;  %v1368_v17 = vsel %vm1012_vm4, %v5063_v58, %v6261_v20 }
 0x192   : > { %v2307_v5 = vld.sshfl [vmem:[#allocation1 + $0x20] sm:$0xff pattern:$0x75316420] }
 0x193   : > { %v5059_v11 = vpop.permute.xlu0 %1663  ;;  %3939 = vmatmul.msk.f32.gmra.mxu1 %vm2351_vm12, %v2307_v5 }
 0x194   : > { %1439 = vrot.lane.b32.xlu2 %v4879_v38, %s4169_s18 }
 0x196   : > { %v1512_v48 = vpop.permute.xlu2 %1511  ;;  %1443 = vrot.lane.b32.xlu1 %v4935_v12, %s4169_s18 }
 0x197   : > { %v5073_v15 = vsel %vm564_vm0, %v2055_v59, %v1512_v48  ;;  %v974_v59 = vrot.slane %v5082_v51, 7  ;;  %v5090_v48 = vld [vmem:[#allocation2 + $0xb0] sm:$0xff] }
 0x198   : > { %v1746_v61 = vpop.permute.xlu1 %1745  ;;  %v5096_v20 = vrot.slane %v5090_v48, 7 }
 0x199   : > { %1995 = vrot.lane.b32.xlu0 %v1368_v17, %s4176_s14  ;;  %v2051_v17 = vsel %vm734_vm1, %v4511_v31, %v4689_v37 }
 0x19a   : > { %v2075_v63 = vsel %vm564_vm0, %v2051_v17, %v4867_v46 }
 0x19b   : > { %v1430_v5 = vpop.permute.xlu0 %1429 }
 0x19c   : > { %v5086_v27 = vsel %vm734_vm1, %v4579_v54, %v1430_v5  ;;  %1523 = vrot.lane.b32.xlu2 %v1036_v7, %s4170_s19  ;;  %v2100_v7 = vsel %vm2095_vm6, %v2075_v63, %v4948_v33  ;;  %v5106_v54 = vsel %vm939_vm5, %v5096_v20, %v974_v59  ;;  %v5120_v59 = vsel %vm939_vm5, 0.0, %v4944_v44 }
 0x19d   : > { %v2125_v31 = vsel %vm2120_vm7, %v2100_v7, %v4929_v32  ;;  %v5128_v7 = vrot.slane %v4935_v12, 1 }
 0x19e   : > { %v1984_v8 = vpop.permute.xlu2 %1983  ;;  %1449 = vrot.lane.b32.xlu1 %v4985_v49, %s4169_s18  ;;  %v2150_v37 = vsel %vm2145_vm8, %v2125_v31, %v4977_v25 }
 0x1a0   : > { %v1900_v5 = vpop.permute.xlu1 %1899 }
 0x1a1   : > { %1447 = vrot.lane.b32.xlu0 %v4987_v62, %s4169_s18 }
 0x1a3   : > { %v1828_v46 = vpop.permute.xlu0 %1827 }
 0x1a4   : > { %v2175_v17 = vsel %vm2170_vm9, %v2150_v37, %v1828_v46  ;;  %1445 = vrot.lane.b32.xlu2 %v4937_v9, %s4169_s18  ;;  %v2052_v46 = vsel %vm734_vm1, %v4500_v24, %v4740_v47 }
 0x1a5   : > { %v2200_v33 = vsel %vm2195_vm10, %v2175_v17, %v1900_v5  ;;  %v1038_v5 = vrot.slane %v4937_v9, 1  ;;  %v2053_v9 = vsel %vm734_vm1, %v4592_v0, %v4876_v18 }
 0x1a6   : > { %v2225_v63 = vsel %vm2220_vm11, %v2200_v33, %v1984_v8  ;;  %v5123_v3 = vpop.permute.xlu2 %1747  ;;  %1607 = vrot.lane.b32.xlu1 %v5120_v59, %s4171_s24  ;;  %v2076_v33 = vsel %vm564_vm0, %v2052_v46, %v4810_v53 }
 0x1a7   : > { %v2271_v32 = vrot.slane %v2225_v63, 4  ;;  %2302 = vst [vmem:[#allocation1 + $0x30] ss:$2 sm:$0xff] %v2225_v63  ;;  %v1070_v8 = vsel %vm1061_vm3, %v1038_v5, 0.0  ;;  %v1039_v37 = vsel %vm1012_vm4, %v5128_v7, %v1038_v5  ;;  %v2101_v5 = vsel %vm2095_vm6, %v2076_v33, %v5040_v30 }
 0x1a8   : > { %v1666_v25 = vpop.permute.xlu1 %1665 }
 0x1a9   : > { %2304 = vst [vmem:[#allocation1 + $0x31] ss:$2 sm:$0xff] %v2271_v32  ;;  %1453 = vrot.lane.b32.xlu0 %v5001_v60, %s4169_s18  ;;  %v2077_v32 = vsel %vm564_vm0, %v2053_v9, %v4970_v40  ;;  %v1138_v40 = vrot.slane %v4915_v52, 7 }
 0x1ab   : > { %v5133_v31 = vpop.permute.xlu0 %1513 }
 0x1ac   : > { %1529 = vrot.lane.b32.xlu2 %v1070_v8, %s4170_s19 }
 0x1ae   : > { %v1434_v17 = vpop.permute.xlu2 %1433  ;;  %1527 = vrot.lane.b32.xlu1 %v1039_v37, %s4170_s19  ;;  %v6304_v37 = vrot.slane %v4887_v23, 1 }
 0x1af   : > { %v2058_v63 = vsel %vm734_vm1, %v4738_v26, %v1434_v17  ;;  %v2126_v26 = vsel %vm2120_vm7, %v2101_v5, %v4898_v45  ;;  %v1089_v5 = vld [vmem:[#allocation2 + $0x88] sm:$0xf] }
 0x1b0   : > { %v1592_v47 = vpop.permute.xlu1 %1591  ;;  %v2308_v24 = vld.sshfl [vmem:[#allocation1 + $0x30] sm:$0xff pattern:$0x75316420]  ;;  %v2151_v18 = vsel %vm2145_vm8, %v2126_v26, %v1746_v61  ;;  %v1402_v46 = vsel %vm1061_vm3, %v6304_v37, 0.0  ;;  %v1139_v61 = vsel %vm939_vm5, %v4990_v22, %v1138_v40  ;;  %v1204_v37 = vrot.slane %v1089_v5, 1 }
 0x1b1   : > { %v2102_v8 = vsel %vm2095_vm6, %v2077_v32, %v1592_v47  ;;  %1679 = vrot.lane.b32.xlu0 %v4935_v12, %s4172_s27  ;;  %3940 = vmatmul.msk.f32.gmra.mxu1 %vm2351_vm12, %v2308_v24 }
 0x1b2   : > { %v2127_v0 = vsel %vm2120_vm7, %v2102_v8, %v5059_v11 }
 0x1b3   : > { %v1830_v53 = vpop.permute.xlu0 %1829 }
 0x1b4   : > { %1451 = vrot.lane.b32.xlu2 %v5003_v55, %s4169_s18  ;;  %v2176_v30 = vsel %vm2170_vm9, %v2151_v18, %v1830_v53  ;;  %v1144_v53 = vrot.slane %v1089_v5, 7 }
 0x1b5   : > { %v2201_v45 = vsel %vm2195_vm10, %v2176_v30, %v5050_v42  ;;  %v2054_v42 = vsel %vm734_vm1, %v4533_v16, %v4999_v43 }
 0x1b6   : > { %v5170_v17 = vpop.permute.xlu2 %1669  ;;  %1989 = vrot.lane.b32.xlu1 %v1402_v46, %s4176_s14  ;;  %v2078_v24 = vsel %vm564_vm0, %v2054_v42, %v5054_v29  ;;  %v1145_v16 = vsel %vm939_vm5, %v4944_v44, %v1144_v53  ;;  %v2152_v42 = vsel %vm2145_vm8, %v2127_v0, %v5123_v3  ;;  %v2080_v3 = vsel %vm564_vm0, %v5086_v27, %v5133_v31 }
 0x1b8   : > { %v1986_v11 = vpop.permute.xlu1 %1985 }
 0x1b9   : > { %v2226_v33 = vsel %vm2220_vm11, %v2201_v45, %v1986_v11  ;;  %1601 = vrot.lane.b32.xlu0 %v1139_v61, %s4171_s24  ;;  %v1237_v11 = vsel %vm1061_vm3, %v1204_v37, 0.0  ;;  %v1205_v61 = vsel %vm1012_vm4, %v5128_v7, %v1204_v37 }
 0x1ba   : > { %2309 = vst [vmem:[#allocation1] ss:$2 sm:$0xff] %v2226_v33  ;;  %v1307_v33 = vrot.slane %v5057_v34, 7 }
 0x1bb   : > { %v1904_v9 = vpop.permute.xlu0 %1903 }
 0x1bc   : > { %1457 = vrot.lane.b32.xlu2 %v5082_v51, %s4169_s18 }
 0x1be   : > { %v1518_v32 = vpop.permute.xlu2 %1517  ;;  %1455 = vrot.lane.b32.xlu1 %v5090_v48, %s4169_s18 }
 0x1bf   : > { %v5187_v47 = vsel %vm564_vm0, %v2058_v63, %v1518_v32  ;;  %v5202_v63 = vsel %vm939_vm5, 0.0, %v4995_v28 }
 0x1c0   : > { %v1594_v8 = vpop.permute.xlu1 %1593 }
 0x1c1   : > { %v2103_v26 = vsel %vm2095_vm6, %v2078_v24, %v1594_v8  ;;  %1667 = vrot.lane.b32.xlu0 %v4705_v13, %s4172_s27  ;;  %v1308_v8 = vsel %vm939_vm5, %v4890_v39, %v1307_v33 }
 0x1c2   : > { %v2128_v18 = vsel %vm2120_vm7, %v2103_v26, %v1666_v25 }
 0x1c3   : > { %v1598_v40 = vpop.permute.xlu0 %1597 }
 0x1c4   : > { %1905 = vrot.lane.b32.xlu2 %v4887_v23, %s4174_s29  ;;  %v2105_v0 = vsel %vm2095_vm6, %v2080_v3, %v1598_v40  ;;  %v6305_v40 = vrot.slane %v4915_v52, 1 }
 0x1c5   : > { %v2130_v37 = vsel %vm2120_vm7, %v2105_v0, %v5170_v17 }
 0x1c6   : > { %v1988_v43 = vpop.permute.xlu2 %1987  ;;  %1609 = vrot.lane.b32.xlu1 %v1145_v16, %s4171_s24 }
 0x1c8   : > { %v1750_v29 = vpop.permute.xlu1 %1749 }
 0x1c9   : > { %v5205_v13 = vsel %vm2145_vm8, %v2128_v18, %v1750_v29  ;;  %1847 = vrot.lane.b32.xlu0 %v5202_v63, %s4175_s30 }
 0x1cb   : > { %v1436_v25 = vpop.permute.xlu0 %1435 }
 0x1cc   : > { %v2059_v23 = vsel %vm734_vm1, %v5029_v6, %v1436_v25  ;;  %1595 = vrot.lane.b32.xlu2 %v4896_v41, %s4171_s24 }
 0x1ce   : > { %v1754_v30 = vpop.permute.xlu2 %1753  ;;  %1673 = vrot.lane.b32.xlu1 %v4915_v52, %s4172_s27 }
 0x1d0   : > { %v5215_v46 = vpop.permute.xlu1 %1431 }
 0x1d1   : > { %1765 = vrot.lane.b32.xlu0 %v1237_v11, %s4173_s28  ;;  %v1235_v11 = vsel %vm1061_vm3, %v6305_v40, 0.0 }
 0x1d3   : > { %v5219_v45 = vpop.permute.xlu0 %1671 }
 0x1d4   : > { %1763 = vrot.lane.b32.xlu2 %v1205_v61, %s4173_s28 }
 0x1d6   : > { %v1910_v32 = vpop.permute.xlu2 %1909  ;;  %1751 = vrot.lane.b32.xlu1 %v4749_v35, %s4173_s28 }
 0x1d8   : > { %v1832_v24 = vpop.permute.xlu1 %1831 }
 0x1d9   : > { %v2177_v26 = vsel %vm2170_vm9, %v2152_v42, %v1832_v24  ;;  %1841 = vrot.lane.b32.xlu0 %v1308_v8, %s4175_s30  ;;  %v959_v24 = vrot.slane %v4872_v50, 7 }
 0x1da   : > { %v2202_v53 = vsel %vm2195_vm10, %v2177_v26, %v1904_v9  ;;  %v1258_v9 = vld [vmem:[#allocation2 + $0x98] sm:$0xf] }
 0x1db   : > { %v2227_v18 = vsel %vm2220_vm11, %v2202_v53, %v1988_v43  ;;  %v1520_v16 = vpop.permute.xlu0 %1519  ;;  %v1373_v26 = vrot.slane %v1258_v9, 1  ;;  %v960_v53 = vsel %vm939_vm5, %v4990_v22, %v959_v24 }
 0x1dc   : > { %v2272_v29 = vrot.slane %v2227_v18, 4  ;;  %2310 = vst [vmem:[#allocation1 + $0x1] ss:$2 sm:$0xff] %v2227_v18  ;;  %v5236_v35 = vsel %vm564_vm0, %v2059_v23, %v1520_v16  ;;  %1681 = vrot.lane.b32.xlu2 %v1089_v5, %s4172_s27  ;;  %v1313_v5 = vrot.slane %v1258_v9, 7  ;;  %v2155_v23 = vsel %vm2145_vm8, %v2130_v37, %v1754_v30 }
 0x1dd   : > { %v6306_v16 = vrot.slane %v5057_v34, 1 }
 0x1de   : > { %2311 = vst [vmem:[#allocation1 + $0x10] ss:$2 sm:$0xff] %v2272_v29  ;;  %v1838_v25 = vpop.permute.xlu2 %1837  ;;  %1919 = vrot.lane.b32.xlu1 %v4987_v62, %s4174_s29  ;;  %v1314_v17 = vsel %vm939_vm5, %v4995_v28, %v1313_v5 }
 0x1df   : > { %v2180_v27 = vsel %vm2170_vm9, %v2155_v23, %v1838_v25  ;;  %v1404_v29 = vsel %vm1061_vm3, %v6306_v16, 0.0 }
 0x1e0   : > { %v1516_v43 = vpop.permute.xlu1 %1515 }
 0x1e1   : > { %1907 = vrot.lane.b32.xlu0 %v4771_v56, %s4174_s29  ;;  %v2205_v56 = vsel %vm2195_vm10, %v2180_v27, %v1910_v32  ;;  %v5271_v32 = vrot.slane %v4987_v62, 1  ;;  %v5301_v27 = vld [vmem:[#allocation2 + $0x78] sm:$0xf] }
 0x1e3   : > { %v1756_v31 = vpop.permute.xlu0 %1755  ;;  %v2317_v61 = vld.sshfl [vmem:[#allocation1] sm:$0xff pattern:$0x75316420]  ;;  %v1374_v50 = vsel %vm1012_vm4, %v5271_v32, %v1373_v26 }
 0x1e4   : > { %1757 = vrot.lane.b32.xlu2 %v1235_v11, %s4173_s28  ;;  %3941 = vmatmul.msk.f32.gmra.mxu1 %vm2351_vm12, %v2317_v61  ;;  %v1406_v11 = vsel %vm1061_vm3, %v1373_v26, 0.0 }
 0x1e6   : > { %v1994_v33 = vpop.permute.xlu2 %1993  ;;  %1849 = vrot.lane.b32.xlu1 %v1314_v17, %s4175_s30 }
 0x1e7   : > { %v2230_v30 = vsel %vm2220_vm11, %v2205_v56, %v1994_v33 }
 0x1e8   : > { %2315 = vst [vmem:[#allocation1 + $0x30] ss:$2 sm:$0xff] %v2230_v30  ;;  %v5261_v42 = vpop.permute.xlu1 %1833 }
 0x1e9   : > { %1991 = vrot.lane.b32.xlu0 %v4798_v21, %s4176_s14 }
 0x1eb   : > { %v1912_v52 = vpop.permute.xlu0 %1911 }
 0x1ec   : > { %1835 = vrot.lane.b32.xlu2 %v5029_v6, %s4175_s30 }
 0x1ee   : > { %v1440_v8 = vpop.permute.xlu2 %1439  ;;  %1913 = vrot.lane.b32.xlu1 %v5057_v34, %s4174_s29 }
 0x1ef   : > { %v2061_v3 = vsel %vm734_vm1, %v4983_v1, %v1440_v8 }
 0x1f0   : > { %v1438_v18 = vpop.permute.xlu1 %1437 }
 0x1f1   : > { %v2060_v21 = vsel %vm734_vm1, %v960_v53, %v1438_v18  ;;  %1603 = vrot.lane.b32.xlu0 %v4983_v1, %s4171_s24  ;;  %v2057_v1 = vsel %vm734_vm1, %v4896_v41, %v5215_v46  ;;  %v1201_v41 = vrot.slane %v5301_v27, 1  ;;  %v5338_v53 = vld [vmem:[#allocation2 + $0x98] sm:$0xf] }
 0x1f2   : > { %v2081_v34 = vsel %vm564_vm0, %v2057_v1, %v1516_v43 }
 0x1f3   : > { %v1840_v6 = vpop.permute.xlu0 %1839  ;;  %v1202_v17 = vsel %vm1012_vm4, %v5063_v58, %v1201_v41  ;;  %v1041_v58 = vrot.slane %v4985_v49, 1 }
 0x1f4   : > { %2003 = vrot.lane.b32.xlu2 %v1374_v50, %s4176_s14  ;;  %v1207_v50 = vrot.slane %v5338_v53, 1 }
 0x1f6   : > { %v1524_v22 = vpop.permute.xlu2 %1523  ;;  %1997 = vrot.lane.b32.xlu1 %v1404_v29, %s4176_s14 }
 0x1f7   : > { %v5288_v0 = vsel %vm564_vm0, %v2061_v3, %v1524_v22 }
 0x1f8   : > { %v1600_v25 = vpop.permute.xlu1 %1599 }
 0x1f9   : > { %1683 = vrot.lane.b32.xlu0 %v4987_v62, %s4172_s27  ;;  %v2106_v62 = vsel %vm2095_vm6, %v2081_v34, %v1600_v25  ;;  %v1208_v25 = vsel %vm1012_vm4, %v5271_v32, %v1207_v50 }
 0x1fa   : > { %v2131_v46 = vsel %vm2120_vm7, %v2106_v62, %v5219_v45 }
 0x1fb   : > { %v1442_v37 = vpop.permute.xlu0 %1441 }
 0x1fc   : > { %v2062_v5 = vsel %vm734_vm1, %v4904_v14, %v1442_v37  ;;  %1921 = vrot.lane.b32.xlu2 %v1258_v9, %s4174_s29 }
 0x1fe   : > { %v1446_v23 = vpop.permute.xlu2 %1445  ;;  %1611 = vrot.lane.b32.xlu1 %v5202_v63, %s4171_s24 }
 0x1ff   : > { %v2064_v40 = vsel %vm734_vm1, %v4955_v57, %v1446_v23  ;;  %v2156_v57 = vsel %vm2145_vm8, %v2131_v46, %v1756_v31 }
 0x200   : > { %v1522_v14 = vpop.permute.xlu1 %1521  ;;  %v2181_v30 = vsel %vm2170_vm9, %v2156_v57, %v1840_v6  ;;  %v5343_v6 = vld [vmem:[#allocation2 + $0x88] sm:$0xf] }
 0x201   : > { %v5307_v9 = vsel %vm564_vm0, %v2060_v21, %v1522_v14  ;;  %1843 = vrot.lane.b32.xlu0 %v5120_v59, %s4175_s30  ;;  %v2206_v31 = vsel %vm2195_vm10, %v2181_v30, %v1912_v52  ;;  %v1370_v3 = vrot.slane %v5343_v6, 1 }
 0x203   : > { %v1526_v43 = vpop.permute.xlu0 %1525 }
 0x204   : > { %v5316_v61 = vsel %vm564_vm0, %v2062_v5, %v1526_v43  ;;  %2005 = vrot.lane.b32.xlu2 %v1406_v11, %s4176_s14 }
 0x206   : > { %v1530_v33 = vpop.permute.xlu2 %1529  ;;  %1759 = vrot.lane.b32.xlu1 %v1202_v17, %s4173_s28  ;;  %v1147_v17 = vrot.slane %v5338_v53, 7 }
 0x207   : > { %v5326_v45 = vsel %vm564_vm0, %v2064_v40, %v1530_v33  ;;  %v5393_v40 = vrot.slane %v5003_v55, 1 }
 0x208   : > { %v1444_v56 = vpop.permute.xlu1 %1443 }
 0x209   : > { %v2063_v24 = vsel %vm734_vm1, %v5120_v59, %v1444_v56  ;;  %1923 = vrot.lane.b32.xlu0 %v5003_v55, %s4174_s29  ;;  %v1010_v59 = vsel %vm939_vm5, 0.0, %v5011_v19 }
 0x20b   : > { %v1996_v8 = vpop.permute.xlu0 %1995 }
 0x20c   : > { %v2231_v26 = vsel %vm2220_vm11, %v2206_v31, %v1996_v8  ;;  %1675 = vrot.lane.b32.xlu2 %v4879_v38, %s4172_s27  ;;  %v1042_v38 = vsel %vm1012_vm4, %v5271_v32, %v1041_v58 }
 0x20d   : > { %v2274_v18 = vrot.slane %v2231_v26, 4  ;;  %2316 = vst [vmem:[#allocation1 + $0x31] ss:$2 sm:$0xff] %v2231_v26 }
 0x20e   : > { %v1452_v21 = vpop.permute.xlu2 %1451  ;;  %1851 = vrot.lane.b32.xlu1 %v1010_v59, %s4175_s30 }
 0x20f   : > { %2321 = vst [vmem:[#allocation1] ss:$2 sm:$0xff] %v2274_v18  ;;  %v5346_v52 = vsel %vm734_vm1, %v1010_v59, %v1452_v21  ;;  %v5435_v18 = vsel %vm939_vm5, 0.0, %v5096_v20 }
 0x210   : > { %v1450_v16 = vpop.permute.xlu1 %1449 }
 0x211   : > { %v5355_v29 = vsel %vm734_vm1, %v5017_v10, %v1450_v16  ;;  %1531 = vrot.lane.b32.xlu0 %v1042_v38, %s4170_s19  ;;  %v1371_v10 = vsel %vm1012_vm4, %v5128_v7, %v1370_v3  ;;  %v5387_v7 = vld [vmem:[#allocation2 + $0xa8] sm:$0xf] }
 0x212   : > { %v1376_v14 = vrot.slane %v5387_v7, 1 }
 0x213   : > { %v1448_v22 = vpop.permute.xlu0 %1447 }
 0x214   : > { %v5365_v37 = vsel %vm734_vm1, %v5202_v63, %v1448_v22  ;;  %1767 = vrot.lane.b32.xlu2 %v1208_v25, %s4173_s28  ;;  %v1141_v63 = vrot.slane %v5301_v27, 7  ;;  %v5452_v22 = vld [vmem:[#allocation2 + $0xb8] sm:$0xf] }
 0x216   : > { %1999 = vrot.lane.b32.xlu1 %v1371_v10, %s4176_s14  ;;  %v1458_v5 = vpop.permute.xlu2 %1457  ;;  %v1238_v10 = vsel %vm1061_vm3, %v1207_v50, 0.0 }
 0x217   : > { %v5375_v1 = vsel %vm734_vm1, %v5106_v54, %v1458_v5  ;;  %v1142_v54 = vsel %vm939_vm5, %v4890_v39, %v1141_v63  ;;  %v1377_v39 = vsel %vm1012_vm4, %v5393_v40, %v1376_v14  ;;  %v5458_v5 = vrot.slane %v5090_v48, 1 }
 0x218   : > { %v5377_v34 = vpop.permute.xlu1 %1607 }
 0x219   : > { %1615 = vrot.lane.b32.xlu0 %v1010_v59, %s4171_s24 }
 0x21b   : > { %v1454_v32 = vpop.permute.xlu0 %1453 }
 0x21c   : > { %v5383_v23 = vsel %vm734_vm1, %v5025_v36, %v1454_v32  ;;  %1915 = vrot.lane.b32.xlu2 %v4935_v12, %s4174_s29  ;;  %v5401_v12 = vld [vmem:[#allocation2 + $0xa8] sm:$0xf]  ;;  %v1316_v32 = vrot.slane %v5387_v7, 7 }
 0x21d   : > { %v1210_v11 = vrot.slane %v5401_v12, 1 }
 0x21e   : > { %1605 = vrot.lane.b32.xlu1 %v1142_v54, %s4171_s24  ;;  %v1906_v62 = vpop.permute.xlu2 %1905 }
 0x21f   : > { %v1211_v30 = vsel %vm1012_vm4, %v5393_v40, %v1210_v11 }
 0x220   : > { %v1528_v46 = vpop.permute.xlu1 %1527 }
 0x221   : > { %v5397_v36 = vsel %vm564_vm0, %v2063_v24, %v1528_v46  ;;  %1687 = vrot.lane.b32.xlu0 %v5003_v55, %s4172_s27  ;;  %v2178_v55 = vsel %vm2170_vm9, %v5205_v13, %v5261_v42  ;;  %v1148_v13 = vsel %vm939_vm5, %v4995_v28, %v1147_v17  ;;  %v1236_v42 = vsel %vm1061_vm3, %v1201_v41, 0.0 }
 0x222   : > { %v2203_v33 = vsel %vm2195_vm10, %v2178_v55, %v1906_v62  ;;  %v1317_v62 = vsel %vm939_vm5, %v5011_v19, %v1316_v32  ;;  %v1405_v46 = vsel %vm1061_vm3, %v1370_v3, 0.0 }
 0x223   : > { %v1680_v43 = vpop.permute.xlu0 %1679 }
 0x224   : > { %2007 = vrot.lane.b32.xlu2 %v1377_v39, %s4176_s14 }
 0x226   : > { %1677 = vrot.lane.b32.xlu1 %v5301_v27, %s4172_s27  ;;  %v5411_v57 = vpop.permute.xlu2 %1595  ;;  %v1310_v27 = vrot.slane %v5343_v6, 7 }
 0x228   : > { %v1990_v56 = vpop.permute.xlu1 %1989  ;;  %v1311_v21 = vsel %vm939_vm5, %v4944_v44, %v1310_v27  ;;  %v1379_v44 = vrot.slane %v5452_v22, 1 }
 0x229   : > { %v2228_v24 = vsel %vm2220_vm11, %v2203_v33, %v1990_v56  ;;  %1771 = vrot.lane.b32.xlu0 %v1211_v30, %s4173_s28  ;;  %v2110_v33 = vsel %vm2095_vm6, %v5288_v0, %v5377_v34 }
 0x22a   : > { %2312 = vst [vmem:[#allocation1 + $0x11] ss:$2 sm:$0xff] %v2228_v24  ;;  %v2135_v3 = vsel %vm2120_vm7, %v2110_v33, %v1680_v43  ;;  %v5504_v43 = vld.sshfl [vmem:[#allocation1 + $0x30] sm:$0xff pattern:$0x75316420] }
 0x22b   : > { %v5424_v31 = vpop.permute.xlu0 %1601 }
 0x22c   : > { %1613 = vrot.lane.b32.xlu2 %v1148_v13, %s4171_s24 }
 0x22e   : > { %1761 = vrot.lane.b32.xlu1 %v1236_v42, %s4173_s28  ;;  %v1764_v8 = vpop.permute.xlu2 %1763 }
 0x22f   : > { %v2160_v30 = vsel %vm2145_vm8, %v2135_v3, %v1764_v8  ;;  %v2104_v8 = vsel %vm2095_vm6, %v5073_v15, %v5411_v57  ;;  %v1044_v15 = vrot.slane %v5001_v60, 1 }
 0x230   : > { %v1456_v26 = vpop.permute.xlu1 %1455 }
 0x231   : > { %v5439_v59 = vsel %vm734_vm1, %v5435_v18, %v1456_v26  ;;  %1855 = vrot.lane.b32.xlu0 %v5435_v18, %s4175_s30  ;;  %v2318_v28 = vld.sshfl [vmem:[#allocation1 + $0x10] sm:$0xff pattern:$0x75316420]  ;;  %v1239_v26 = vsel %vm1061_vm3, %v1210_v11, 0.0  ;;  %v5523_v11 = vld [vmem:[#allocation2 + $0xc0] sm:$0xff] }
 0x232   : > { %3942 = vmatmul.msk.f32.gmra.mxu1 %vm2351_vm12, %v2318_v28 }
 0x233   : > { %v1668_v41 = vpop.permute.xlu0 %1667 }
 0x234   : > { %1685 = vrot.lane.b32.xlu2 %v5338_v53, %s4172_s27  ;;  %v1380_v53 = vsel %vm1012_vm4, %v5458_v5, %v1379_v44  ;;  %v2129_v28 = vsel %vm2120_vm7, %v2104_v8, %v1668_v41  ;;  %v1047_v8 = vrot.slane %v5082_v51, 1 }
 0x236   : > { %1845 = vrot.lane.b32.xlu1 %v1311_v21, %s4175_s30  ;;  %v1682_v16 = vpop.permute.xlu2 %1681  ;;  %v1150_v21 = vrot.slane %v5401_v12, 7 }
 0x238   : > { %v1610_v38 = vpop.permute.xlu1 %1609 }
 0x239   : > { %1927 = vrot.lane.b32.xlu0 %v5090_v48, %s4174_s29 }
 0x23b   : > { %v1848_v25 = vpop.permute.xlu0 %1847 }
 0x23c   : > { %1769 = vrot.lane.b32.xlu2 %v1238_v10, %s4173_s28  ;;  %v2185_v24 = vsel %vm2170_vm9, %v2160_v30, %v1848_v25 }
 0x23e   : > { %1917 = vrot.lane.b32.xlu1 %v5343_v6, %s4174_s29  ;;  %v5464_v63 = vpop.permute.xlu2 %1757  ;;  %v1071_v6 = vsel %vm1061_vm3, %v1041_v58, 0.0  ;;  %v1407_v58 = vsel %vm1061_vm3, %v1376_v14, 0.0 }
 0x240   : > { %v5467_v54 = vpop.permute.xlu1 %1673 }
 0x241   : > { %2011 = vrot.lane.b32.xlu0 %v1380_v53, %s4176_s14  ;;  %v1045_v53 = vsel %vm1012_vm4, %v5393_v40, %v1044_v15  ;;  %v2107_v40 = vsel %vm2095_vm6, %v5187_v47, %v5424_v31 }
 0x242   : > { %v2132_v33 = vsel %vm2120_vm7, %v2107_v40, %v5467_v54 }
 0x243   : > { %v1766_v50 = vpop.permute.xlu0 %1765 }
 0x244   : > { %1853 = vrot.lane.b32.xlu2 %v1317_v62, %s4175_s30 }
 0x246   : > { %2001 = vrot.lane.b32.xlu1 %v1405_v46, %s4176_s14  ;;  %v1836_v39 = vpop.permute.xlu2 %1835  ;;  %v1319_v46 = vrot.slane %v5452_v22, 7 }
 0x248   : > { %v1752_v55 = vpop.permute.xlu1 %1751  ;;  %v1320_v3 = vsel %vm939_vm5, %v5096_v20, %v1319_v46 }
 0x249   : > { %1689 = vrot.lane.b32.xlu0 %v5401_v12, %s4172_s27  ;;  %v2154_v27 = vsel %vm2145_vm8, %v2129_v28, %v1752_v55  ;;  %v1151_v12 = vsel %vm939_vm5, %v5011_v19, %v1150_v21  ;;  %v1048_v28 = vsel %vm1012_vm4, %v5458_v5, %v1047_v8  ;;  %v5588_v21 = vld [vmem:[#allocation2 + $0xd0] sm:$0xff] }
 0x24b   : > { %v5483_v17 = vpop.permute.xlu0 %1841 }
 0x24c   : > { %1925 = vrot.lane.b32.xlu2 %v5387_v7, %s4174_s29  ;;  %v2111_v7 = vsel %vm2095_vm6, %v5316_v61, %v1610_v38  ;;  %v2179_v61 = vsel %vm2170_vm9, %v2154_v27, %v1836_v39 }
 0x24d   : > { %v2136_v57 = vsel %vm2120_vm7, %v2111_v7, %v1682_v16 }
 0x24e   : > { %1533 = vrot.lane.b32.xlu1 %v1071_v6, %s4170_s19  ;;  %v2004_v56 = vpop.permute.xlu2 %2003  ;;  %v2161_v41 = vsel %vm2145_vm8, %v2136_v57, %v1766_v50  ;;  %v1324_v57 = vrot.slane %v5588_v21, 7 }
 0x250   : > { %v1920_v13 = vpop.permute.xlu1 %1919 }
 0x251   : > { %v2210_v42 = vsel %vm2195_vm10, %v2185_v24, %v1920_v13  ;;  %1929 = vrot.lane.b32.xlu0 %v5452_v22, %s4174_s29 }
 0x252   : > { %v2235_v0 = vsel %vm2220_vm11, %v2210_v42, %v2004_v56  ;;  %v2157_v56 = vsel %vm2145_vm8, %v2132_v33, %v5464_v63  ;;  %v1072_v42 = vsel %vm1061_vm3, %v1044_v15, 0.0 }
 0x253   : > { %v2276_v49 = vrot.slane %v2235_v0, 4  ;;  %v1908_v34 = vpop.permute.xlu0 %1907  ;;  %v2182_v47 = vsel %vm2170_vm9, %v2157_v56, %v5483_v17  ;;  %v1408_v17 = vsel %vm1061_vm3, %v1379_v44, 0.0  ;;  %v5578_v44 = vld [vmem:[#allocation2 + $0xc8] sm:$0xf] }
 0x254   : > { %2009 = vrot.lane.b32.xlu2 %v1407_v58, %s4176_s14  ;;  %v2204_v38 = vsel %vm2195_vm10, %v2179_v61, %v1908_v34  ;;  %v1382_v27 = vrot.slane %v5578_v44, 1 }
 0x255   : > { %2327 = vst [vmem:[#allocation1 + $0x30] ss:$2 sm:$0xff] %v2276_v49 }
 0x256   : > { %1773 = vrot.lane.b32.xlu1 %v1239_v26, %s4173_s28  ;;  %v1922_v14 = vpop.permute.xlu2 %1921 }
 0x258   : > { %v1850_v25 = vpop.permute.xlu1 %1849 }
 0x259   : > { %1619 = vrot.lane.b32.xlu0 %v5435_v18, %s4171_s24  ;;  %v2186_v10 = vsel %vm2170_vm9, %v2161_v41, %v1850_v25  ;;  %v5534_v18 = vrot.slane %v5523_v11, 7 }
 0x25a   : > { %v2211_v50 = vsel %vm2195_vm10, %v2186_v10, %v1922_v14  ;;  %v1381_v14 = vrot.slane %v5523_v11, 1 }
 0x25b   : > { %v1992_v32 = vpop.permute.xlu0 %1991  ;;  %v1349_v55 = vsel %vm939_vm5, 0.0, %v5534_v18 }
 0x25c   : > { %v2229_v60 = vsel %vm2220_vm11, %v2204_v38, %v1992_v32  ;;  %1617 = vrot.lane.b32.xlu2 %v1151_v12, %s4171_s24  ;;  %v1383_v61 = vsel %vm1012_vm4, %v1381_v14, %v1382_v27  ;;  %v1350_v32 = vsel %vm939_vm5, 0.0, %v1324_v57  ;;  %v5600_v12 = vld [vmem:[#allocation2 + $0xc8] sm:$0xf] }
 0x25d   : > { %v2273_v16 = vrot.slane %v2229_v60, 4  ;;  %2313 = vst [vmem:[#allocation1 + $0x20] ss:$2 sm:$0xff] %v2229_v60 }
 0x25e   : > { %1535 = vrot.lane.b32.xlu1 %v1045_v53, %s4170_s19  ;;  %v2006_v62 = vpop.permute.xlu2 %2005 }
 0x25f   : > { %2314 = vst [vmem:[#allocation1 + $0x21] ss:$2 sm:$0xff] %v2273_v16  ;;  %v2236_v19 = vsel %vm2220_vm11, %v2211_v50, %v2006_v62 }
 0x260   : > { %2328 = vst [vmem:[#allocation1 + $0x31] ss:$2 sm:$0xff] %v2236_v19  ;;  %v1914_v39 = vpop.permute.xlu1 %1913  ;;  %v1216_v19 = vrot.slane %v5600_v12, 1 }
 0x261   : > { %1859 = vrot.lane.b32.xlu0 %v1349_v55, %s4175_s30  ;;  %v2207_v54 = vsel %vm2195_vm10, %v2182_v47, %v1914_v39  ;;  %v1409_v47 = vsel %vm1061_vm3, %v1382_v27, 0.0 }
 0x263   : > { %v1604_v6 = vpop.permute.xlu0 %1603 }
 0x264   : > { %1857 = vrot.lane.b32.xlu2 %v1320_v3, %s4175_s30  ;;  %v1217_v3 = vsel %vm1012_vm4, %v1381_v14, %v1216_v19 }
 0x266   : > { %1691 = vrot.lane.b32.xlu1 %v5090_v48, %s4172_s27  ;;  %v1676_v30 = vpop.permute.xlu2 %1675  ;;  %v2319_v24 = vld.sshfl [vmem:[#allocation1 + $0x20] sm:$0xff pattern:$0x75316420] }
 0x267   : > { %3943 = vmatmul.msk.f32.gmra.mxu1 %vm2351_vm12, %v2319_v24  ;;  %2326 = vst [vmem:[#allocation1 + $0x21] ss:$2 sm:$0xff] %v2235_v0  ;;  %v2332_v31 = vld.sshfl [vmem:[#allocation1 + $0x30] sm:$0xff pattern:$0x75316420] }
 0x268   : > { %v1998_v13 = vpop.permute.xlu1 %1997  ;;  %3948 = vmatmul.msk.f32.vlgmr.msra.gmra.mxu2 %vm2351_vm12, %v2332_v31  ;;  %v1095_v0 = vld [vmem:[#allocation2 + $0xb8] sm:$0xf] }
 0x269   : > { %v2232_v63 = vsel %vm2220_vm11, %v2207_v54, %v1998_v13  ;;  %1537 = vrot.lane.b32.xlu0 %v1072_v42, %s4170_s19  ;;  %v1213_v34 = vrot.slane %v1095_v0, 1  ;;  %v1153_v60 = vrot.slane %v1095_v0, 7  ;;  %v1156_v13 = vrot.slane %v5600_v12, 7  ;;  %v1266_v42 = vld [vmem:[#allocation2 + $0xd8] sm:$0xf] }
 0x26a   : > { %2322 = vst [vmem:[#allocation1 + $0x1] ss:$2 sm:$0xff] %v2232_v63 }
 0x26b   : > { %v1684_v48 = vpop.permute.xlu0 %1683  ;;  %v1214_v22 = vsel %vm1012_vm4, %v5458_v5, %v1213_v34  ;;  %v1240_v15 = vsel %vm1061_vm3, %v1213_v34, 0.0 }
 0x26c   : > { %2013 = vrot.lane.b32.xlu2 %v1408_v17, %s4176_s14  ;;  %v1322_v17 = vrot.slane %v5578_v44, 7 }
 0x26e   : > { %v1768_v49 = vpop.permute.xlu2 %1767  ;;  %1931 = vrot.lane.b32.xlu1 %v5523_v11, %s4174_s29 }
 0x26f   : > { %3944 = vmatmul.msk.f32.gmra.mxu1 %vm2351_vm12, %v5504_v43 }
 0x270   : > { %v1612_v58 = vpop.permute.xlu1 %1611 }
 0x271   : > { %1623 = vrot.lane.b32.xlu0 %v1349_v55, %s4171_s24  ;;  %v2329_v7 = vld.sshfl [vmem:[#allocation1] sm:$0xff pattern:$0x75316420]  ;;  %v2112_v5 = vsel %vm2095_vm6, %v5397_v36, %v1612_v58  ;;  %v2108_v36 = vsel %vm2095_vm6, %v5236_v35, %v1604_v6  ;;  %v1154_v35 = vsel %vm939_vm5, %v5096_v20, %v1153_v60  ;;  %v1157_v58 = vsel %vm939_vm5, %v5534_v18, %v1156_v13 }
 0x272   : > { %v2137_v38 = vsel %vm2120_vm7, %v2112_v5, %v1684_v48  ;;  %v2133_v50 = vsel %vm2120_vm7, %v2108_v36, %v1676_v30  ;;  %v1073_v5 = vsel %vm1061_vm3, %v1047_v8, 0.0 }
 0x273   : > { %v1844_v26 = vpop.permute.xlu0 %1843  ;;  %v2162_v53 = vsel %vm2145_vm8, %v2137_v38, %v1768_v49  ;;  %v1385_v49 = vrot.slane %v1266_v42, 1 }
 0x274   : > { %1775 = vrot.lane.b32.xlu2 %v1214_v22, %s4173_s28 }
 0x276   : > { %v1916_v43 = vpop.permute.xlu2 %1915  ;;  %1539 = vrot.lane.b32.xlu1 %v1048_v28, %s4170_s19  ;;  %v1323_v28 = vsel %vm939_vm5, %v5534_v18, %v1322_v17 }
 0x277   : > { %3945 = vmatmul.msk.f32.gmra.mxu1 %vm2351_vm12, %v2329_v7 }
 0x278   : > { %v1760_v25 = vpop.permute.xlu1 %1759 }
 0x279   : > { %1777 = vrot.lane.b32.xlu0 %v1240_v15, %s4173_s28  ;;  %v2158_v46 = vsel %vm2145_vm8, %v2133_v50, %v1760_v25 }
 0x27a   : > { %v2183_v6 = vsel %vm2170_vm9, %v2158_v46, %v1844_v26 }
 0x27b   : > { %v1924_v41 = vpop.permute.xlu0 %1923  ;;  %v2208_v24 = vsel %vm2195_vm10, %v2183_v6, %v1916_v43 }
 0x27c   : > { %2015 = vrot.lane.b32.xlu2 %v1383_v61, %s4176_s14 }
 0x27e   : > { %v2008_v10 = vpop.permute.xlu2 %2007  ;;  %1693 = vrot.lane.b32.xlu1 %v1095_v0, %s4172_s27  ;;  %v1384_v0 = vrot.slane %v5588_v21, 1 }
 0x280   : > { %v1852_v16 = vpop.permute.xlu1 %1851  ;;  %v1386_v43 = vsel %vm1012_vm4, %v1384_v0, %v1385_v49  ;;  %vm3090_vm4 = vcmask 1046534  }
 0x281   : > { %v2187_v62 = vsel %vm2170_vm9, %v2162_v53, %v1852_v16  ;;  %1863 = vrot.lane.b32.xlu0 %v1350_v32, %s4175_s30  ;;  %v2405_v16 = vpop.f32.mrf.mxu1 }
 0x282   : > { %v2212_v39 = vsel %vm2195_vm10, %v2187_v62, %v1924_v41 }
 0x283   : > { %v2237_v55 = vsel %vm2220_vm11, %v2212_v39, %v2008_v10  ;;  %v5612_v40 = vpop.permute.xlu0 %1531  ;;  %v1241_v10 = vsel %vm1061_vm3, %v1216_v19, 0.0  ;;  %v1410_v19 = vsel %vm1061_vm3, %v1385_v49, 0.0  ;;  %vm3088_vm3 = vcmask 1045509  }
 0x284   : > { %v2277_v33 = vrot.slane %v2237_v55, 4  ;;  %2333 = vst [vmem:[#allocation1] ss:$2 sm:$0xff] %v2237_v55  ;;  %1621 = vrot.lane.b32.xlu2 %v1154_v35, %s4171_s24  ;;  %v2089_v8 = vsel %vm564_vm0, %v5365_v37, %v5612_v40 }
 0x286   : > { %2334 = vst [vmem:[#allocation1 + $0x1] ss:$2 sm:$0xff] %v2277_v33  ;;  %v1614_v56 = vpop.permute.xlu2 %1613  ;;  %1779 = vrot.lane.b32.xlu1 %v1217_v3, %s4173_s28 }
 0x287   : > { %v2113_v61 = vsel %vm2095_vm6, %v5326_v45, %v1614_v56 }
 0x288   : > { %v2000_v30 = vpop.permute.xlu1 %1999 }
 0x289   : > { %v2233_v31 = vsel %vm2220_vm11, %v2208_v24, %v2000_v30  ;;  %2017 = vrot.lane.b32.xlu0 %v1409_v47, %s4176_s14  ;;  %v2408_v56 = vpop.f32.mrf.mxu1 }
 0x28a   : > { %v2275_v20 = vrot.slane %v2233_v31, 4  ;;  %2323 = vst [vmem:[#allocation1 + $0x10] ss:$2 sm:$0xff] %v2233_v31 }
 0x28b   : > { %v1616_v54 = vpop.permute.xlu0 %1615 }
 0x28c   : > { %2324 = vst [vmem:[#allocation1 + $0x11] ss:$2 sm:$0xff] %v2275_v20  ;;  %1695 = vrot.lane.b32.xlu2 %v5523_v11, %s4172_s27  ;;  %v1325_v11 = vrot.slane %v1266_v42, 7  ;;  %v2114_v45 = vsel %vm2095_vm6, %v2089_v8, %v1616_v54 }
 0x28d   : > { %v2341_v63 = vld.sshfl [vmem:[#allocation1] sm:$0xff pattern:$0x75316420] }
 0x28e   : > { %v1686_v48 = vpop.permute.xlu2 %1685  ;;  %3949 = vmatmul.msk.f32.gmra.mxu2 %vm2351_vm12, %v2341_v63  ;;  %1933 = vrot.lane.b32.xlu1 %v5578_v44, %s4174_s29  ;;  %v1326_v7 = vsel %vm939_vm5, %v1324_v57, %v1325_v11  ;;  %v5694_v11 = vld [vmem:[%s6183_s6] ss:$0 sm:$0xff]  ;;  %vm3092_vm5 = vcmask 1047559  }
 0x290   : > { %v1606_v34 = vpop.permute.xlu1 %1605 }
 0x291   : > { %1625 = vrot.lane.b32.xlu0 %v1157_v58, %s4171_s24  ;;  %v2109_v55 = vsel %vm2095_vm6, %v5307_v9, %v1606_v34  ;;  %v2411_v54 = vpop.f32.mrf.mxu1 }
 0x293   : > { %v1688_v26 = vpop.permute.xlu0 %1687  ;;  %v2330_v22 = vld.sshfl [vmem:[#allocation1 + $0x10] sm:$0xff pattern:$0x75316420] }
 0x294   : > { %3946 = vmatmul.msk.f32.gmra.mxu1 %vm2351_vm12, %v2330_v22  ;;  %1861 = vrot.lane.b32.xlu2 %v1323_v28, %s4175_s30  ;;  %v2139_v53 = vsel %vm2120_vm7, %v2114_v45, %v1688_v26 }
 0x296   : > { %v1770_v44 = vpop.permute.xlu2 %1769  ;;  %2019 = vrot.lane.b32.xlu1 %v1386_v43, %s4176_s14 }
 0x298   : > { %v1678_v14 = vpop.permute.xlu1 %1677 }
 0x299   : > { %1865 = vrot.lane.b32.xlu0 %v1326_v7, %s4175_s30  ;;  %v2134_v35 = vsel %vm2120_vm7, %v2109_v55, %v1678_v14  ;;  %v2414_v28 = vpop.f32.mrf.mxu1 }
 0x29b   : > { %v1772_v27 = vpop.permute.xlu0 %1771 }
 0x29c   : > { %1935 = vrot.lane.b32.xlu2 %v5588_v21, %s4174_s29  ;;  %v2138_v21 = vsel %vm2120_vm7, %v2113_v61, %v1686_v48  ;;  %v2164_v62 = vsel %vm2145_vm8, %v2139_v53, %v1772_v27  ;;  %v5683_v48 = vld [vmem:[%s6182_s5] ss:$0 sm:$0xff] }
 0x29d   : > { %v2163_v32 = vsel %vm2145_vm8, %v2138_v21, %v1770_v44  ;;  %v2464_v49 = vmul.f32 %v5683_v48, %v2408_v56  ;;  %v2463_v58 = vmul.f32 %v5683_v48, %v2405_v16 }
 0x29e   : > { %v1854_v25 = vpop.permute.xlu2 %1853  ;;  %1697 = vrot.lane.b32.xlu1 %v5600_v12, %s4172_s27 }
 0x29f   : > { %v2188_v51 = vsel %vm2170_vm9, %v2163_v32, %v1854_v25  ;;  %v2486_v22 = vadd.f32 %v5694_v11, %v2464_v49  ;;  %v2485_v14 = vadd.f32 %v5694_v11, %v2463_v58 }
 0x2a0   : > { %v1762_v18 = vpop.permute.xlu1 %1761 }
 0x2a1   : > { %v2159_v33 = vsel %vm2145_vm8, %v2134_v35, %v1762_v18  ;;  %v2417_v32 = vpop.f32.mrf.mxu1 }
 0x2a3   : > { %v1856_v15 = vpop.permute.xlu0 %1855 }
 0x2a4   : > { %1541 = vrot.lane.b32.xlu2 %v1073_v5, %s4170_s19  ;;  %v2189_v46 = vsel %vm2170_vm9, %v2164_v62, %v1856_v15  ;;  %v5703_v15 = vmax.f32 %v2486_v22, 0.0 }
 0x2a6   : > { %v1926_v57 = vpop.permute.xlu2 %1925  ;;  %1937 = vrot.lane.b32.xlu1 %v1266_v42, %s4174_s29  ;;  %v2543_v21 = vrot.slane %v5703_v15, 4 }
 0x2a7   : > { %v2213_v12 = vsel %vm2195_vm10, %v2188_v51, %v1926_v57 }
 0x2a8   : > { %v1846_v41 = vpop.permute.xlu1 %1845 }
 0x2a9   : > { %v2184_v3 = vsel %vm2170_vm9, %v2159_v33, %v1846_v41  ;;  %v2503_v41 = vmax.f32 %v2485_v14, 0.0 }
 0x2ab   : > { %v1928_v38 = vpop.permute.xlu0 %1927  ;;  %v2539_v8 = vrot.slane %v2503_v41, 2  ;;  %v3955_v62 = vrot.slane %v2503_v41, 9 }
 0x2ac   : > { %1781 = vrot.lane.b32.xlu2 %v1241_v10, %s4173_s28  ;;  %v2214_v37 = vsel %vm2195_vm10, %v2189_v46, %v1928_v38  ;;  %v2544_v38 = vrot.slane %v5703_v15, 6 }
 0x2ad   : > { %v3956_v46 = vrot.slane %v2539_v8, 9 }
 0x2ae   : > { %v2010_v60 = vpop.permute.xlu2 %2009  ;;  %v3962_v16 = vrot.slane %v2544_v38, 9 }
 0x2af   : > { %v2238_v36 = vsel %vm2220_vm11, %v2213_v12, %v2010_v60  ;;  %v2540_v12 = vrot.slane %v2503_v41, 4  ;;  %v2541_v60 = vrot.slane %v2503_v41, 6 }
 0x2b0   : > { %2335 = vst [vmem:[#allocation1 + $0x10] ss:$2 sm:$0xff] %v2238_v36  ;;  %v1918_v50 = vpop.permute.xlu1 %1917  ;;  %v3961_v36 = vrot.slane %v2543_v21, 9 }
 0x2b1   : > { %v2209_v30 = vsel %vm2195_vm10, %v2184_v3, %v1918_v50  ;;  %v3958_v33 = vrot.slane %v2541_v60, 9  ;;  %v2870_v3 = vadd.f32 %v3962_v16, %v2544_v38 }
 0x2b3   : > { %v2012_v39 = vpop.permute.xlu0 %2011  ;;  %v2866_v14 = vadd.f32 %v3958_v33, %v2541_v60 }
 0x2b4   : > { %v2239_v40 = vsel %vm2220_vm11, %v2214_v37, %v2012_v39  ;;  %2021 = vrot.lane.b32.xlu2 %v1410_v19, %s4176_s14  ;;  %v3957_v37 = vrot.slane %v2540_v12, 9  ;;  %s4132_s14 = smul.u32 48, %s6342_s26 }
 0x2b5   : > { %2336 = vst [vmem:[#allocation1 + $0x11] ss:$2 sm:$0xff] %v2239_v40  ;;  %v2278_v13 = vrot.slane %v2239_v40, 4 }
 0x2b6   : > { %v1618_v6 = vpop.permute.xlu2 %1617  ;;  %s6148_s23 = scalar_lea.vmem %s6190_s13, %s4132_s14 }
 0x2b8   : > { %v2002_v24 = vpop.permute.xlu1 %2001 }
 0x2b9   : > { %v2234_v47 = vsel %vm2220_vm11, %v2209_v30, %v2002_v24  ;;  %v2420_v30 = vpop.f32.mrf.mxu1 }
 0x2ba   : > { %2325 = vst [vmem:[#allocation1 + $0x20] ss:$2 sm:$0xff] %v2234_v47  ;;  %v2863_v47 = vadd.f32 %v3955_v62, %v2503_v41 }
 0x2bb   : > { %v1690_v9 = vpop.permute.xlu0 %1689 }
 0x2bc   : > { %v2342_v31 = vld.sshfl [vmem:[#allocation1 + $0x10] sm:$0xff pattern:$0x75316420] }
 0x2bd   : > { %3950 = vmatmul.msk.f32.gmra.mxu2 %vm2351_vm12, %v2342_v31 }
 0x2be   : > { %v1858_v20 = vpop.permute.xlu2 %1857 }
 0x2c0   : > { %v1534_v42 = vpop.permute.xlu1 %1533 }
 0x2c1   : > { %v2331_v63 = vld.sshfl [vmem:[#allocation1 + $0x20] sm:$0xff pattern:$0x75316420]  ;;  %v2090_v17 = vsel %vm564_vm0, %v5355_v29, %v1534_v42  ;;  %v2465_v29 = vmul.f32 %v5683_v48, %v2411_v54  ;;  %v2864_v54 = vadd.f32 %v3956_v46, %v2539_v8 }
 0x2c2   : > { %3947 = vmatmul.msk.f32.gmra.mxu1 %vm2351_vm12, %v2331_v63  ;;  %2337 = vst [vmem:[#allocation1 + $0x20] ss:$2 sm:$0xff] %v2278_v13  ;;  %v2115_v34 = vsel %vm2095_vm6, %v2090_v17, %v1618_v6  ;;  %v2869_v6 = vadd.f32 %v3961_v36, %v2543_v21  ;;  %v2865_v13 = vadd.f32 %v3957_v37, %v2540_v12 }
 0x2c3   : > { %v1930_v0 = vpop.permute.xlu0 %1929  ;;  %v2140_v44 = vsel %vm2120_vm7, %v2115_v34, %v1690_v9  ;;  %v2487_v5 = vadd.f32 %v5694_v11, %v2465_v29  ;;  %v2542_v9 = vrot.slane %v5703_v15, 2  ;;  %v2467_v17 = vmul.f32 %v5683_v48, %v2417_v32 }
 0x2c4   : > { %v2935_v58 = vadd.f32 %v2869_v6, %v2863_v47 }
 0x2c5   : > { %v2505_v10 = vmax.f32 %v2487_v5, 0.0 }
 0x2c6   : > { %v2014_v26 = vpop.permute.xlu2 %2013  ;;  %v2971_v21 = vmul.f32 0.25, %v2935_v58 }
 0x2c7   : > { %v2545_v53 = vrot.slane %v2505_v10, 2  ;;  %v3963_v19 = vrot.slane %v2505_v10, 9  ;;  %v2546_v39 = vrot.slane %v2505_v10, 4  ;;  %v2547_v35 = vrot.slane %v2505_v10, 6 }
 0x2c8   : > { %v1774_v43 = vpop.permute.xlu1 %1773 }
 0x2c9   : > { %v2165_v7 = vsel %vm2145_vm8, %v2140_v44, %v1774_v43  ;;  %v3964_v56 = vrot.slane %v2545_v53, 9  ;;  %v2871_v31 = vadd.f32 %v3963_v19, %v2505_v10  ;;  %v3965_v42 = vrot.slane %v2546_v39, 9 }
 0x2ca   : > { %v2190_v27 = vsel %vm2170_vm9, %v2165_v7, %v1858_v20  ;;  %v3966_v34 = vrot.slane %v2547_v35, 9  ;;  %v2466_v43 = vmul.f32 %v5683_v48, %v2414_v28  ;;  %v3960_v7 = vrot.slane %v2542_v9, 9 }
 0x2cb   : > { %v2215_v25 = vsel %vm2195_vm10, %v2190_v27, %v1930_v0  ;;  %v1620_v18 = vpop.permute.xlu0 %1619  ;;  %v2468_v0 = vmul.f32 %v5683_v48, %v2420_v30  ;;  %v2872_v22 = vadd.f32 %v3964_v56, %v2545_v53  ;;  %v2937_v29 = vadd.f32 %v2871_v31, %v2865_v13 }
 0x2cc   : > { %v2240_v57 = vsel %vm2220_vm11, %v2215_v25, %v2014_v26  ;;  %v2936_v26 = vadd.f32 %v2870_v3, %v2864_v54  ;;  %v2873_v27 = vadd.f32 %v3965_v42, %v2546_v39  ;;  %v2874_v41 = vadd.f32 %v3966_v34, %v2547_v35 }
 0x2cd   : > { %2338 = vst [vmem:[#allocation1 + $0x21] ss:$2 sm:$0xff] %v2240_v57  ;;  %v2490_v5 = vadd.f32 %v5694_v11, %v2468_v0  ;;  %v2938_v28 = vadd.f32 %v2872_v22, %v2866_v14  ;;  %v2868_v12 = vadd.f32 %v3960_v7, %v2542_v9 }
 0x2ce   : > { %v1776_v61 = vpop.permute.xlu2 %1775  ;;  %v2972_v38 = vmul.f32 0.25, %v2936_v26 }
 0x2cf   : > { %v5733_v16 = vmax.f32 %v2490_v5, 0.0  ;;  %v2940_v62 = vadd.f32 %v2874_v41, %v2868_v12  ;;  %v2974_v37 = vmul.f32 0.25, %v2938_v28 }
 0x2d0   : > { %v1536_v51 = vpop.permute.xlu1 %1535  ;;  %v3045_v19 = vperm.slane %v2972_v38, 0 }
 0x2d1   : > { %v2091_v55 = vsel %vm564_vm0, %v5346_v52, %v1536_v51  ;;  %v3959_v52 = vrot.slane %v5703_v15, 9  ;;  %v2973_v51 = vmul.f32 0.25, %v2937_v29  ;;  %v2554_v35 = vrot.slane %v5733_v16, 2 }
 0x2d2   : > { %v2116_v20 = vsel %vm2095_vm6, %v2091_v55, %v1620_v18  ;;  %v2489_v18 = vadd.f32 %v5694_v11, %v2467_v17  ;;  %v5741_v6 = vmul.f32 0.25, %v2940_v62  ;;  %v3047_v56 = vperm.slane %v2974_v37, 0 }
 0x2d3   : > { %v1860_v45 = vpop.permute.xlu0 %1859  ;;  %v2867_v25 = vadd.f32 %v3959_v52, %v5703_v15  ;;  %v3046_v39 = vperm.slane %v2973_v51, 0  ;;  %v2555_v47 = vrot.slane %v5733_v16, 4  ;;  %v3976_v52 = vrot.slane %v2554_v35, 9 }
 0x2d4   : > { %v2343_v50 = vld.sshfl [vmem:[#allocation1 + $0x20] sm:$0xff pattern:$0x75316420]  ;;  %v5731_v36 = vmax.f32 %v2489_v18, 0.0  ;;  %v3049_v0 = vperm.slane %v5741_v6, 0  ;;  %v3975_v34 = vrot.slane %v5733_v16, 9 }
 0x2d5   : > { %3951 = vmatmul.msk.f32.gmra.mxu2 %vm2351_vm12, %v2343_v50  ;;  %v2939_v60 = vadd.f32 %v2873_v27, %v2867_v25  ;;  %v3977_v14 = vrot.slane %v2555_v47, 9 }
 0x2d6   : > { %v2016_v40 = vpop.permute.xlu2 %2015  ;;  %v2552_v33 = vrot.slane %v5731_v36, 4  ;;  %v2553_v13 = vrot.slane %v5731_v36, 6  ;;  %v2551_v7 = vrot.slane %v5731_v36, 2  ;;  %v3971_v5 = vrot.slane %v5731_v36, 9 }
 0x2d7   : > { %v2883_v51 = vadd.f32 %v3975_v34, %v5733_v16  ;;  %v2885_v62 = vadd.f32 %v3977_v14, %v2555_v47 }
 0x2d8   : > { %v1692_v24 = vpop.permute.xlu1 %1691  ;;  %v3973_v17 = vrot.slane %v2552_v33, 9 }
 0x2d9   : > { %v2141_v63 = vsel %vm2120_vm7, %v2116_v20, %v1692_v24 }
 0x2da   : > { %v2166_v44 = vsel %vm2145_vm8, %v2141_v63, %v1776_v61  ;;  %v2488_v61 = vadd.f32 %v5694_v11, %v2466_v43  ;;  %v2556_v63 = vrot.slane %v5733_v16, 6  ;;  %v2881_v28 = vadd.f32 %v3973_v17, %v2552_v33 }
 0x2db   : > { %v5718_v49 = vpop.permute.xlu0 %1537  ;;  %v2191_v32 = vsel %vm2170_vm9, %v2166_v44, %v1860_v45  ;;  %v3044_v45 = vperm.slane %v2971_v21, 0  ;;  %v3974_v21 = vrot.slane %v2553_v13, 9 }
 0x2dc   : > { %v5737_v55 = vmax.f32 %v2488_v61, 0.0  ;;  %v3978_v38 = vrot.slane %v2556_v63, 9 }
 0x2dd   : > { %v3081_v30 = vsel %vm3080_vm13, %v3045_v19, %v3044_v45 }
 0x2de   : > { %v5725_v57 = vpop.permute.xlu2 %1621  ;;  %v2550_v24 = vrot.slane %v5737_v55, 6  ;;  %v3083_v31 = vsel %vm3082_vm14, %v3046_v39, %v3081_v30  ;;  %v2549_v20 = vrot.slane %v5737_v55, 4  ;;  %v2548_v22 = vrot.slane %v5737_v55, 2 }
 0x2df   : > { %v3967_v29 = vrot.slane %v5737_v55, 9  ;;  %v3085_v43 = vsel %vm3084_vm15, %v3047_v56, %v3083_v31  ;;  %v2882_v39 = vadd.f32 %v3974_v21, %v2553_v13 }
 0x2e0   : > { %v1932_v10 = vpop.permute.xlu1 %1931  ;;  %v3970_v44 = vrot.slane %v2550_v24, 9  ;;  %v3969_v18 = vrot.slane %v2549_v20, 9 }
 0x2e1   : > { %v2216_v8 = vsel %vm2195_vm10, %v2191_v32, %v1932_v10  ;;  %v2884_v10 = vadd.f32 %v3976_v52, %v2554_v35  ;;  %v2875_v12 = vadd.f32 %v3967_v29, %v5737_v55  ;;  %v2092_v29 = vsel %vm564_vm0, %v5383_v23, %v5718_v49 }
 0x2e2   : > { %v2241_v15 = vsel %vm2220_vm11, %v2216_v8, %v2016_v40  ;;  %v2975_v40 = vmul.f32 0.25, %v2939_v60  ;;  %v3968_v8 = vrot.slane %v2548_v22, 9  ;;  %v2878_v60 = vadd.f32 %v3970_v44, %v2550_v24 }
 0x2e3   : > { %v2279_v53 = vrot.slane %v2241_v15, 4  ;;  %2339 = vst [vmem:[#allocation1 + $0x30] ss:$2 sm:$0xff] %v2241_v15  ;;  %v5735_v50 = vpop.permute.xlu0 %1623  ;;  %v2877_v19 = vadd.f32 %v3969_v18, %v2549_v20  ;;  %v2941_v6 = vadd.f32 %v2881_v28, %v2875_v12  ;;  %v2117_v14 = vsel %vm2095_vm6, %v2092_v29, %v5725_v57  ;;  %v6308_v29 = vld [vmem:[#allocation7_spill] sm:$0xff] }
 0x2e4   : > { %v2423_v46 = vpop.f32.mrf.mxu1  ;;  %v3048_v42 = vperm.slane %v2975_v40, 0  ;;  %v2886_v40 = vadd.f32 %v3978_v38, %v2556_v63  ;;  %v2944_v35 = vadd.f32 %v2884_v10, %v2878_v60  ;;  %v2876_v24 = vadd.f32 %v3968_v8, %v2548_v22 }
 0x2e5   : > { %2340 = vst [vmem:[#allocation1 + $0x31] ss:$2 sm:$0xff] %v2279_v53  ;;  %v2469_v54 = vmul.f32 %v5683_v48, %v2423_v46  ;;  %v3972_v53 = vrot.slane %v2551_v7, 9  ;;  %v2879_v46 = vadd.f32 %v3971_v5, %v5731_v36  ;;  %v2943_v55 = vadd.f32 %v2883_v51, %v2877_v19 }
 0x2e6   : > { %v5748_v9 = vpop.permute.xlu2 %1695  ;;  %v3087_v15 = vsel %vm3086_vm2, %v3048_v42, %v3085_v43  ;;  %v2942_v52 = vadd.f32 %v2882_v39, %v2876_v24  ;;  %v2980_v17 = vmul.f32 0.25, %v2944_v35 }
 0x2e7   : > { %v2491_v41 = vadd.f32 %v5694_v11, %v2469_v54  ;;  %v5779_v47 = vsel %vm3088_vm3, %v3049_v0, %v3087_v15  ;;  %v2880_v31 = vadd.f32 %v3972_v53, %v2551_v7  ;;  %v2945_v54 = vadd.f32 %v2885_v62, %v2879_v46 }
 0x2e8   : > { %v5743_v3 = vpop.permute.xlu1 %1539  ;;  %v5788_v0 = vmul.f32 0.25, %v2941_v6  ;;  %v2979_v22 = vmul.f32 0.25, %v2943_v55  ;;  %v5805_v21 = vmul.f32 0.25, %v2942_v52  ;;  %v3053_v38 = vperm.slane %v2980_v17, 0 }
 0x2e9   : > { %v5774_v37 = vmax.f32 %v2491_v41, 0.0  ;;  %v2093_v63 = vsel %vm564_vm0, %v5439_v59, %v5743_v3  ;;  %v2981_v18 = vmul.f32 0.25, %v2945_v54  ;;  %v3181_v52 = vrot.slane %v4276_v4, 2 }
 0x2ea   : > { %v2118_v59 = vsel %vm2095_vm6, %v2093_v63, %v5735_v50  ;;  %v3052_v10 = vperm.slane %v2979_v22, 0  ;;  %v3050_v53 = vperm.slane %v5788_v0, 0  ;;  %v3182_v17 = vrot.slane %v4276_v4, 6 }
 0x2eb   : > { %v5761_v27 = vpop.permute.xlu0 %1777  ;;  %v2557_v13 = vrot.slane %v5774_v37, 2  ;;  %v3979_v42 = vrot.slane %v5774_v37, 9  ;;  %v2558_v49 = vrot.slane %v5774_v37, 4  ;;  %v2559_v57 = vrot.slane %v5774_v37, 6  ;;  %v2438_v0 = vpop.f32.mrf.mxu2 }
 0x2ec   : > { %v2426_v58 = vpop.f32.mrf.mxu1  ;;  %v2344_v26 = vld.sshfl [vmem:[#allocation1 + $0x30] sm:$0xff pattern:$0x75316420]  ;;  %v3054_v46 = vperm.slane %v2981_v18, 0 }
 0x2ed   : > { %v2470_v25 = vmul.f32 %v5683_v48, %v2426_v58  ;;  %3952 = vmatmul.msk.f32.gmra.mxu2 %vm2351_vm12, %v2344_v26  ;;  %v2946_v26 = vadd.f32 %v2886_v40, %v2880_v31  ;;  %v2887_v5 = vadd.f32 %v3979_v42, %v5774_v37  ;;  %v3980_v41 = vrot.slane %v2557_v13, 9 }
 0x2ee   : > { %v1862_v33 = vpop.permute.xlu2 %1861  ;;  %v3981_v62 = vrot.slane %v2558_v49, 9  ;;  %v3051_v37 = vperm.slane %v5805_v21, 0  ;;  %v3094_v40 = vsel %vm3080_vm13, %v3053_v38, %v3052_v10 }
 0x2ef   : > { %v2492_v32 = vadd.f32 %v5694_v11, %v2470_v25  ;;  %v3007_v25 = vld [vmem:[%s6184_s7] sm:$0xff]  ;;  %v5808_v50 = vmul.f32 0.25, %v2946_v26  ;;  %v2888_v19 = vadd.f32 %v3980_v41, %v2557_v13  ;;  %v5830_v13 = vsel %vm3082_vm14, %v3054_v46, %v3094_v40  ;;  %v6307_v26 = vld [vmem:[#allocation3_spill] sm:$0xff] }
 0x2f0   : > { %v1694_v61 = vpop.permute.xlu1 %1693  ;;  %3143 = vmatpush.msrb.mxu2 %v3007_v25  ;;  %v2889_v54 = vadd.f32 %v3981_v62, %v2558_v49  ;;  %v3180_v22 = vrot.slane %v6307_v26, 2  ;;  %v4032_v25 = vrot.slane %v4270_v2, 9  ;;  %v6310_v49 = vld [vmem:[#allocation10_spill] sm:$0xff] }
 0x2f1   : > { %v5771_v45 = vmax.f32 %v2492_v32, 0.0  ;;  %v2142_v23 = vsel %vm2120_vm7, %v2117_v14, %v1694_v61  ;;  %v2143_v32 = vsel %vm2120_vm7, %v2118_v59, %v5748_v9  ;;  %v3982_v9 = vrot.slane %v2559_v57, 9  ;;  %v3623_v14 = vld [vmem:[%s6187_s10 + $0x8] sm:$0xff]  ;;  %v3622_v59 = vld [vmem:[%s6187_s10] sm:$0xff] }
 0x2f2   : > { %v2167_v61 = vsel %vm2145_vm8, %v2142_v23, %v5761_v27  ;;  %v3055_v39 = vperm.slane %v5808_v50, 0  ;;  %3751 = vmatpush.msra.mxu3 %v3623_v14  ;;  %v3187_v41 = vrot.slane %v6310_v49, 2  ;;  %v4037_v62 = vrot.slane %v3180_v22, 9 }
 0x2f3   : > { %v2561_v16 = vrot.slane %v5771_v45, 4  ;;  %v2562_v56 = vrot.slane %v5771_v45, 6  ;;  %v1864_v34 = vpop.permute.xlu0 %1863  ;;  %v2192_v35 = vsel %vm2170_vm9, %v2167_v61, %v1862_v33  ;;  %v3179_v33 = vrot.slane %v4270_v2, 6  ;;  %v6312_v61 = vld [vmem:[#allocation5_spill] sm:$0xff] }
 0x2f4   : > { %v2429_v30 = vpop.f32.mrf.mxu1  ;;  %v2890_v63 = vadd.f32 %v3982_v9, %v2559_v57  ;;  %v6311_v57 = vld [vmem:[#allocation4_spill] sm:$0xff]  ;;  %3752 = vmatpush.msra.mxu3 %v3622_v59  ;;  %v4051_v14 = vrot.slane %v3187_v41, 9 }
 0x2f5   : > { %v3985_v20 = vrot.slane %v2561_v16, 9  ;;  %v2471_v36 = vmul.f32 %v5683_v48, %v2429_v30  ;;  %v3986_v44 = vrot.slane %v2562_v56, 9  ;;  %v4034_v38 = vrot.slane %v6311_v57, 9 }
 0x2f6   : > { %v1936_v8 = vpop.permute.xlu2 %1935  ;;  %v4035_v10 = vrot.slane %v3179_v33, 9 }
 0x2f7   : > { %v2493_v58 = vadd.f32 %v5694_v11, %v2471_v36  ;;  %v2893_v7 = vadd.f32 %v3985_v20, %v2561_v16  ;;  %v2894_v28 = vadd.f32 %v3986_v44, %v2562_v56  ;;  %v3178_v20 = vrot.slane %v4270_v2, 2 }
 0x2f8   : > { %v1780_v43 = vpop.permute.xlu1 %1779 }
 0x2f9   : > { %v5797_v3 = vmax.f32 %v2493_v58, 0.0  ;;  %v2947_v51 = vadd.f32 %v2893_v7, %v2887_v5  ;;  %v2168_v12 = vsel %vm2145_vm8, %v2143_v32, %v1780_v43  ;;  %v2948_v6 = vadd.f32 %v2894_v28, %v2888_v19  ;;  %v6309_v5 = vld [vmem:[#allocation6_spill] sm:$0xff] }
 0x2fa   : > { %v2193_v27 = vsel %vm2170_vm9, %v2168_v12, %v1864_v34  ;;  %v3183_v43 = vrot.slane %v6308_v29, 2  ;;  %v4033_v18 = vrot.slane %v3178_v20, 9  ;;  %v3184_v23 = vrot.slane %v6309_v5, 2 }
 0x2fb   : > { %v2563_v15 = vrot.slane %v5797_v3, 2  ;;  %v3987_v60 = vrot.slane %v5797_v3, 9  ;;  %v5823_v55 = vmul.f32 0.25, %v2947_v51  ;;  %v2018_v56 = vpop.permute.xlu0 %2017  ;;  %v2218_v42 = vsel %vm2195_vm10, %v2193_v27, %v1936_v8 }
 0x2fc   : > { %v5836_v34 = vmul.f32 0.25, %v2948_v6  ;;  %v4038_v28 = vrot.slane %v4276_v4, 9  ;;  %v4039_v51 = vrot.slane %v3181_v52, 9  ;;  %v4040_v8 = vrot.slane %v6312_v61, 9 }
 0x2fd   : > { %v3988_v24 = vrot.slane %v2563_v15, 9  ;;  %v2895_v31 = vadd.f32 %v3987_v60, %v5797_v3  ;;  %v3056_v58 = vperm.slane %v5823_v55, 0  ;;  %v4041_v12 = vrot.slane %v3182_v17, 9 }
 0x2fe   : > { %v1542_v32 = vpop.permute.xlu2 %1541  ;;  %v4036_v60 = vrot.slane %v6307_v26, 9  ;;  %v4042_v19 = vrot.slane %v6308_v29, 9  ;;  %v4043_v46 = vrot.slane %v3183_v43, 9  ;;  %v4044_v40 = vrot.slane %v6309_v5, 9 }
 0x2ff   : > { %v2896_v44 = vadd.f32 %v3988_v24, %v2563_v15  ;;  %v2949_v7 = vadd.f32 %v2895_v31, %v2889_v54  ;;  %v3478_v27 = vadd.f32 %v4032_v25, %v4270_v2  ;;  %v4050_v6 = vrot.slane %v6310_v49, 9 }
 0x300   : > { %v1934_v16 = vpop.permute.xlu1 %1933  ;;  %v3484_v24 = vadd.f32 %v4038_v28, %v4276_v4  ;;  %v3485_v31 = vadd.f32 %v4039_v51, %v3181_v52  ;;  %v3487_v54 = vadd.f32 %v4041_v12, %v3182_v17  ;;  %v3482_v59 = vadd.f32 %v4036_v60, %v6307_v26 }
 0x301   : > { %v2217_v30 = vsel %vm2195_vm10, %v2192_v35, %v1934_v16  ;;  %v3479_v35 = vadd.f32 %v4033_v18, %v3178_v20  ;;  %v3488_v2 = vadd.f32 %v4042_v19, %v6308_v29  ;;  %v3483_v20 = vadd.f32 %v4037_v62, %v3180_v22 }
 0x302   : > { %v2242_v36 = vsel %vm2220_vm11, %v2217_v30, %v2018_v56  ;;  %v3480_v56 = vadd.f32 %v4034_v38, %v6311_v57  ;;  %v3481_v30 = vadd.f32 %v4035_v10, %v3179_v33  ;;  %v3489_v25 = vadd.f32 %v4043_v46, %v3183_v43 }
 0x303   : > { %2345 = vst [vmem:[#allocation1] ss:$2 sm:$0xff] %v2242_v36  ;;  %v3486_v36 = vadd.f32 %v4040_v8, %v6312_v61  ;;  %v3550_v18 = vadd.f32 %v3484_v24, %v3478_v27  ;;  %v1626_v57 = vpop.permute.xlu0 %1625  ;;  %v3490_v33 = vadd.f32 %v4044_v40, %v6309_v5  ;;  %v3496_v4 = vadd.f32 %v4050_v6, %v6310_v49 }
 0x304   : > { %v3553_v38 = vadd.f32 %v3487_v54, %v3481_v30  ;;  %v2094_v17 = vsel %vm564_vm0, %v5375_v1, %v1542_v32  ;;  %v2950_v10 = vadd.f32 %v2896_v44, %v2890_v63  ;;  %v2985_v29 = vmul.f32 0.25, %v2949_v7 }
 0x305   : > { %v3552_v52 = vadd.f32 %v3486_v36, %v3480_v56  ;;  %v3586_v28 = vmul.f32 0.25, %v3550_v18  ;;  %v3554_v22 = vadd.f32 %v3488_v2, %v3482_v59  ;;  %v3497_v60 = vadd.f32 %v4051_v14, %v3187_v41 }
 0x306   : > { %v1782_v8 = vpop.permute.xlu2 %1781  ;;  %v3555_v62 = vadd.f32 %v3489_v25, %v3483_v20  ;;  %v3589_v19 = vmul.f32 0.25, %v3553_v38  ;;  %v3096_v1 = vsel %vm3084_vm15, %v3055_v39, %v5830_v13  ;;  %v3556_v63 = vadd.f32 %v3496_v4, %v3490_v33  ;;  %v6313_v4 = vld [vmem:[#allocation9_spill] sm:$0xff] }
 0x307   : > { %v3588_v43 = vmul.f32 0.25, %v3552_v52  ;;  %v3660_v46 = vperm.slane %v3586_v28, 0  ;;  %v3057_v32 = vperm.slane %v5836_v34, 0  ;;  %v3091_v27 = vsel %vm3090_vm4, %v3050_v53, %v5779_v47  ;;  %v6314_v28 = vld [vmem:[#allocation12_spill] sm:$0xff] }
 0x308   : > { %v2020_v15 = vpop.permute.xlu1 %2019  ;;  %v3097_v50 = vsel %vm3086_vm2, %v3056_v58, %v3096_v1  ;;  %v3590_v39 = vmul.f32 0.25, %v3554_v22  ;;  %v3663_v6 = vperm.slane %v3589_v19, 0  ;;  %v3592_v24 = vmul.f32 0.25, %v3556_v63  ;;  %v6318_v1 = vld [vmem:[#allocation11_spill] sm:$0xff] }
 0x309   : > { %v2243_v9 = vsel %vm2220_vm11, %v2218_v42, %v2020_v15  ;;  %v4045_v42 = vrot.slane %v3184_v23, 9  ;;  %v3551_v15 = vadd.f32 %v3485_v31, %v3479_v35  ;;  %v3662_v41 = vperm.slane %v3588_v43, 0 }
 0x30a   : > { %v2280_v16 = vrot.slane %v2243_v9, 4  ;;  %2346 = vst [vmem:[#allocation1 + $0x1] ss:$2 sm:$0xff] %v2243_v9  ;;  %v2119_v9 = vsel %vm2095_vm6, %v2094_v17, %v1626_v57  ;;  %v3058_v35 = vperm.slane %v2985_v29, 0  ;;  %v3098_v55 = vsel %vm3088_vm3, %v3057_v32, %v3097_v50 }
 0x30b   : > { %v3587_v26 = vmul.f32 0.25, %v3551_v15  ;;  %v3491_v61 = vadd.f32 %v4045_v42, %v3184_v23  ;;  %v2986_v23 = vmul.f32 0.25, %v2950_v10  ;;  %v1866_v30 = vpop.permute.xlu0 %1865  ;;  %v3093_v58 = vsel %vm3092_vm5, %v3051_v37, %v3091_v27 }
 0x30c   : > { %2347 = vst [vmem:[#allocation1 + $0x10] ss:$2 sm:$0xff] %v2280_v16  ;;  %v3591_v16 = vmul.f32 0.25, %v3555_v62  ;;  %v3099_v54 = vsel %vm3090_vm4, %v3058_v35, %v3098_v55  ;;  %v3664_v42 = vperm.slane %v3590_v39, 0  ;;  %v5897_v18 = vmul.f32 %v5683_v48, %v2438_v0  ;;  %v6317_v62 = vld [vmem:[#allocation8_spill] sm:$0xff] }
 0x30d   : > { %v3661_v44 = vperm.slane %v3587_v26, 0  ;;  %v3557_v13 = vadd.f32 %v3497_v60, %v3491_v61  ;;  %v3059_v53 = vperm.slane %v2986_v23, 0  ;;  %v3666_v21 = vperm.slane %v3592_v24, 0  ;;  %v6315_v61 = vld [vmem:[#allocation13_spill] sm:$0xff] }
 0x30e   : > { %v2022_v59 = vpop.permute.xlu2 %2021  ;;  %v3665_v20 = vperm.slane %v3591_v16, 0  ;;  %v3185_v33 = vrot.slane %v6309_v5, 6  ;;  %v3186_v52 = vrot.slane %v6313_v4, 2  ;;  %v3188_v10 = vrot.slane %v6310_v49, 6 }
 0x30f   : > { %v3696_v56 = vsel %vm3080_vm13, %v3661_v44, %v3660_v46  ;;  %v5893_v2 = vmul.f32 0.25, %v3557_v13  ;;  %v3100_v57 = vsel %vm3092_vm5, %v3059_v53, %v3099_v54  ;;  %v3189_v26 = vrot.slane %v6314_v28, 2  ;;  %v6320_v13 = vld [vmem:[#allocation18_spill] sm:$0xff] }
 0x310   : > { %v1698_v51 = vpop.permute.xlu1 %1697  ;;  %v3697_v31 = vsel %vm3082_vm14, %v3662_v41, %v3696_v56  ;;  %v3190_v22 = vrot.slane %v6315_v61, 2  ;;  %v3191_v43 = vrot.slane %v6315_v61, 6  ;;  %v4046_v19 = vrot.slane %v6317_v62, 9 }
 0x311   : > { %v2349_v12 = vld.sshfl [vmem:[#allocation1] sm:$0xff pattern:$0x75316420]  ;;  %v2144_v7 = vsel %vm2120_vm7, %v2119_v9, %v1698_v51  ;;  %v2432_v40 = vpop.f32.mrf.mxu1  ;;  %v3698_v25 = vsel %vm3084_vm15, %v3663_v6, %v3697_v31  ;;  %v3667_v51 = vperm.slane %v5893_v2, 0  ;;  %v4047_v49 = vrot.slane %v3185_v33, 9 }
 0x312   : > { %3953 = vmatmul.msk.f32.gmra.mxu2 %vm2351_vm12, %v2349_v12  ;;  %v2169_v34 = vsel %vm2145_vm8, %v2144_v7, %v1782_v8  ;;  %v2472_v47 = vmul.f32 %v5683_v48, %v2432_v40  ;;  %v3699_v17 = vsel %vm3086_vm2, %v3664_v42, %v3698_v25  ;;  %v6316_v8 = vld [vmem:[#allocation16_spill] sm:$0xff]  ;;  %v4048_v46 = vrot.slane %v6313_v4, 9  ;;  %v6319_v40 = vld [vmem:[#allocation14_spill] sm:$0xff] }
 0x313   : > { %v2194_v14 = vsel %vm2170_vm9, %v2169_v34, %v1866_v30  ;;  %v3700_v29 = vsel %vm3088_vm3, %v3665_v20, %v3699_v17  ;;  %v3193_v12 = vrot.slane %v6316_v8, 2  ;;  %v3194_v60 = vrot.slane %v6316_v8, 6 }
 0x314   : > { %v5902_v37 = vadd.f32 %v5694_v11, %v2472_v47  ;;  %v3701_v5 = vsel %vm3090_vm4, %v3666_v21, %v3700_v29  ;;  %v4049_v9 = vrot.slane %v3186_v52, 9  ;;  %v4052_v63 = vrot.slane %v6318_v1, 9 }
 0x315   : > { %v4053_v44 = vrot.slane %v3188_v10, 9  ;;  %v4054_v7 = vrot.slane %v6314_v28, 9  ;;  %v4055_v23 = vrot.slane %v3189_v26, 9  ;;  %v4056_v32 = vrot.slane %v6315_v61, 9 }
 0x316   : > { %v4057_v41 = vrot.slane %v3190_v22, 9  ;;  %v4058_v27 = vrot.slane %v6319_v40, 9  ;;  %v4059_v35 = vrot.slane %v3191_v43, 9  ;;  %v4062_v50 = vrot.slane %v6316_v8, 9 }
 0x317   : > { %v4063_v39 = vrot.slane %v3193_v12, 9  ;;  %v4064_v16 = vrot.slane %v6320_v13, 9  ;;  %v4065_v6 = vrot.slane %v3194_v60, 9  ;;  %v3492_v56 = vadd.f32 %v4046_v19, %v6317_v62 }
 0x318   : > { %v1938_v36 = vpop.permute.xlu1 %1937  ;;  %v3493_v34 = vadd.f32 %v4047_v49, %v3185_v33  ;;  %v3494_v30 = vadd.f32 %v4048_v46, %v6313_v4  ;;  %v3495_v24 = vadd.f32 %v4049_v9, %v3186_v52  ;;  %v3498_v31 = vadd.f32 %v4052_v63, %v6318_v1 }
 0x319   : > { %v2219_v15 = vsel %vm2195_vm10, %v2194_v14, %v1938_v36  ;;  %v3499_v47 = vadd.f32 %v4053_v44, %v3188_v10  ;;  %v3500_v53 = vadd.f32 %v4054_v7, %v6314_v28  ;;  %v3501_v55 = vadd.f32 %v4055_v23, %v3189_v26 }
 0x31a   : > { %4027 = vmatmul.msk.f32.vlgmr.msrb.gmra.mxu2 %vm734_vm1, %v3093_v58  ;;  %v2244_v38 = vsel %vm2220_vm11, %v2219_v15, %v2022_v59  ;;  %v3502_v36 = vadd.f32 %v4056_v32, %v6315_v61  ;;  %v3503_v58 = vadd.f32 %v4057_v41, %v3190_v22  ;;  %v3504_v54 = vadd.f32 %v4058_v27, %v6319_v40 }
 0x31b   : > { %2348 = vst [vmem:[#allocation1 + $0x11] ss:$2 sm:$0xff] %v2244_v38  ;;  %v3505_v42 = vadd.f32 %v4059_v35, %v3191_v43  ;;  %v3508_v14 = vadd.f32 %v4062_v50, %v6316_v8  ;;  %v3509_v59 = vadd.f32 %v4063_v39, %v3193_v12  ;;  %v3510_v2 = vadd.f32 %v4064_v16, %v6320_v13 }
 0x31c   : > { %v3511_v20 = vadd.f32 %v4065_v6, %v3194_v60  ;;  %v3558_v25 = vadd.f32 %v3498_v31, %v3492_v56  ;;  %v3559_v15 = vadd.f32 %v3499_v47, %v3493_v34  ;;  %v3560_v21 = vadd.f32 %v3500_v53, %v3494_v30 }
 0x31d   : > { %v3562_v33 = vadd.f32 %v3508_v14, %v3502_v36  ;;  %v3563_v4 = vadd.f32 %v3509_v59, %v3503_v58  ;;  %v3564_v52 = vadd.f32 %v3510_v2, %v3504_v54  ;;  %v3702_v61 = vsel %vm3092_vm5, %v3667_v51, %v3701_v5 }
 0x31e   : > { %v3565_v38 = vadd.f32 %v3511_v20, %v3505_v42  ;;  %v3594_v17 = vmul.f32 0.25, %v3558_v25  ;;  %v3595_v10 = vmul.f32 0.25, %v3559_v15  ;;  %v3596_v28 = vmul.f32 0.25, %v3560_v21 }
 0x31f   : > { %v3598_v29 = vmul.f32 0.25, %v3562_v33  ;;  %v3599_v22 = vmul.f32 0.25, %v3563_v4  ;;  %v3600_v43 = vmul.f32 0.25, %v3564_v52  ;;  %v2496_v46 = vadd.f32 %v5694_v11, %v5897_v18 }
 0x320   : > { %v3668_v8 = vperm.slane %v3594_v17, 0  ;;  %v3601_v12 = vmul.f32 0.25, %v3565_v38  ;;  %v3669_v60 = vperm.slane %v3595_v10, 0  ;;  %v3670_v62 = vperm.slane %v3596_v28, 0 }
 0x321   : > { %v3672_v49 = vperm.slane %v3598_v29, 0  ;;  %v3673_v9 = vperm.slane %v3599_v22, 0  ;;  %v2564_v63 = vrot.slane %v5797_v3, 4  ;;  %v3674_v44 = vperm.slane %v3600_v43, 0 }
 0x322   : > { %4028 = vmatmul.msk.f32.gmra.mxu2 %vm734_vm1, %v3100_v57  ;;  %v2350_v0 = vld.sshfl [vmem:[#allocation1 + $0x10] sm:$0xff pattern:$0x75316420]  ;;  %v3561_v57 = vadd.f32 %v3501_v55, %v3495_v24  ;;  %v3703_v1 = vsel %vm3080_vm13, %v3669_v60, %v3668_v8  ;;  %v2565_v5 = vrot.slane %v5797_v3, 6  ;;  %v2512_v7 = vmax.f32 %v5902_v37, 0.0 }
 0x323   : > { %3954 = vmatmul.msk.f32.vlgmr.msrb.gmra.mxu3 %vm2351_vm12, %v2350_v0  ;;  %v3704_v51 = vsel %vm3082_vm14, %v3670_v62, %v3703_v1  ;;  %v3675_v23 = vperm.slane %v3601_v12, 0  ;;  %v2514_v18 = vmax.f32 %v2496_v46, 0.0  ;;  %v2560_v40 = vrot.slane %v5771_v45, 2 }
 0x324   : > { %v3597_v26 = vmul.f32 0.25, %v3561_v57  ;;  %v3989_v35 = vrot.slane %v2564_v63, 9  ;;  %v3990_v39 = vrot.slane %v2565_v5, 9  ;;  %v2567_v13 = vrot.slane %v2512_v7, 4 }
 0x325   : > { %v2568_v16 = vrot.slane %v2512_v7, 6  ;;  %v2572_v6 = vrot.slane %v2514_v18, 2  ;;  %v3983_v37 = vrot.slane %v5771_v45, 9  ;;  %v3984_v56 = vrot.slane %v2560_v40, 9 }
 0x326   : > { %v3671_v19 = vperm.slane %v3597_v26, 0  ;;  %v2897_v34 = vadd.f32 %v3989_v35, %v2564_v63  ;;  %v2898_v30 = vadd.f32 %v3990_v39, %v2565_v5  ;;  %v3993_v24 = vrot.slane %v2567_v13, 9 }
 0x327   : > { %v3994_v31 = vrot.slane %v2568_v16, 9  ;;  %v3999_v0 = vrot.slane %v2514_v18, 9  ;;  %v2891_v47 = vadd.f32 %v3983_v37, %v5771_v45  ;;  %v2892_v53 = vadd.f32 %v3984_v56, %v2560_v40 }
 0x328   : > { %v3705_v32 = vsel %vm3084_vm15, %v3671_v19, %v3704_v51  ;;  %v4000_v55 = vrot.slane %v2572_v6, 9  ;;  %v2901_v54 = vadd.f32 %v3993_v24, %v2567_v13  ;;  %v2573_v59 = vrot.slane %v2514_v18, 4 }
 0x329   : > { %v3706_v41 = vsel %vm3086_vm2, %v3672_v49, %v3705_v32  ;;  %v2951_v36 = vadd.f32 %v2897_v34, %v2891_v47  ;;  %v2952_v58 = vadd.f32 %v2898_v30, %v2892_v53  ;;  %v2902_v42 = vadd.f32 %v3994_v31, %v2568_v16  ;;  %v6324_v16 = vld [vmem:[#allocation27_spill] sm:$0xff]  ;;  %v6326_v34 = vld [vmem:[#allocation32_spill] sm:$0xff] }
 0x32a   : > { %v3707_v27 = vsel %vm3088_vm3, %v3673_v9, %v3706_v41  ;;  %v2907_v14 = vadd.f32 %v3999_v0, %v2514_v18  ;;  %v2574_v2 = vrot.slane %v2514_v18, 6  ;;  %v2908_v20 = vadd.f32 %v4000_v55, %v2572_v6  ;;  %v6323_v18 = vld [vmem:[#allocation23_spill] sm:$0xff]  ;;  %v6325_v6 = vld [vmem:[#allocation28_spill] sm:$0xff] }
 0x32b   : > { %4104 = vmatmul.msk.f32.vlgmr.msra.gmra.mxu3 %vm564_vm0, %v3702_v61  ;;  %v3708_v50 = vsel %vm3090_vm4, %v3674_v44, %v3707_v27  ;;  %v2566_v25 = vrot.slane %v2512_v7, 2  ;;  %v2987_v15 = vmul.f32 0.25, %v2951_v36  ;;  %v2988_v21 = vmul.f32 0.25, %v2952_v58 }
 0x32c   : > { %v3709_v3 = vsel %vm3092_vm5, %v3675_v23, %v3708_v50  ;;  %v2955_v33 = vadd.f32 %v2907_v14, %v2901_v54  ;;  %v2956_v4 = vadd.f32 %v2908_v20, %v2902_v42  ;;  %v3991_v38 = vrot.slane %v2512_v7, 9  ;;  %v6321_v23 = vld [vmem:[#allocation15_spill] sm:$0xff] }
 0x32d   : > { %v4001_v45 = vrot.slane %v2573_v59, 9  ;;  %v4002_v17 = vrot.slane %v2574_v2, 9  ;;  %v3992_v10 = vrot.slane %v2566_v25, 9  ;;  %v3060_v61 = vperm.slane %v2987_v15, 0 }
 0x32e   : > { %v5956_v26 = vmul.f32 0.25, %v2955_v33  ;;  %v5958_v29 = vmul.f32 0.25, %v2956_v4  ;;  %v3061_v22 = vperm.slane %v2988_v21, 0  ;;  %v2899_v8 = vadd.f32 %v3991_v38, %v2512_v7  ;;  %v6322_v7 = vld [vmem:[#allocation17_spill] sm:$0xff] }
 0x32f   : > { %v2909_v12 = vadd.f32 %v4001_v45, %v2573_v59  ;;  %v2910_v60 = vadd.f32 %v4002_v17, %v2574_v2  ;;  %v2900_v46 = vadd.f32 %v3992_v10, %v2566_v25  ;;  %v3192_v32 = vrot.slane %v6321_v23, 2  ;;  %v6327_v25 = vld [vmem:[#allocation24_spill] sm:$0xff]  ;;  %v6328_v10 = vld [vmem:[#allocation31_spill] sm:$0xff] }
 0x330   : > { %v3064_v9 = vperm.slane %v5956_v26, 0  ;;  %v3065_v1 = vperm.slane %v5958_v29, 0  ;;  %v3195_v41 = vrot.slane %v6322_v7, 2  ;;  %v3196_v40 = vrot.slane %v6323_v18, 2 }
 0x331   : > { %v3197_v27 = vrot.slane %v6323_v18, 6  ;;  %v3199_v37 = vrot.slane %v6325_v6, 2  ;;  %v3200_v56 = vrot.slane %v6325_v6, 6  ;;  %v3201_v30 = vrot.slane %v6326_v34, 2 }
 0x332   : > { %v4060_v53 = vrot.slane %v6321_v23, 9  ;;  %v4061_v55 = vrot.slane %v3192_v32, 9  ;;  %v4066_v36 = vrot.slane %v6322_v7, 9  ;;  %v4067_v58 = vrot.slane %v3195_v41, 9 }
 0x333   : > { %4105 = vmatmul.msk.f32.gmra.mxu3 %vm564_vm0, %v3709_v3  ;;  %v3198_v3 = vrot.slane %v6324_v16, 2  ;;  %v4068_v59 = vrot.slane %v6323_v18, 9  ;;  %v4069_v20 = vrot.slane %v3196_v40, 9  ;;  %v4070_v15 = vrot.slane %v6327_v25, 9 }
 0x334   : > { %v4071_v21 = vrot.slane %v3197_v27, 9  ;;  %v4074_v45 = vrot.slane %v6325_v6, 9  ;;  %v4075_v17 = vrot.slane %v3199_v37, 9  ;;  %v4077_v29 = vrot.slane %v3200_v56, 9 }
 0x335   : > { %v4073_v38 = vrot.slane %v3198_v3, 9  ;;  %vm3850_vm6 = vcmask 259072  }
 0x33f   : > { %v2435_v57 = vpop.f32.mrf.mxu1 }
 0x340   : > { %v2473_v52 = vmul.f32 %v5683_v48, %v2435_v57 }
 0x342   : > { %v2495_v28 = vadd.f32 %v5694_v11, %v2473_v52  ;;  %v3101_v11 = vsel %vm3080_vm13, %v3061_v22, %v3060_v61  ;;  %v4072_v52 = vrot.slane %v6324_v16, 9  ;;  %v4078_v61 = vrot.slane %v6326_v34, 9 }
 0x343   : > { %v4079_v22 = vrot.slane %v3201_v30, 9 }
 0x344   : > { %v2513_v43 = vmax.f32 %v2495_v28, 0.0  ;;  %v4076_v28 = vrot.slane %v6328_v10, 9 }
 0x346   : > { %v2570_v62 = vrot.slane %v2513_v43, 4  ;;  %v2571_v19 = vrot.slane %v2513_v43, 6  ;;  %v2569_v49 = vrot.slane %v2513_v43, 2  ;;  %v3995_v48 = vrot.slane %v2513_v43, 9 }
 0x348   : > { %v3997_v63 = vrot.slane %v2570_v62, 9  ;;  %v3998_v44 = vrot.slane %v2571_v19, 9  ;;  %v3996_v51 = vrot.slane %v2569_v49, 9  ;;  %v2903_v5 = vadd.f32 %v3995_v48, %v2513_v43 }
 0x349   : > { %v3515_v48 = vadd.f32 %v4069_v20, %v3196_v40  ;;  %v3524_v40 = vadd.f32 %v4078_v61, %v6326_v34 }
 0x34a   : > { %v2905_v35 = vadd.f32 %v3997_v63, %v2570_v62  ;;  %v2906_v50 = vadd.f32 %v3998_v44, %v2571_v19  ;;  %v2904_v39 = vadd.f32 %v3996_v51, %v2569_v49  ;;  %v2957_v13 = vadd.f32 %v2909_v12, %v2903_v5 }
 0x34b   : > { %v3507_v12 = vadd.f32 %v4061_v55, %v3192_v32  ;;  %v3513_v19 = vadd.f32 %v4067_v58, %v3195_v41  ;;  %v3514_v49 = vadd.f32 %v4068_v59, %v6323_v18  ;;  %v3517_v63 = vadd.f32 %v4071_v21, %v3197_v27 }
 0x34c   : > { %v2953_v24 = vadd.f32 %v2905_v35, %v2899_v8  ;;  %v2954_v31 = vadd.f32 %v2906_v50, %v2900_v46  ;;  %v2958_v0 = vadd.f32 %v2910_v60, %v2904_v39  ;;  %v2993_v47 = vmul.f32 0.25, %v2957_v13 }
 0x34d   : > { %v3506_v8 = vadd.f32 %v4060_v53, %v6321_v23  ;;  %v3512_v60 = vadd.f32 %v4066_v36, %v6322_v7  ;;  %v3518_v44 = vadd.f32 %v4072_v52, %v6324_v16  ;;  %v3519_v5 = vadd.f32 %v4073_v38, %v3198_v3  ;;  %v2441_v7 = vpop.f32.mrf.mxu2 }
 0x34e   : > { %v2989_v54 = vmul.f32 0.25, %v2953_v24  ;;  %v2990_v42 = vmul.f32 0.25, %v2954_v31  ;;  %v2994_v14 = vmul.f32 0.25, %v2958_v0  ;;  %v3066_v2 = vperm.slane %v2993_v47, 0 }
 0x34f   : > { %v3520_v23 = vadd.f32 %v4074_v45, %v6325_v6  ;;  %v3521_v32 = vadd.f32 %v4075_v17, %v3199_v37  ;;  %v3522_v41 = vadd.f32 %v4076_v28, %v6328_v10  ;;  %v3523_v18 = vadd.f32 %v4077_v29, %v3200_v56  ;;  %v6012_v10 = vld [vmem:[%s6183_s6] ss:$0 sm:$0xff] }
 0x350   : > { %v3062_v57 = vperm.slane %v2989_v54, 0  ;;  %v3063_v33 = vperm.slane %v2990_v42, 0  ;;  %v3067_v4 = vperm.slane %v2994_v14, 0  ;;  %v3566_v27 = vadd.f32 %v3512_v60, %v3506_v8 }
 0x351   : > { %v3567_v35 = vadd.f32 %v3513_v19, %v3507_v12  ;;  %v3568_v50 = vadd.f32 %v3520_v23, %v3514_v49  ;;  %v3569_v39 = vadd.f32 %v3521_v32, %v3515_v48  ;;  %v3571_v16 = vadd.f32 %v3523_v18, %v3517_v63 }
 0x352   : > { %v3102_v26 = vsel %vm3082_vm14, %v3062_v57, %v3101_v11  ;;  %v3516_v11 = vadd.f32 %v4070_v15, %v6327_v25  ;;  %v3572_v3 = vadd.f32 %v3524_v40, %v3518_v44  ;;  %v3602_v37 = vmul.f32 0.25, %v3566_v27 }
 0x353   : > { %v3103_v43 = vsel %vm3084_vm15, %v3063_v33, %v3102_v26  ;;  %v3603_v24 = vmul.f32 0.25, %v3567_v35  ;;  %v3604_v31 = vmul.f32 0.25, %v3568_v50  ;;  %v3605_v0 = vmul.f32 0.25, %v3569_v39  ;;  %v6002_v33 = vld [vmem:[%s6182_s5] ss:$0 sm:$0xff] }
 0x354   : > { %v3104_v62 = vsel %vm3086_vm2, %v3064_v9, %v3103_v43  ;;  %v3570_v13 = vadd.f32 %v3522_v41, %v3516_v11  ;;  %v3607_v53 = vmul.f32 0.25, %v3571_v16  ;;  %v3676_v56 = vperm.slane %v3602_v37, 0 }
 0x355   : > { %v3105_v46 = vsel %vm3088_vm3, %v3065_v1, %v3104_v62  ;;  %v3525_v1 = vadd.f32 %v4079_v22, %v3201_v30  ;;  %v3608_v55 = vmul.f32 0.25, %v3572_v3  ;;  %v3677_v34 = vperm.slane %v3603_v24, 0  ;;  %v2444_v54 = vpop.f32.mrf.mxu2 }
 0x356   : > { %v3106_v51 = vsel %vm3090_vm4, %v3066_v2, %v3105_v46  ;;  %v3606_v47 = vmul.f32 0.25, %v3570_v13  ;;  %v3678_v36 = vperm.slane %v3604_v31, 0  ;;  %v3679_v30 = vperm.slane %v3605_v0, 0 }
 0x357   : > { %v3107_v9 = vsel %vm3092_vm5, %v3067_v4, %v3106_v51  ;;  %v3573_v6 = vadd.f32 %v3525_v1, %v3519_v5  ;;  %v3681_v14 = vperm.slane %v3607_v53, 0  ;;  %v3710_v59 = vsel %vm3080_vm13, %v3677_v34, %v3676_v56 }
 0x358   : > { %4029 = vmatmul.msk.f32.gmra.mxu2 %vm734_vm1, %v3107_v9  ;;  %v3680_v42 = vperm.slane %v3606_v47, 0  ;;  %v3682_v2 = vperm.slane %v3608_v55, 0  ;;  %v3711_v20 = vsel %vm3082_vm14, %v3678_v36, %v3710_v59  ;;  %v2476_v4 = vmul.f32 %v6002_v33, %v2444_v54 }
 0x359   : > { %v3609_v58 = vmul.f32 0.25, %v3573_v6  ;;  %v3712_v15 = vsel %vm3084_vm15, %v3679_v30, %v3711_v20  ;;  %v2475_v17 = vmul.f32 %v6002_v33, %v2441_v7 }
 0x35a   : > { %v3713_v21 = vsel %vm3086_vm2, %v3680_v42, %v3712_v15  ;;  %v2498_v28 = vadd.f32 %v6012_v10, %v2476_v4 }
 0x35b   : > { %v3683_v25 = vperm.slane %v3609_v58, 0  ;;  %v3714_v57 = vsel %vm3088_vm3, %v3681_v14, %v3713_v21  ;;  %v2497_v29 = vadd.f32 %v6012_v10, %v2475_v17 }
 0x35c   : > { %v3715_v52 = vsel %vm3090_vm4, %v3682_v2, %v3714_v57  ;;  %v2516_v61 = vmax.f32 %v2498_v28, 0.0 }
 0x35d   : > { %v3716_v38 = vsel %vm3092_vm5, %v3683_v25, %v3715_v52  ;;  %v2447_v45 = vpop.f32.mrf.mxu2  ;;  %v2515_v43 = vmax.f32 %v2497_v29, 0.0 }
 0x35e   : > { %4106 = vmatmul.msk.f32.gmra.mxu3 %vm564_vm0, %v3716_v38  ;;  %v2477_v26 = vmul.f32 %v6002_v33, %v2447_v45  ;;  %v2579_v8 = vrot.slane %v2516_v61, 4  ;;  %v2580_v12 = vrot.slane %v2516_v61, 6  ;;  %v2578_v37 = vrot.slane %v2516_v61, 2 }
 0x35f   : > { %v2575_v62 = vrot.slane %v2515_v43, 2  ;;  %v2576_v19 = vrot.slane %v2515_v43, 4  ;;  %v4003_v11 = vrot.slane %v2515_v43, 9  ;;  %v2577_v44 = vrot.slane %v2515_v43, 6 }
 0x360   : > { %v2499_v22 = vadd.f32 %v6012_v10, %v2477_v26  ;;  %v4009_v49 = vrot.slane %v2579_v8, 9  ;;  %v4010_v48 = vrot.slane %v2580_v12, 9  ;;  %v4007_v0 = vrot.slane %v2516_v61, 9 }
 0x361   : > { %v4004_v51 = vrot.slane %v2575_v62, 9  ;;  %v4005_v5 = vrot.slane %v2576_v19, 9  ;;  %v2911_v41 = vadd.f32 %v4003_v11, %v2515_v43  ;;  %v4006_v1 = vrot.slane %v2577_v44, 9  ;;  %v6329_v43 = vld [vmem:[#allocation19_spill] sm:$0xff] }
 0x362   : > { %v2517_v60 = vmax.f32 %v2499_v22, 0.0  ;;  %v2917_v23 = vadd.f32 %v4009_v49, %v2579_v8  ;;  %v2918_v32 = vadd.f32 %v4010_v48, %v2580_v12  ;;  %v4008_v58 = vrot.slane %v2578_v37, 9 }
 0x363   : > { %v2912_v27 = vadd.f32 %v4004_v51, %v2575_v62  ;;  %v2913_v35 = vadd.f32 %v4005_v5, %v2576_v19  ;;  %v2914_v31 = vadd.f32 %v4006_v1, %v2577_v44  ;;  %v2915_v54 = vadd.f32 %v4007_v0, %v2516_v61  ;;  %v6331_v19 = vld [vmem:[#allocation26_spill] sm:$0xff] }
 0x364   : > { %v2581_v46 = vrot.slane %v2517_v60, 2  ;;  %v4011_v63 = vrot.slane %v2517_v60, 9  ;;  %v2582_v7 = vrot.slane %v2517_v60, 4  ;;  %v2959_v50 = vadd.f32 %v2917_v23, %v2911_v41  ;;  %v6334_v51 = vld [vmem:[#allocation22_spill] sm:$0xff] }
 0x365   : > { %v2583_v39 = vrot.slane %v2517_v60, 6  ;;  %v2960_v13 = vadd.f32 %v2918_v32, %v2912_v27  ;;  %v2916_v15 = vadd.f32 %v4008_v58, %v2578_v37  ;;  %v3202_v8 = vrot.slane %v6329_v43, 2 }
 0x366   : > { %v4012_v9 = vrot.slane %v2581_v46, 9  ;;  %v2919_v18 = vadd.f32 %v4011_v63, %v2517_v60  ;;  %v4013_v16 = vrot.slane %v2582_v7, 9  ;;  %v2995_v47 = vmul.f32 0.25, %v2959_v50  ;;  %v6330_v60 = vld [vmem:[#allocation25_spill] sm:$0xff]  ;;  %v6333_v63 = vld [vmem:[#allocation35_spill] sm:$0xff] }
 0x367   : > { %v4014_v53 = vrot.slane %v2583_v39, 9  ;;  %v2996_v56 = vmul.f32 0.25, %v2960_v13  ;;  %v3203_v12 = vrot.slane %v6329_v43, 6  ;;  %v3204_v62 = vrot.slane %v6330_v60, 2 }
 0x368   : > { %v2920_v3 = vadd.f32 %v4012_v9, %v2581_v46  ;;  %v2961_v24 = vadd.f32 %v2919_v18, %v2913_v35  ;;  %v2921_v34 = vadd.f32 %v4013_v16, %v2582_v7  ;;  %v3068_v14 = vperm.slane %v2995_v47, 0  ;;  %v6332_v46 = vld [vmem:[#allocation34_spill] sm:$0xff]  ;;  %v6335_v7 = vld [vmem:[#allocation20_spill] sm:$0xff]  ;;  %v6336_v35 = vld [vmem:[#allocation33_spill] sm:$0xff] }
 0x369   : > { %v2922_v42 = vadd.f32 %v4014_v53, %v2583_v39  ;;  %v3069_v25 = vperm.slane %v2996_v56, 0  ;;  %v3205_v49 = vrot.slane %v6331_v19, 2  ;;  %v3206_v48 = vrot.slane %v6331_v19, 6 }
 0x36a   : > { %v2962_v36 = vadd.f32 %v2920_v3, %v2914_v31  ;;  %v2997_v30 = vmul.f32 0.25, %v2961_v24  ;;  %v2963_v2 = vadd.f32 %v2921_v34, %v2915_v54  ;;  %v3207_v11 = vrot.slane %v6332_v46, 2 }
 0x36b   : > { %v2964_v57 = vadd.f32 %v2922_v42, %v2916_v15  ;;  %v3108_v45 = vsel %vm3080_vm13, %v3069_v25, %v3068_v14  ;;  %v3208_v44 = vrot.slane %v6333_v63, 2  ;;  %v3211_v5 = vrot.slane %v6334_v51, 2 }
 0x36c   : > { %v2998_v20 = vmul.f32 0.25, %v2962_v36  ;;  %v3070_v21 = vperm.slane %v2997_v30, 0  ;;  %v6023_v52 = vmul.f32 0.25, %v2963_v2  ;;  %v4080_v23 = vrot.slane %v6329_v43, 9 }
 0x36d   : > { %v6027_v28 = vmul.f32 0.25, %v2964_v57  ;;  %v4081_v32 = vrot.slane %v3202_v8, 9  ;;  %v4082_v9 = vrot.slane %v6335_v7, 9  ;;  %v4083_v41 = vrot.slane %v3203_v12, 9 }
 0x36e   : > { %v3071_v38 = vperm.slane %v2998_v20, 0  ;;  %v3109_v17 = vsel %vm3082_vm14, %v3070_v21, %v3108_v45  ;;  %v3072_v61 = vperm.slane %v6023_v52, 0  ;;  %v4084_v18 = vrot.slane %v6330_v60, 9  ;;  %v6094_v52 = vld [vmem:[%s6186_s9] ss:$0 sm:$0xff] }
 0x36f   : > { %v4086_v1 = vrot.slane %v6331_v19, 9  ;;  %v4087_v27 = vrot.slane %v3205_v49, 9  ;;  %v4088_v50 = vrot.slane %v6336_v35, 9  ;;  %v4089_v39 = vrot.slane %v3206_v48, 9 }
 0x370   : > { %v2450_v40 = vpop.f32.mrf.mxu2  ;;  %v6036_v22 = vsel %vm3084_vm15, %v3071_v38, %v3109_v17  ;;  %v4090_v13 = vrot.slane %v6332_v46, 9  ;;  %v4091_v16 = vrot.slane %v3207_v11, 9  ;;  %v4092_v3 = vrot.slane %v6333_v63, 9 }
 0x371   : > { %v2478_v6 = vmul.f32 %v6002_v33, %v2450_v40  ;;  %v4085_v40 = vrot.slane %v3204_v62, 9  ;;  %v4098_v37 = vrot.slane %v6334_v51, 9  ;;  %v4099_v24 = vrot.slane %v3211_v5, 9 }
 0x372   : > { %v3526_v0 = vadd.f32 %v4080_v23, %v6329_v43  ;;  %v3527_v47 = vadd.f32 %v4081_v32, %v3202_v8  ;;  %v3528_v53 = vadd.f32 %v4082_v9, %v6335_v7  ;;  %v3529_v56 = vadd.f32 %v4083_v41, %v3203_v12 }
 0x373   : > { %v2500_v55 = vadd.f32 %v6012_v10, %v2478_v6  ;;  %v4093_v6 = vrot.slane %v3208_v44, 9  ;;  %v3530_v34 = vadd.f32 %v4084_v18, %v6330_v60  ;;  %v3531_v36 = vadd.f32 %v4085_v40, %v3204_v62 }
 0x374   : > { %v3532_v58 = vadd.f32 %v4086_v1, %v6331_v19  ;;  %v3533_v30 = vadd.f32 %v4087_v27, %v3205_v49  ;;  %v3534_v54 = vadd.f32 %v4088_v50, %v6336_v35  ;;  %v3535_v42 = vadd.f32 %v4089_v39, %v3206_v48 }
 0x375   : > { %v6020_v59 = vmax.f32 %v2500_v55, 0.0  ;;  %v3536_v14 = vadd.f32 %v4090_v13, %v6332_v46  ;;  %v3537_v20 = vadd.f32 %v4091_v16, %v3207_v11  ;;  %v3538_v25 = vadd.f32 %v4092_v3, %v6333_v63 }
 0x376   : > { %v3539_v15 = vadd.f32 %v4093_v6, %v3208_v44  ;;  %v3544_v21 = vadd.f32 %v4098_v37, %v6334_v51  ;;  %v3545_v57 = vadd.f32 %v4099_v24, %v3211_v5  ;;  %v3574_v38 = vadd.f32 %v3532_v58, %v3526_v0  ;;  %v6077_v37 = vld [vmem:[%s6185_s8] ss:$0 sm:$0xff] }
 0x377   : > { %v2584_v4 = vrot.slane %v6020_v59, 2  ;;  %v4015_v26 = vrot.slane %v6020_v59, 9  ;;  %v3575_v45 = vadd.f32 %v3533_v30, %v3527_v47  ;;  %v3576_v43 = vadd.f32 %v3534_v54, %v3528_v53 }
 0x378   : > { %v3577_v8 = vadd.f32 %v3535_v42, %v3529_v56  ;;  %v3578_v12 = vadd.f32 %v3536_v14, %v3530_v34  ;;  %v3579_v60 = vadd.f32 %v3537_v20, %v3531_v36  ;;  %v3580_v62 = vadd.f32 %v3544_v21, %v3538_v25 }
 0x379   : > { %v6032_v29 = vrot.slane %v2584_v4, 9  ;;  %v3581_v19 = vadd.f32 %v3545_v57, %v3539_v15  ;;  %v3610_v49 = vmul.f32 0.25, %v3574_v38  ;;  %v3611_v11 = vmul.f32 0.25, %v3575_v45 }
 0x37a   : > { %v3612_v44 = vmul.f32 0.25, %v3576_v43  ;;  %v2923_v23 = vadd.f32 %v4015_v26, %v6020_v59  ;;  %v3613_v5 = vmul.f32 0.25, %v3577_v8  ;;  %v3614_v32 = vmul.f32 0.25, %v3578_v12 }
 0x37b   : > { %v3615_v7 = vmul.f32 0.25, %v3579_v60  ;;  %v3616_v18 = vmul.f32 0.25, %v3580_v62  ;;  %v3617_v40 = vmul.f32 0.25, %v3581_v19  ;;  %v3684_v1 = vperm.slane %v3610_v49, 0 }
 0x37c   : > { %v3685_v27 = vperm.slane %v3611_v11, 0  ;;  %v3686_v35 = vperm.slane %v3612_v44, 0  ;;  %v3687_v50 = vperm.slane %v3613_v5, 0  ;;  %v2924_v39 = vadd.f32 %v6032_v29, %v2584_v4  ;;  %v6337_v11 = vld [vmem:[#allocation21_spill] sm:$0xff] }
 0x37d   : > { %v3688_v3 = vperm.slane %v3614_v32, 0  ;;  %v2585_v26 = vrot.slane %v6020_v59, 4  ;;  %v2586_v6 = vrot.slane %v6020_v59, 6  ;;  %v3689_v24 = vperm.slane %v3615_v7, 0  ;;  %v6339_v32 = vld [vmem:[#allocation36_spill] sm:$0xff] }
 0x37e   : > { %v3690_v56 = vperm.slane %v3616_v18, 0  ;;  %v3073_v29 = vperm.slane %v6027_v28, 0  ;;  %v3111_v59 = vsel %vm3086_vm2, %v3072_v61, %v6036_v22  ;;  %v3210_v44 = vrot.slane %v6337_v11, 2 }
 0x37f   : > { %v4018_v28 = vrot.slane %v2586_v6, 9  ;;  %v4094_v7 = vrot.slane %v6339_v32, 9 }
 0x380   : > { %v3112_v15 = vsel %vm3088_vm3, %v3073_v29, %v3111_v59 }
 0x381   : > { %v2926_v62 = vadd.f32 %v4018_v28, %v2586_v6 }
 0x395   : > { %v2453_v31 = vpop.f32.mrf.mxu2 }
 0x396   : > { %v2479_v55 = vmul.f32 %v6002_v33, %v2453_v31  ;;  %v3717_v31 = vsel %vm3080_vm13, %v3685_v27, %v3684_v1 }
 0x397   : > { %v3718_v4 = vsel %vm3082_vm14, %v3686_v35, %v3717_v31  ;;  %v3540_v35 = vadd.f32 %v4094_v7, %v6339_v32 }
 0x398   : > { %v2501_v2 = vadd.f32 %v6012_v10, %v2479_v55  ;;  %v3691_v55 = vperm.slane %v3617_v40, 0  ;;  %v3719_v34 = vsel %vm3084_vm15, %v3687_v50, %v3718_v4 }
 0x399   : > { %v3720_v30 = vsel %vm3086_vm2, %v3688_v3, %v3719_v34 }
 0x39a   : > { %v6064_v17 = vmax.f32 %v2501_v2, 0.0  ;;  %v3721_v14 = vsel %vm3088_vm3, %v3689_v24, %v3720_v30  ;;  %v4017_v2 = vrot.slane %v2585_v26, 9 }
 0x39b   : > { %v3722_v20 = vsel %vm3090_vm4, %v3690_v56, %v3721_v14 }
 0x39c   : > { %v2588_v48 = vrot.slane %v6064_v17, 4  ;;  %v2589_v46 = vrot.slane %v6064_v17, 6  ;;  %v2587_v54 = vrot.slane %v6064_v17, 2  ;;  %v4019_v25 = vrot.slane %v6064_v17, 9 }
 0x39d   : > { %v3145_v0 = vpop.f32.mrf.mxu2  ;;  %v3723_v21 = vsel %vm3092_vm5, %v3691_v55, %v3722_v20  ;;  %v2925_v12 = vadd.f32 %v4017_v2, %v2585_v26 }
 0x39e   : > { %v4021_v9 = vrot.slane %v2588_v48, 9  ;;  %v4022_v41 = vrot.slane %v2589_v46, 9  ;;  %v3164_v42 = vmul.f32 %v6077_v37, %v3145_v0  ;;  %v4020_v57 = vrot.slane %v2587_v54, 9  ;;  %4107 = vmatmul.msk.f32.gmra.mxu3 %vm564_vm0, %v3723_v21 }
 0x39f   : > { %v2927_v19 = vadd.f32 %v4019_v25, %v6064_v17  ;;  %v6118_v17 = vld [vmem:[%s6188_s11] ss:$0 sm:$0xff] }
 0x3a0   : > { %v2929_v13 = vadd.f32 %v4021_v9, %v2588_v48  ;;  %v2930_v16 = vadd.f32 %v4022_v41, %v2589_v46  ;;  %v3173_v60 = vadd.f32 %v6094_v52, %v3164_v42  ;;  %v2928_v49 = vadd.f32 %v4020_v57, %v2587_v54  ;;  %v6340_v41 = vld [vmem:[#allocation29_spill] sm:$0xff] }
 0x3a1   : > { %v3209_v46 = vrot.slane %v6333_v63, 6  ;;  %v4096_v9 = vrot.slane %v6337_v11, 9  ;;  %v4100_v18 = vrot.slane %v6340_v41, 9  ;;  %v4097_v63 = vrot.slane %v3210_v44, 9 }
 0x3a2   : > { %v2965_v47 = vadd.f32 %v2929_v13, %v2923_v23  ;;  %v2966_v53 = vadd.f32 %v2930_v16, %v2924_v39  ;;  %v3212_v23 = vrot.slane %v6334_v51, 6  ;;  %v6126_v16 = vld [vmem:[%s6189_s12] ss:$0 sm:$0xff] }
 0x3a3   : > { %v3542_v50 = vadd.f32 %v4096_v9, %v6337_v11  ;;  %v3543_v31 = vadd.f32 %v4097_v63, %v3210_v44  ;;  %v3546_v0 = vadd.f32 %v4100_v18, %v6340_v41 }
 0x3a4   : > { %v3001_v36 = vmul.f32 0.25, %v2965_v47  ;;  %v3002_v58 = vmul.f32 0.25, %v2966_v53  ;;  %v4101_v1 = vrot.slane %v3212_v23, 9 }
 0x3a5   : > { %v3148_v14 = vpop.f32.mrf.mxu2 }
 0x3a6   : > { %v3074_v61 = vperm.slane %v3001_v36, 0  ;;  %v3075_v22 = vperm.slane %v3002_v58, 0  ;;  %v2456_v38 = vpop.f32.mrf.mxu3  ;;  %v3547_v47 = vadd.f32 %v4101_v1, %v3212_v23  ;;  %v3582_v36 = vadd.f32 %v3546_v0, %v3540_v35 }
 0x3a7   : > { %v2480_v43 = vmul.f32 %v6002_v33, %v2456_v38  ;;  %v6338_v33 = vld [vmem:[#allocation30_spill] sm:$0xff] }
 0x3a8   : > { %v3113_v45 = vsel %vm3090_vm4, %v3074_v61, %v3112_v15  ;;  %v3213_v5 = vrot.slane %v6338_v33, 2  ;;  %v4102_v27 = vrot.slane %v6338_v33, 9  ;;  %v3618_v38 = vmul.f32 0.25, %v3582_v36 }
 0x3a9   : > { %v3114_v8 = vsel %vm3092_vm5, %v3075_v22, %v3113_v45  ;;  %v2502_v48 = vadd.f32 %v6012_v10, %v2480_v43  ;;  %v4095_v10 = vrot.slane %v3209_v46, 9 }
 0x3aa   : > { %4030 = vmatmul.msk.f32.gmra.mxu2 %vm734_vm1, %v3114_v8  ;;  %v4103_v51 = vrot.slane %v3213_v5, 9  ;;  %v3548_v55 = vadd.f32 %v4102_v27, %v6338_v33  ;;  %v3165_v8 = vmul.f32 %v6077_v37, %v3148_v14 }
 0x3ab   : > { %v2520_v40 = vmax.f32 %v2502_v48, 0.0  ;;  %v3541_v24 = vadd.f32 %v4095_v10, %v3209_v46 }
 0x3ac   : > { %v3549_v34 = vadd.f32 %v4103_v51, %v3213_v5  ;;  %v3584_v61 = vadd.f32 %v3548_v55, %v3542_v50  ;;  %v3174_v18 = vadd.f32 %v6094_v52, %v3165_v8 }
 0x3ad   : > { %v2590_v39 = vrot.slane %v2520_v40, 2  ;;  %v4023_v13 = vrot.slane %v2520_v40, 9  ;;  %v2591_v3 = vrot.slane %v2520_v40, 4  ;;  %v2592_v26 = vrot.slane %v2520_v40, 6 }
 0x3ae   : > { %v3754_v6 = vpop.f32.mrf.mxu3  ;;  %v3583_v28 = vadd.f32 %v3547_v47, %v3541_v24  ;;  %v3585_v22 = vadd.f32 %v3549_v34, %v3543_v31  ;;  %v3620_v43 = vmul.f32 0.25, %v3584_v61 }
 0x3af   : > { %v3773_v53 = vmul.f32 %v6118_v17, %v3754_v6  ;;  %v4024_v56 = vrot.slane %v2590_v39, 9  ;;  %v4025_v4 = vrot.slane %v2591_v3, 9  ;;  %v4026_v29 = vrot.slane %v2592_v26, 9 }
 0x3b0   : > { %v2931_v59 = vadd.f32 %v4023_v13, %v2520_v40  ;;  %v3619_v45 = vmul.f32 0.25, %v3583_v28  ;;  %v3621_v33 = vmul.f32 0.25, %v3585_v22  ;;  %v3694_v41 = vperm.slane %v3620_v43, 0 }
 0x3b1   : > { %v3782_v58 = vadd.f32 %v6126_v16, %v3773_v53  ;;  %v2932_v30 = vadd.f32 %v4024_v56, %v2590_v39  ;;  %v2933_v54 = vadd.f32 %v4025_v4, %v2591_v3  ;;  %v2934_v42 = vadd.f32 %v4026_v29, %v2592_v26 }
 0x3b2   : > { %v2967_v2 = vadd.f32 %v2931_v59, %v2925_v12  ;;  %v3692_v12 = vperm.slane %v3618_v38, 0  ;;  %v3693_v5 = vperm.slane %v3619_v45, 0  ;;  %v3695_v10 = vperm.slane %v3621_v33, 0 }
 0x3b3   : > { %v3787_v20 = vadd.f32 %v3782_v58, %v3173_v60  ;;  %v2968_v25 = vadd.f32 %v2932_v30, %v2926_v62  ;;  %v2969_v15 = vadd.f32 %v2933_v54, %v2927_v19  ;;  %v2970_v21 = vadd.f32 %v2934_v42, %v2928_v49 }
 0x3b4   : > { %v3003_v57 = vmul.f32 0.25, %v2967_v2  ;;  %v3724_v63 = vsel %vm3080_vm13, %v3693_v5, %v3692_v12 }
 0x3b5   : > { %v3792_v48 = vmax.f32 %v3787_v20, 0.0  ;;  %v3004_v46 = vmul.f32 0.25, %v2968_v25  ;;  %v3005_v11 = vmul.f32 0.25, %v2969_v15  ;;  %v3006_v23 = vmul.f32 0.25, %v2970_v21 }
 0x3b6   : > { %v3757_v44 = vpop.f32.mrf.mxu3  ;;  %v3076_v19 = vperm.slane %v3003_v57, 0  ;;  %v3725_v51 = vsel %vm3082_vm14, %v3694_v41, %v3724_v63 }
 0x3b7   : > { %v3802_v32 = vrot.slane %v3792_v48, 2  ;;  %v3803_v7 = vrot.slane %v3792_v48, 4  ;;  %v3804_v60 = vrot.slane %v3792_v48, 6  ;;  %3815 = vst [vmem:[#allocation1] ss:$4 sm:$0xff] %v3792_v48  ;;  %v3774_v62 = vmul.f32 %v6118_v17, %v3757_v44 }
 0x3b8   : > { %v3077_v49 = vperm.slane %v3004_v46, 0  ;;  %v3078_v9 = vperm.slane %v3005_v11, 0  ;;  %v3079_v1 = vperm.slane %v3006_v23, 0  ;;  %v3726_v39 = vsel %vm3084_vm15, %v3695_v10, %v3725_v51 }
 0x3b9   : > { %3822 = vst [vmem:[#allocation1 + $0x20] ss:$4 sm:$0xff] %v3804_v60  ;;  %v3783_v40 = vadd.f32 %v6126_v16, %v3774_v62  ;;  %4108 = vmatmul.msk.f32.gmra.mxu3 %vm564_vm0, %v3726_v39 }
 0x3ba   : > { %3817 = vst [vmem:[#allocation1 + $0x1] ss:$4 sm:$0xff] %v3802_v32  ;;  %v3115_v27 = vsel %vm3080_vm13, %v3077_v49, %v3076_v19 }
 0x3bb   : > { %3819 = vst [vmem:[#allocation1 + $0x2] ss:$4 sm:$0xff] %v3803_v7  ;;  %v3788_v35 = vadd.f32 %v3783_v40, %v3174_v18  ;;  %v3116_v50 = vsel %vm3082_vm14, %v3078_v9, %v3115_v27 }
 0x3bc   : > { %v3117_v13 = vsel %vm3084_vm15, %v3079_v1, %v3116_v50 }
 0x3bd   : > { %v3793_v3 = vmax.f32 %v3788_v35, 0.0  ;;  %4031 = vmatmul.msk.f32.gmra.mxu2 %vm734_vm1, %v3117_v13 }
 0x3bf   : > { %v3805_v26 = vrot.slane %v3793_v3, 2  ;;  %v3806_v6 = vrot.slane %v3793_v3, 4  ;;  %3824 = vst [vmem:[#allocation1 + $0x21] ss:$4 sm:$0xff] %v3793_v3  ;;  %v3807_v24 = vrot.slane %v3793_v3, 6 }
 0x3c1   : > { %3826 = vst [vmem:[#allocation1 + $0x22] ss:$4 sm:$0xff] %v3805_v26 }
 0x3c2   : > { %v3820_v31 = vld.sshfl [vmem:[#allocation1] sm:$0xff pattern:$0x73625140] }
 0x3c3   : > { %3828 = vst [vmem:[#allocation1] ss:$4 sm:$0xff] %v3806_v6 }
 0x3c4   : > { %3829 = vst [vmem:[#allocation1 + $0x1] ss:$4 sm:$0xff] %v3807_v24 }
 0x3c5   : > { %3851 = vst.msk [vmem:[%s6148_s23] sm:$0x3f] %vm3850_vm6, %v3820_v31 }
 0x3c8   : > { %v3827_v0 = vld.sshfl [vmem:[#allocation1 + $0x20] sm:$0xff pattern:$0x73625140] }
 0x3c9   : > { %3852 = vst.msk [vmem:[%s6148_s23 + $0x8] sm:$0x3f] %vm3850_vm6, %v3827_v0 }
 0x3db   : > { %v3151_v47 = vpop.f32.mrf.mxu2 }
 0x3dc   : > { %v3166_v53 = vmul.f32 %v6077_v37, %v3151_v47 }
 0x3de   : > { %v3175_v4 = vadd.f32 %v6094_v52, %v3166_v53 }
 0x3e1   : > { %v3760_v56 = vpop.f32.mrf.mxu3 }
 0x3e2   : > { %v3775_v29 = vmul.f32 %v6118_v17, %v3760_v56 }
 0x3e4   : > { %v3784_v59 = vadd.f32 %v6126_v16, %v3775_v29 }
 0x3e6   : > { %v3789_v55 = vadd.f32 %v3784_v59, %v3175_v4 }
 0x3e8   : > { %v3794_v34 = vmax.f32 %v3789_v55, 0.0 }
 0x3ea   : > { %v3808_v36 = vrot.slane %v3794_v34, 2  ;;  %v3809_v58 = vrot.slane %v3794_v34, 4  ;;  %v3810_v30 = vrot.slane %v3794_v34, 6  ;;  %3830 = vst [vmem:[#allocation1 + $0x2] ss:$4 sm:$0xff] %v3794_v34 }
 0x3ec   : > { %3832 = vst [vmem:[#allocation1 + $0x20] ss:$4 sm:$0xff] %v3808_v36 }
 0x3ed   : > { %3833 = vst [vmem:[#allocation1 + $0x21] ss:$4 sm:$0xff] %v3809_v58 }
 0x3ee   : > { %3834 = vst [vmem:[#allocation1 + $0x22] ss:$4 sm:$0xff] %v3810_v30 }
 0x3f1   : > { %v3831_v54 = vld.sshfl [vmem:[#allocation1] sm:$0xff pattern:$0x73625140] }
 0x3f2   : > { %3853 = vst.msk [vmem:[%s6148_s23 + $0x10] sm:$0x3f] %vm3850_vm6, %v3831_v54 }
 0x3f5   : > { %v3835_v42 = vld.sshfl [vmem:[#allocation1 + $0x20] sm:$0xff pattern:$0x73625140] }
 0x3f6   : > { %3854 = vst.msk [vmem:[%s6148_s23 + $0x18] sm:$0x3f] %vm3850_vm6, %v3835_v42 }
 0x421   : > { %v3763_v14 = vpop.f32.mrf.mxu3 }
 0x422   : > { %v3776_v2 = vmul.f32 %v6118_v17, %v3763_v14 }
 0x424   : > { %v3785_v22 = vadd.f32 %v6126_v16, %v3776_v2 }
 0x42d   : > { %v3154_v28 = vpop.f32.mrf.mxu2 }
 0x42e   : > { %v3167_v61 = vmul.f32 %v6077_v37, %v3154_v28 }
 0x430   : > { %v3176_v20 = vadd.f32 %v6094_v52, %v3167_v61 }
 0x432   : > { %v3790_v25 = vadd.f32 %v3785_v22, %v3176_v20 }
 0x434   : > { %v3795_v15 = vmax.f32 %v3790_v25, 0.0 }
 0x436   : > { %v3811_v21 = vrot.slane %v3795_v15, 2  ;;  %v3812_v57 = vrot.slane %v3795_v15, 4  ;;  %v3813_v38 = vrot.slane %v3795_v15, 6  ;;  %3836 = vst [vmem:[#allocation1] ss:$4 sm:$0xff] %v3795_v15 }
 0x438   : > { %3837 = vst [vmem:[#allocation1 + $0x1] ss:$4 sm:$0xff] %v3811_v21 }
 0x439   : > { %3838 = vst [vmem:[#allocation1 + $0x2] ss:$4 sm:$0xff] %v3812_v57 }
 0x43a   : > { %3840 = vst [vmem:[#allocation1 + $0x20] ss:$4 sm:$0xff] %v3813_v38 }
 0x43c   : > { %v3766_v43 = vpop.f32.mrf.mxu3 }
 0x43d   : > { %v3777_v48 = vmul.f32 %v6118_v17, %v3766_v43 }
 0x43f   : > { %v3786_v11 = vadd.f32 %v6126_v16, %v3777_v48 }
 0x440   : > { %v3839_v45 = vld.sshfl [vmem:[#allocation1] sm:$0xff pattern:$0x73625140]  ;;  %v3157_v8 = vpop.f32.mrf.mxu2 }
 0x441   : > { %3855 = vst.msk [vmem:[%s6148_s23 + $0x20] sm:$0x3f] %vm3850_vm6, %v3839_v45  ;;  %v3168_v46 = vmul.f32 %v6077_v37, %v3157_v8 }
 0x443   : > { %v3177_v44 = vadd.f32 %v6094_v52, %v3168_v46 }
 0x445   : > { %v3791_v23 = vadd.f32 %v3786_v11, %v3177_v44 }
 0x447   : > { %v3796_v33 = vmax.f32 %v3791_v23, 0.0 }
 0x449   : > { %v3814_v12 = vrot.slane %v3796_v33, 2  ;;  %3841 = vst [vmem:[#allocation1 + $0x21] ss:$4 sm:$0xff] %v3796_v33 }
 0x44b   : > { %3842 = vst [vmem:[#allocation1 + $0x22] ss:$4 sm:$0xff] %v3814_v12 }
 0x452   : > { %v3843_v5 = vld.sshfl [vmem:[#allocation1 + $0x20] sm:$0xff pattern:$0x73625140] }
 0x453   : > { %3856 = vst.msk [vmem:[%s6148_s23 + $0x28] sm:$0x3f] %vm3850_vm6, %v3843_v5 }
 0x454 PF: > { %s23_s25 = sadd.s32 1, %s4166_s25  }
 0x455   : > { %p20_p4 = scmp.ge.s32.totalorder %s23_s25, 4  }
 0x457   :  { %22 = sbr.rel (!%p20_p4) target bundleno = 1 (0x1), region = 129 }

</bundles_post_ra>
